<compile_context>
chip_gen: v5e
topology: v5e:2x2
jax: 0.10.0
libtpu: 0.0.40
codegen_flags: <defaults>
</compile_context>

<pallas_src>
import functools

import jax
import jax.numpy as jnp
from jax import lax
from jax.experimental import pallas as pl
from jax.experimental.pallas import tpu as pltpu

# ----------------------------- configuration --------------------------------
INPUT_GLOBAL_DIM = 3
INPUT_VARIABLE_DIM = 4
INPUT_CLAUSE_DIM = 5
HIDDEN_DIMS = [32, 32, 32]            # 2 processing blocks, constant width (required by
                                      # `out = zeros_like(h)` in the torch block)
EDGE_DIM = 1
DISAMBIGUATE_FIRST = 2
TEMPERATURE = 4.0                     # Hyperparameters().temperature
NEWTON_ITERS = 10                     # torch runs <=100 with early break; with the
                                      # analytic init + residual freeze 10 clipped Newton
                                      # steps on 5 logits converge well past 1e-6.

NUM_VARIABLES = 6
NUM_REDUNDANT = 5
NUM_IRREDUNDANT = 5
NUM_NODES = NUM_VARIABLES + NUM_REDUNDANT + NUM_IRREDUNDANT
BATCH_GRAPHS = 8

assert all(d == HIDDEN_DIMS[0] for d in HIDDEN_DIMS)
assert EDGE_DIM == 1                  # kernel edge-attention term assumes scalar edges
HID = HIDDEN_DIMS[0]
NUM_BLOCKS = len(HIDDEN_DIMS) - 1
BLOCK_DISAMB = tuple(i < DISAMBIGUATE_FIRST for i in range(NUM_BLOCKS))
BLOCK_KS = tuple(3 if d else 2 for d in BLOCK_DISAMB)
XCOLS = max(INPUT_VARIABLE_DIM, INPUT_CLAUSE_DIM)


# ----------------------------- fused Pallas kernel ---------------------------
def _fused_forward_kernel(ex_ref, scal_ref, x_ref, gd_ref, ntc_ref, ntr_ref,
                          adj_ref, eattr_ref, w_emb_x_ref, w_emb_g_ref, b_emb_ref,
                          *rest, block_disamb, block_ks):
    """Whole CnfGraphModel forward for one graph per grid step; VMEM-resident."""
    nblk = len(block_ks)
    blk_refs = [rest[3 * b: 3 * b + 3] for b in range(nblk)]
    w_heads_ref = rest[3 * nblk]
    probs_ref, value_ref = rest[3 * nblk + 1], rest[3 * nblk + 2]

    gidx = pl.program_id(0)
    ex = ex_ref[gidx]                                       # SMEM scalar, per graph

    ntc = ntc_ref[0]                                        # (N, 3) one-hot, columns
    ntr = ntr_ref[0]                                        # (3, N) one-hot, lane rows
    adj = adj_ref[0]                                        # (N, N): adj[i,j]=1 iff j->i
    eattr = eattr_ref[0]                                    # (N, N) dense edge attr
    is_var = ntc[:, 0:1]                                    # (N, 1)
    edge_mask = adj > 0.0

    # ---- input embeddings: SiLU(x @ Wx + gd @ Wg + b), variable & clause paths packed.
    emb = (jnp.dot(x_ref[0].astype(jnp.bfloat16), w_emb_x_ref[...],
                   preferred_element_type=jnp.float32)
           + jnp.dot(gd_ref[0].astype(jnp.bfloat16), w_emb_g_ref[...],
                     preferred_element_type=jnp.float32)
           + b_emb_ref[...])                                # (N, 2*HID) f32
    emb = emb * jax.nn.sigmoid(emb)                         # SiLU
    h = is_var * emb[:, :HID] + (1.0 - is_var) * emb[:, HID:]       # (N, HID) f32

    neg_big = jnp.float32(-1e30)
    scal_base = 1                                           # scal[0] = value_fc_vars bias
    for bi in range(nblk):
        K = block_ks[bi]
        w_big_ref, a_src_ref, bias_ref = blk_refs[bi]
        h_bf = h.astype(jnp.bfloat16)
        # one packed matmul: h @ [W_0|..|W_{K-1} | Wres_0|..|Wres_{K-1} | a_dst cols]
        big = jnp.dot(h_bf, w_big_ref[...], preferred_element_type=jnp.float32)
        # all alpha_src rows in one (K,H)x(N,H) matmul -> (K, N), lane-major
        a_src_all = lax.dot_general(a_src_ref[...], h_bf, (((1,), (1,)), ((), ())),
                                    preferred_element_type=jnp.float32)

        out_acc = None
        for k in range(K):
            xl = big[:, k * HID:(k + 1) * HID]                       # (N, HID)  W_k h
            res = big[:, (K + k) * HID:(K + k + 1) * HID]            # (N, HID)  residual
            a_dst = big[:, 2 * K * HID + k: 2 * K * HID + k + 1]     # (N, 1)
            a_src = a_src_all[k:k + 1, :]                            # (1, N)
            raw = a_dst + a_src + eattr * scal_ref[scal_base + k]    # raw[i, j]
            raw = jnp.where(raw > 0, raw, 0.2 * raw)                 # LeakyReLU(0.2)
            masked = jnp.where(edge_mask, raw, neg_big)
            m = jnp.max(masked, axis=-1, keepdims=True)
            e = jnp.exp(masked - m)                                  # non-edges -> 0
            denom = jnp.maximum(jnp.sum(e, axis=-1, keepdims=True), jnp.float32(1e-20))
            attn = e * pl.reciprocal(denom, approx=True)             # EUP reciprocal
            part = (jnp.dot(attn.astype(jnp.bfloat16), xl.astype(jnp.bfloat16),
                            preferred_element_type=jnp.float32)
                    + res + bias_ref[k:k + 1, :])
            # per-node-type selection (matches the masked writes in the torch block)
            if block_disamb[bi]:
                sel = ntc[:, k:k + 1]                                # node_type == k
            else:
                sel = is_var if k == 0 else (1.0 - is_var)
            contrib = sel * part
            out_acc = contrib if out_acc is None else out_acc + contrib
        h = jnp.maximum(out_acc, 0.0)                                # ReLU
        scal_base += K

    # ---- heads: one (3,H)x(N,H) matmul -> lane-major rows
    heads = lax.dot_general(w_heads_ref[...], h.astype(jnp.bfloat16),
                            (((1,), (1,)), ((), ())),
                            preferred_element_type=jnp.float32)      # (3, N)
    is_var_r = ntr[0:1, :]
    is_red_r = ntr[1:2, :]
    logits = heads[0:1, :] * jnp.float32(TEMPERATURE)                # (1, N)

    # value = mean(cat(value_fc_variables(h_vars), value_fc_clauses(h_clauses)))
    bvv = scal_ref[0]
    v_vars = jnp.sum(heads[2:3, :] * is_var_r, axis=-1, keepdims=True)
    v_cls = jnp.sum(heads[1:2, :] * (1.0 - is_var_r), axis=-1, keepdims=True)
    value = (v_vars + v_cls + jnp.float32(NUM_VARIABLES) * bvv) / jnp.float32(NUM_NODES)
    value_ref[...] = value.reshape(1, 1, 1)

    # ---- ExpectedValueNormalizationLogits: Newton solve for a shared bias b such that
    #      sum_{redundant} sigmoid(logit + b) == ex.  Non-redundant lanes are pre-masked
    #      to -1e30 (sigmoid exactly 0) so no per-iteration masking is needed.
    mlog = jnp.where(is_red_r > 0, logits, neg_big)                  # (1, N)
    r_cnt = jnp.sum(is_red_r, axis=-1, keepdims=True)                # (1, 1)
    mean_red = (jnp.sum(logits * is_red_r, axis=-1, keepdims=True)
                / jnp.maximum(r_cnt, 1.0))
    ex_c = jnp.clip(ex, 1e-3, r_cnt - 1e-3)
    bshift = jnp.log(ex_c / (r_cnt - ex_c)) - mean_red               # analytic init
    for _ in range(NEWTON_ITERS):
        z = jax.nn.sigmoid(mlog + bshift)                            # (1, N)
        f = jnp.sum(z, axis=-1, keepdims=True) - ex
        fp = jnp.maximum(jnp.sum(z * (1.0 - z), axis=-1, keepdims=True),
                         jnp.float32(1e-12))
        diff = jnp.clip(f / fp, -2.0, 2.0)
        bshift = jnp.where(jnp.abs(f) < 1e-6, bshift, bshift - diff)  # freeze on residual
    probs_ref[...] = jax.nn.sigmoid(mlog + bshift).reshape(1, 1, NUM_NODES)


# ----------------------------- parameter packing -----------------------------
def pack_params(params):
    """One-time parameter algebra: pack/fold weights (bf16 at the MXU) for the kernel."""
    g = INPUT_GLOBAL_DIM
    wv, bv = params["variable_fc"]["w"], params["variable_fc"]["b"]
    wc, bc = params["clause_fc"]["w"], params["clause_fc"]["b"]
    w_var_x = jnp.concatenate(
        [wv[g:, :], jnp.zeros((XCOLS - INPUT_VARIABLE_DIM, HID), jnp.float32)], axis=0)
    w_cls_x = jnp.concatenate(
        [wc[g:, :], jnp.zeros((XCOLS - INPUT_CLAUSE_DIM, HID), jnp.float32)], axis=0)
    packed = {
        "w_emb_x": jnp.concatenate([w_var_x, w_cls_x], axis=1).astype(jnp.bfloat16),
        "w_emb_g": jnp.concatenate([wv[:g, :], wc[:g, :]], axis=1).astype(jnp.bfloat16),
        "b_emb": jnp.concatenate([bv, bc], axis=1),                      # (1, 2H) f32
        "w_heads": jnp.concatenate([params["output_fc"]["w"].T,
                                    params["value_fc_clauses"]["w"].T,
                                    params["value_fc_variables"]["w"].T],
                                   axis=0).astype(jnp.bfloat16),         # (3, H)
        "blocks": [],
    }
    scal_parts = [params["value_fc_variables"]["b"].reshape(1)]          # [bvv]
    for blk in params["blocks"]:
        if blk["disambiguate"]:
            convs = [blk["conv_variables"], blk["conv_redundant"], blk["conv_irredundant"]]
        else:
            convs = [blk["conv_variables"], blk["conv_clauses"]]
        # [W_0|..|W_{K-1} | Wres_0|..|Wres_{K-1} | (W_k att_dst^T) columns]
        w_big = jnp.concatenate([c["w"] for c in convs]
                                + [c["w_res"] for c in convs]
                                + [c["w"] @ c["att_dst"].T for c in convs],
                                axis=1).astype(jnp.bfloat16)             # (H, 2KH + K)
        a_src = jnp.concatenate([(c["w"] @ c["att_src"].T).T for c in convs],
                                axis=0).astype(jnp.bfloat16)             # (K, H)
        bias = jnp.concatenate([c["bias"] for c in convs], axis=0)       # (K, H) f32
        packed["blocks"].append((w_big, a_src, bias))
        for c in convs:                                                  # lin_edge.att_edge
            scal_parts.append(jnp.sum(c["w_edge"] * c["att_edge"], axis=1))  # (EDGE_DIM,)
    packed["scal"] = jnp.concatenate(scal_parts, axis=0).astype(jnp.float32)
    return packed


# ----------------------------- model forward (batched) ----------------------
def cnf_graph_model_forward(packed, batch, ex):
    """Batched forward: `batch` holds (B, ...) stacked dense graphs, `ex` is (B,)."""
    B = batch["x"].shape[0]
    graph_inputs = [batch["x"], batch["gd"], batch["ntype_col"], batch["ntype_row"],
                    batch["adj"], batch["eattr"]]
    weight_inputs = [packed["w_emb_x"], packed["w_emb_g"], packed["b_emb"]]
    for blk in packed["blocks"]:
        weight_inputs.extend(blk)
    weight_inputs.append(packed["w_heads"])

    def graph_spec(arr):                       # one block per graph along the batch axis
        dims = arr.shape[1:]
        return pl.BlockSpec((1,) + dims,
                            lambda b, ex_r, sc_r, _nd=len(dims): (b,) + (0,) * _nd)

    def const_spec(arr):                       # grid-invariant (fetched once, resident)
        return pl.BlockSpec(arr.shape,
                            lambda b, ex_r, sc_r, _nd=arr.ndim: (0,) * _nd)

    grid_spec = pltpu.PrefetchScalarGridSpec(
        num_scalar_prefetch=2,                 # ex (B,), scal (S,) land in SMEM
        grid=(B,),
        in_specs=[graph_spec(a) for a in graph_inputs]
                 + [const_spec(a) for a in weight_inputs],
        out_specs=(pl.BlockSpec((1, 1, NUM_NODES), lambda b, ex_r, sc_r: (b, 0, 0)),
                   pl.BlockSpec((1, 1, 1), lambda b, ex_r, sc_r: (b, 0, 0))),
    )
    probs_rows, values = pl.pallas_call(
        functools.partial(_fused_forward_kernel,
                          block_disamb=BLOCK_DISAMB, block_ks=BLOCK_KS),
        grid_spec=grid_spec,
        out_shape=(jax.ShapeDtypeStruct((B, 1, NUM_NODES), jnp.float32),
                   jax.ShapeDtypeStruct((B, 1, 1), jnp.float32)),
        compiler_params=pltpu.CompilerParams(dimension_semantics=("parallel",)),
    )(jnp.asarray(ex, jnp.float32).reshape(B), packed["scal"],
      *graph_inputs, *weight_inputs)

    probs = probs_rows[:, 0, NUM_VARIABLES:NUM_VARIABLES + NUM_REDUNDANT]
    return probs, values[:, 0, 0]


# ----------------------------- parameter init -------------------------------
def _init_linear(key, din, dout, bias=True):
    k1, k2 = jax.random.split(key)
    w = jax.random.normal(k1, (din, dout), jnp.float32) / jnp.sqrt(jnp.float32(din))
    b = (jax.random.normal(k2, (1, dout), jnp.float32) * 0.1
         if bias else jnp.zeros((1, dout), jnp.float32))
    return {"w": w, "b": b}


def _init_gat(key, cin, cout, edge_dim):
    ks = jax.random.split(key, 6)
    s = 1.0 / jnp.sqrt(jnp.float32(cin))
    return {
        "w": jax.random.normal(ks[0], (cin, cout), jnp.float32) * s,
        "att_src": jax.random.normal(ks[1], (1, cout), jnp.float32) * 0.1,
        "att_dst": jax.random.normal(ks[2], (1, cout), jnp.float32) * 0.1,
        "att_edge": jax.random.normal(ks[3], (1, cout), jnp.float32) * 0.1,
        "w_edge": jax.random.normal(ks[4], (edge_dim, cout), jnp.float32),
        "w_res": jax.random.normal(ks[5], (cin, cout), jnp.float32) * s,
        "bias": jnp.zeros((1, cout), jnp.float32),
    }


def init_params(key):
    keys = jax.random.split(key, 6 + 4 * (len(HIDDEN_DIMS) - 1))
    params = {
        "variable_fc": _init_linear(keys[0], INPUT_GLOBAL_DIM + INPUT_VARIABLE_DIM,
                                    HIDDEN_DIMS[0]),
        "clause_fc": _init_linear(keys[1], INPUT_GLOBAL_DIM + INPUT_CLAUSE_DIM,
                                  HIDDEN_DIMS[0]),
        "output_fc": _init_linear(keys[2], HIDDEN_DIMS[-1], 1, bias=False),
        "value_fc_clauses": _init_linear(keys[3], HIDDEN_DIMS[-1], 1, bias=False),
        "value_fc_variables": _init_linear(keys[4], HIDDEN_DIMS[-1], 1, bias=True),
        "blocks": [],
    }
    kidx = 5
    for i in range(len(HIDDEN_DIMS) - 1):
        cin, cout = HIDDEN_DIMS[i], HIDDEN_DIMS[i + 1]
        disamb = i < DISAMBIGUATE_FIRST
        blk = {"disambiguate": disamb,
               "conv_variables": _init_gat(keys[kidx], cin, cout, EDGE_DIM)}
        if disamb:
            blk["conv_redundant"] = _init_gat(keys[kidx + 1], cin, cout, EDGE_DIM)
            blk["conv_irredundant"] = _init_gat(keys[kidx + 2], cin, cout, EDGE_DIM)
        else:
            blk["conv_clauses"] = _init_gat(keys[kidx + 1], cin, cout, EDGE_DIM)
        kidx += 4
        params["blocks"].append(blk)
    return params


# ----------------------------- graph construction ---------------------------
def make_graph(key):
    kx, kg, kc, ka1, ka2 = jax.random.split(key, 5)
    n, v = NUM_NODES, NUM_VARIABLES
    c = n - v
    x = jax.random.normal(kx, (n, XCOLS), jnp.float32)
    global_data = jax.random.normal(kg, (INPUT_GLOBAL_DIM,), jnp.float32)
    node_type = jnp.concatenate([
        jnp.zeros((NUM_VARIABLES,), jnp.int32),
        jnp.ones((NUM_REDUNDANT,), jnp.int32),
        jnp.full((NUM_IRREDUNDANT,), 2, jnp.int32)])

    # bipartite variable<->clause edges (both directions), dense representation
    conn = jax.random.bernoulli(kc, 0.5, (c, v)).astype(jnp.float32)     # clause x var
    attr_v2c = jax.random.normal(ka1, (c, v), jnp.float32) * conn
    attr_c2v = jax.random.normal(ka2, (c, v), jnp.float32) * conn

    adj0 = jnp.zeros((n, n), jnp.float32)
    adj0 = adj0.at[v:, :v].set(conn)          # edge var j -> clause i
    adj0 = adj0.at[:v, v:].set(conn.T)        # edge clause j -> var i
    eattr0 = jnp.zeros((EDGE_DIM, n, n), jnp.float32)
    eattr0 = eattr0.at[0, v:, :v].set(attr_v2c)
    eattr0 = eattr0.at[0, :v, v:].set(attr_c2v.T)

    # GATConv default: remove + add self-loops with edge_attr fill_value='mean'
    deg_in = adj0.sum(axis=1)                                            # (N,)
    loop_attr = jnp.where(deg_in[None, :] > 0,
                          eattr0.sum(axis=2) / jnp.maximum(deg_in[None, :], 1.0),
                          0.0)                                           # (edge_dim, N)
    idx = jnp.arange(n)
    adj = adj0 + jnp.eye(n, dtype=jnp.float32)
    eattr = eattr0.at[:, idx, idx].set(loop_attr)

    return {"x": x, "global_data": global_data, "node_type": node_type,
            "adj": adj, "edge_attr_dense": eattr}


def make_batch(key, batch_size):
    keys = jax.random.split(key, batch_size)
    graphs = jax.vmap(make_graph)(keys)
    onehot = jax.nn.one_hot(graphs["node_type"], 3, dtype=jnp.float32)   # (B, N, 3)
    return {
        "x": graphs["x"],                                                # (B, N, XCOLS)
        "gd": graphs["global_data"].reshape(batch_size, 1, INPUT_GLOBAL_DIM),
        "ntype_col": onehot,                                             # (B, N, 3)
        "ntype_row": jnp.transpose(onehot, (0, 2, 1)),                   # (B, 3, N)
        "adj": graphs["adj"],                                            # (B, N, N)
        "eattr": graphs["edge_attr_dense"][:, 0],                        # (B, N, N)
    }


# ----------------------------- main ------------------------------------------
if __name__ == "__main__":
    key = jax.random.PRNGKey(0)
    kp, kg = jax.random.split(key)
    params = init_params(kp)
    packed = pack_params(params)          # one-time parameter packing for the fused kernel
    batch = make_batch(kg, BATCH_GRAPHS)
    # per-graph expected number of redundant clauses to keep (normalization target)
    ex = jnp.clip(0.5 + 0.5 * jnp.arange(BATCH_GRAPHS, dtype=jnp.float32),
                  0.25, NUM_REDUNDANT - 0.25)

    fwd = jax.jit(functools.partial(cnf_graph_model_forward, packed))
    probs, value = fwd(batch, ex)
    probs, value = jax.block_until_ready((probs, value))

    assert probs.shape == (BATCH_GRAPHS, NUM_REDUNDANT)
    assert value.shape == (BATCH_GRAPHS,)
    assert not bool(jnp.isnan(probs).any()), "probs contain NaN"
    assert not bool(jnp.isnan(value).any()), "value contains NaN"
    # The expected-value normalization targets sum(probs) == ex for every graph.
    err = float(jnp.max(jnp.abs(jnp.sum(probs, axis=-1) - ex)))
    assert err < 0.1, f"expected-value normalization off by {err}"
    print("KERNEL_OK")
</pallas_src>

<mosaic_0001>
module attributes {stable_mosaic.version = 11 : i64} {
  func.func @_fused_forward_kernel(%arg0: i32, %arg1: memref<8xf32, #tpu.memory_space<smem>>, %arg2: memref<7xf32, #tpu.memory_space<smem>>, %arg3: memref<1x16x5xf32, #tpu.memory_space<vmem>>, %arg4: memref<1x1x3xf32, #tpu.memory_space<vmem>>, %arg5: memref<1x16x3xf32, #tpu.memory_space<vmem>>, %arg6: memref<1x3x16xf32, #tpu.memory_space<vmem>>, %arg7: memref<1x16x16xf32, #tpu.memory_space<vmem>>, %arg8: memref<1x16x16xf32, #tpu.memory_space<vmem>>, %arg9: memref<5x64xbf16, #tpu.memory_space<vmem>>, %arg10: memref<3x64xbf16, #tpu.memory_space<vmem>>, %arg11: memref<1x64xf32, #tpu.memory_space<vmem>>, %arg12: memref<32x195xbf16, #tpu.memory_space<vmem>>, %arg13: memref<3x32xbf16, #tpu.memory_space<vmem>>, %arg14: memref<3x32xf32, #tpu.memory_space<vmem>>, %arg15: memref<32x195xbf16, #tpu.memory_space<vmem>>, %arg16: memref<3x32xbf16, #tpu.memory_space<vmem>>, %arg17: memref<3x32xf32, #tpu.memory_space<vmem>>, %arg18: memref<3x32xbf16, #tpu.memory_space<vmem>>, %arg19: memref<1x1x16xf32, #tpu.memory_space<vmem>>, %arg20: memref<1x1x1xf32, #tpu.memory_space<vmem>>) attributes {dimension_semantics = [#tpu.dimension_semantics<parallel>], iteration_bounds = array<i64: 8>, scalar_prefetch = 2 : i64, scratch_operands = 0 : i64, tpu.core_type = #tpu.core_type<tc>, window_params = [{transform_indices = @transform_0, window_bounds = array<i64: 1, 16, 5>}, {transform_indices = @transform_1, window_bounds = array<i64: 1, 1, 3>}, {transform_indices = @transform_2, window_bounds = array<i64: 1, 16, 3>}, {transform_indices = @transform_3, window_bounds = array<i64: 1, 3, 16>}, {transform_indices = @transform_4, window_bounds = array<i64: 1, 16, 16>}, {transform_indices = @transform_5, window_bounds = array<i64: 1, 16, 16>}, {pipeline_mode = #tpu.pipeline_mode<synchronous>, transform_indices = @transform_6, window_bounds = array<i64: 5, 64>}, {pipeline_mode = #tpu.pipeline_mode<synchronous>, transform_indices = @transform_7, window_bounds = array<i64: 3, 64>}, {pipeline_mode = #tpu.pipeline_mode<synchronous>, transform_indices = @transform_8, window_bounds = array<i64: 1, 64>}, {pipeline_mode = #tpu.pipeline_mode<synchronous>, transform_indices = @transform_9, window_bounds = array<i64: 32, 195>}, {pipeline_mode = #tpu.pipeline_mode<synchronous>, transform_indices = @transform_10, window_bounds = array<i64: 3, 32>}, {pipeline_mode = #tpu.pipeline_mode<synchronous>, transform_indices = @transform_11, window_bounds = array<i64: 3, 32>}, {pipeline_mode = #tpu.pipeline_mode<synchronous>, transform_indices = @transform_12, window_bounds = array<i64: 32, 195>}, {pipeline_mode = #tpu.pipeline_mode<synchronous>, transform_indices = @transform_13, window_bounds = array<i64: 3, 32>}, {pipeline_mode = #tpu.pipeline_mode<synchronous>, transform_indices = @transform_14, window_bounds = array<i64: 3, 32>}, {pipeline_mode = #tpu.pipeline_mode<synchronous>, transform_indices = @transform_15, window_bounds = array<i64: 3, 32>}, {transform_indices = @transform_16, window_bounds = array<i64: 1, 1, 16>}, {transform_indices = @transform_17, window_bounds = array<i64: 1, 1, 1>}]} {
    %0 = arith.index_cast %arg0 : i32 to index
    %1 = memref.load %arg1[%0] : memref<8xf32, #tpu.memory_space<smem>>
    %c0 = arith.constant 0 : index
    %c0_0 = arith.constant 0 : index
    %c0_1 = arith.constant 0 : index
    %2 = vector.load %arg5[%c0, %c0_0, %c0_1] : memref<1x16x3xf32, #tpu.memory_space<vmem>>, vector<1x16x3xf32>
    %3 = vector.shape_cast %2 : vector<1x16x3xf32> to vector<16x3xf32>
    %c0_2 = arith.constant 0 : index
    %c0_3 = arith.constant 0 : index
    %c0_4 = arith.constant 0 : index
    %4 = vector.load %arg6[%c0_2, %c0_3, %c0_4] : memref<1x3x16xf32, #tpu.memory_space<vmem>>, vector<1x3x16xf32>
    %5 = vector.shape_cast %4 : vector<1x3x16xf32> to vector<3x16xf32>
    %c0_5 = arith.constant 0 : index
    %c0_6 = arith.constant 0 : index
    %c0_7 = arith.constant 0 : index
    %6 = vector.load %arg7[%c0_5, %c0_6, %c0_7] : memref<1x16x16xf32, #tpu.memory_space<vmem>>, vector<1x16x16xf32>
    %7 = vector.shape_cast %6 : vector<1x16x16xf32> to vector<16x16xf32>
    %c0_8 = arith.constant 0 : index
    %c0_9 = arith.constant 0 : index
    %c0_10 = arith.constant 0 : index
    %8 = vector.load %arg8[%c0_8, %c0_9, %c0_10] : memref<1x16x16xf32, #tpu.memory_space<vmem>>, vector<1x16x16xf32>
    %9 = vector.shape_cast %8 : vector<1x16x16xf32> to vector<16x16xf32>
    %10 = vector.extract_strided_slice %3 {offsets = [0, 0], sizes = [16, 1], strides = [1, 1]} : vector<16x3xf32> to vector<16x1xf32>
    %cst = arith.constant 0.000000e+00 : f32
    %11 = vector.broadcast %cst : f32 to vector<16x16xf32>
    %12 = arith.cmpf ogt, %7, %11 : vector<16x16xf32>
    %c0_11 = arith.constant 0 : index
    %c0_12 = arith.constant 0 : index
    %c0_13 = arith.constant 0 : index
    %13 = vector.load %arg3[%c0_11, %c0_12, %c0_13] : memref<1x16x5xf32, #tpu.memory_space<vmem>>, vector<1x16x5xf32>
    %14 = vector.shape_cast %13 : vector<1x16x5xf32> to vector<16x5xf32>
    %15 = arith.truncf %14 : vector<16x5xf32> to vector<16x5xbf16>
    %c0_14 = arith.constant 0 : index
    %c0_15 = arith.constant 0 : index
    %16 = vector.load %arg9[%c0_14, %c0_15] : memref<5x64xbf16, #tpu.memory_space<vmem>>, vector<5x64xbf16>
    %cst_16 = arith.constant dense<0.000000e+00> : vector<16x64xf32>
    %17 = tpu.matmul %15, %16, %cst_16 {dimension_numbers = #tpu.dot_dimension_numbers<[1], [0], [0], [1], [0, 0, 1, 1], [], []>} : vector<16x5xbf16>, vector<5x64xbf16>, vector<16x64xf32> -> vector<16x64xf32>
    %c0_17 = arith.constant 0 : index
    %c0_18 = arith.constant 0 : index
    %c0_19 = arith.constant 0 : index
    %18 = vector.load %arg4[%c0_17, %c0_18, %c0_19] : memref<1x1x3xf32, #tpu.memory_space<vmem>>, vector<1x1x3xf32>
    %19 = vector.shape_cast %18 : vector<1x1x3xf32> to vector<1x3xf32>
    %20 = arith.truncf %19 : vector<1x3xf32> to vector<1x3xbf16>
    %c0_20 = arith.constant 0 : index
    %c0_21 = arith.constant 0 : index
    %21 = vector.load %arg10[%c0_20, %c0_21] : memref<3x64xbf16, #tpu.memory_space<vmem>>, vector<3x64xbf16>
    %cst_22 = arith.constant dense<0.000000e+00> : vector<1x64xf32>
    %22 = tpu.matmul %20, %21, %cst_22 {dimension_numbers = #tpu.dot_dimension_numbers<[1], [0], [0], [1], [0, 0, 1, 1], [], []>} : vector<1x3xbf16>, vector<3x64xbf16>, vector<1x64xf32> -> vector<1x64xf32>
    %23 = vector.broadcast %22 : vector<1x64xf32> to vector<16x64xf32>
    %24 = arith.addf %17, %23 : vector<16x64xf32>
    %c0_23 = arith.constant 0 : index
    %c0_24 = arith.constant 0 : index
    %25 = vector.load %arg11[%c0_23, %c0_24] : memref<1x64xf32, #tpu.memory_space<vmem>>, vector<1x64xf32>
    %26 = vector.broadcast %25 : vector<1x64xf32> to vector<16x64xf32>
    %27 = arith.addf %24, %26 : vector<16x64xf32>
    %28 = arith.negf %27 : vector<16x64xf32>
    %29 = math.exp %28 : vector<16x64xf32>
    %cst_25 = arith.constant 1.000000e+00 : f32
    %30 = vector.broadcast %cst_25 : f32 to vector<16x64xf32>
    %31 = arith.addf %30, %29 : vector<16x64xf32>
    %32 = arith.divf %30, %31 : vector<16x64xf32>
    %33 = arith.mulf %27, %32 : vector<16x64xf32>
    %34 = vector.extract_strided_slice %33 {offsets = [0, 0], sizes = [16, 32], strides = [1, 1]} : vector<16x64xf32> to vector<16x32xf32>
    %35 = vector.broadcast %10 : vector<16x1xf32> to vector<16x32xf32>
    %36 = arith.mulf %35, %34 : vector<16x32xf32>
    %cst_26 = arith.constant 1.000000e+00 : f32
    %37 = vector.broadcast %cst_26 : f32 to vector<16x1xf32>
    %38 = arith.subf %37, %10 : vector<16x1xf32>
    %39 = vector.extract_strided_slice %33 {offsets = [0, 32], sizes = [16, 32], strides = [1, 1]} : vector<16x64xf32> to vector<16x32xf32>
    %40 = vector.broadcast %38 : vector<16x1xf32> to vector<16x32xf32>
    %41 = arith.mulf %40, %39 : vector<16x32xf32>
    %42 = arith.addf %36, %41 : vector<16x32xf32>
    %43 = arith.truncf %42 : vector<16x32xf32> to vector<16x32xbf16>
    %c0_27 = arith.constant 0 : index
    %c0_28 = arith.constant 0 : index
    %44 = vector.load %arg12[%c0_27, %c0_28] : memref<32x195xbf16, #tpu.memory_space<vmem>>, vector<32x195xbf16>
    %cst_29 = arith.constant dense<0.000000e+00> : vector<16x195xf32>
    %45 = tpu.matmul %43, %44, %cst_29 {dimension_numbers = #tpu.dot_dimension_numbers<[1], [0], [0], [1], [0, 0, 1, 1], [], []>} : vector<16x32xbf16>, vector<32x195xbf16>, vector<16x195xf32> -> vector<16x195xf32>
    %c0_30 = arith.constant 0 : index
    %c0_31 = arith.constant 0 : index
    %46 = vector.load %arg13[%c0_30, %c0_31] : memref<3x32xbf16, #tpu.memory_space<vmem>>, vector<3x32xbf16>
    %cst_32 = arith.constant dense<0.000000e+00> : vector<3x16xf32>
    %47 = tpu.matmul %46, %43, %cst_32 {dimension_numbers = #tpu.dot_dimension_numbers<[1], [1], [0], [0], [0, 0, 1, 0], [], []>} : vector<3x32xbf16>, vector<16x32xbf16>, vector<3x16xf32> -> vector<3x16xf32>
    %48 = vector.extract_strided_slice %45 {offsets = [0, 0], sizes = [16, 32], strides = [1, 1]} : vector<16x195xf32> to vector<16x32xf32>
    %49 = vector.extract_strided_slice %45 {offsets = [0, 96], sizes = [16, 32], strides = [1, 1]} : vector<16x195xf32> to vector<16x32xf32>
    %50 = vector.extract_strided_slice %45 {offsets = [0, 192], sizes = [16, 1], strides = [1, 1]} : vector<16x195xf32> to vector<16x1xf32>
    %51 = vector.extract_strided_slice %47 {offsets = [0, 0], sizes = [1, 16], strides = [1, 1]} : vector<3x16xf32> to vector<1x16xf32>
    %52 = vector.broadcast %50 : vector<16x1xf32> to vector<16x16xf32>
    %53 = vector.broadcast %51 : vector<1x16xf32> to vector<16x16xf32>
    %54 = arith.addf %52, %53 : vector<16x16xf32>
    %c1 = arith.constant 1 : index
    %55 = memref.load %arg2[%c1] : memref<7xf32, #tpu.memory_space<smem>>
    %56 = vector.broadcast %55 : f32 to vector<16x16xf32>
    %57 = arith.mulf %9, %56 : vector<16x16xf32>
    %58 = arith.addf %54, %57 : vector<16x16xf32>
    %cst_33 = arith.constant 0.000000e+00 : f32
    %59 = vector.broadcast %cst_33 : f32 to vector<16x16xf32>
    %60 = arith.cmpf ogt, %58, %59 : vector<16x16xf32>
    %cst_34 = arith.constant 2.000000e-01 : f32
    %61 = vector.broadcast %cst_34 : f32 to vector<16x16xf32>
    %62 = arith.mulf %61, %58 : vector<16x16xf32>
    %63 = arith.select %60, %58, %62 : vector<16x16xi1>, vector<16x16xf32>
    %cst_35 = arith.constant -1.000000e+30 : f32
    %64 = vector.broadcast %cst_35 : f32 to vector<16x16xf32>
    %65 = arith.select %12, %63, %64 : vector<16x16xi1>, vector<16x16xf32>
    %cst_36 = arith.constant dense<0xFF800000> : vector<16xf32>
    %66 = vector.multi_reduction <maximumf>, %65, %cst_36 [1] : vector<16x16xf32> to vector<16xf32>
    %67 = vector.shape_cast %66 : vector<16xf32> to vector<16x1xf32>
    %68 = vector.broadcast %67 : vector<16x1xf32> to vector<16x16xf32>
    %69 = arith.subf %65, %68 : vector<16x16xf32>
    %70 = math.exp %69 : vector<16x16xf32>
    %cst_37 = arith.constant dense<0.000000e+00> : vector<16xf32>
    %71 = vector.multi_reduction <add>, %70, %cst_37 [1] : vector<16x16xf32> to vector<16xf32>
    %72 = vector.shape_cast %71 : vector<16xf32> to vector<16x1xf32>
    %cst_38 = arith.constant 9.99999968E-21 : f32
    %73 = vector.broadcast %cst_38 : f32 to vector<16x1xf32>
    %74 = arith.maximumf %72, %73 : vector<16x1xf32>
    %75 = tpu.reciprocal %74 {approx = true} : vector<16x1xf32> -> vector<16x1xf32>
    %76 = vector.broadcast %75 : vector<16x1xf32> to vector<16x16xf32>
    %77 = arith.mulf %70, %76 : vector<16x16xf32>
    %78 = arith.truncf %77 : vector<16x16xf32> to vector<16x16xbf16>
    %79 = arith.truncf %48 : vector<16x32xf32> to vector<16x32xbf16>
    %cst_39 = arith.constant dense<0.000000e+00> : vector<16x32xf32>
    %80 = tpu.matmul %78, %79, %cst_39 {dimension_numbers = #tpu.dot_dimension_numbers<[1], [0], [0], [1], [0, 0, 1, 1], [], []>} : vector<16x16xbf16>, vector<16x32xbf16>, vector<16x32xf32> -> vector<16x32xf32>
    %81 = arith.addf %80, %49 : vector<16x32xf32>
    %c0_40 = arith.constant 0 : index
    %c0_41 = arith.constant 0 : index
    %82 = vector.load %arg14[%c0_40, %c0_41] : memref<3x32xf32, #tpu.memory_space<vmem>>, vector<1x32xf32>
    %83 = vector.broadcast %82 : vector<1x32xf32> to vector<16x32xf32>
    %84 = arith.addf %81, %83 : vector<16x32xf32>
    %85 = vector.extract_strided_slice %3 {offsets = [0, 0], sizes = [16, 1], strides = [1, 1]} : vector<16x3xf32> to vector<16x1xf32>
    %86 = vector.broadcast %85 : vector<16x1xf32> to vector<16x32xf32>
    %87 = arith.mulf %86, %84 : vector<16x32xf32>
    %88 = vector.extract_strided_slice %45 {offsets = [0, 32], sizes = [16, 32], strides = [1, 1]} : vector<16x195xf32> to vector<16x32xf32>
    %89 = vector.extract_strided_slice %45 {offsets = [0, 128], sizes = [16, 32], strides = [1, 1]} : vector<16x195xf32> to vector<16x32xf32>
    %90 = vector.extract_strided_slice %45 {offsets = [0, 193], sizes = [16, 1], strides = [1, 1]} : vector<16x195xf32> to vector<16x1xf32>
    %91 = vector.extract_strided_slice %47 {offsets = [1, 0], sizes = [1, 16], strides = [1, 1]} : vector<3x16xf32> to vector<1x16xf32>
    %92 = vector.broadcast %90 : vector<16x1xf32> to vector<16x16xf32>
    %93 = vector.broadcast %91 : vector<1x16xf32> to vector<16x16xf32>
    %94 = arith.addf %92, %93 : vector<16x16xf32>
    %c2 = arith.constant 2 : index
    %95 = memref.load %arg2[%c2] : memref<7xf32, #tpu.memory_space<smem>>
    %96 = vector.broadcast %95 : f32 to vector<16x16xf32>
    %97 = arith.mulf %9, %96 : vector<16x16xf32>
    %98 = arith.addf %94, %97 : vector<16x16xf32>
    %cst_42 = arith.constant 0.000000e+00 : f32
    %99 = vector.broadcast %cst_42 : f32 to vector<16x16xf32>
    %100 = arith.cmpf ogt, %98, %99 : vector<16x16xf32>
    %cst_43 = arith.constant 2.000000e-01 : f32
    %101 = vector.broadcast %cst_43 : f32 to vector<16x16xf32>
    %102 = arith.mulf %101, %98 : vector<16x16xf32>
    %103 = arith.select %100, %98, %102 : vector<16x16xi1>, vector<16x16xf32>
    %cst_44 = arith.constant -1.000000e+30 : f32
    %104 = vector.broadcast %cst_44 : f32 to vector<16x16xf32>
    %105 = arith.select %12, %103, %104 : vector<16x16xi1>, vector<16x16xf32>
    %cst_45 = arith.constant dense<0xFF800000> : vector<16xf32>
    %106 = vector.multi_reduction <maximumf>, %105, %cst_45 [1] : vector<16x16xf32> to vector<16xf32>
    %107 = vector.shape_cast %106 : vector<16xf32> to vector<16x1xf32>
    %108 = vector.broadcast %107 : vector<16x1xf32> to vector<16x16xf32>
    %109 = arith.subf %105, %108 : vector<16x16xf32>
    %110 = math.exp %109 : vector<16x16xf32>
    %cst_46 = arith.constant dense<0.000000e+00> : vector<16xf32>
    %111 = vector.multi_reduction <add>, %110, %cst_46 [1] : vector<16x16xf32> to vector<16xf32>
    %112 = vector.shape_cast %111 : vector<16xf32> to vector<16x1xf32>
    %cst_47 = arith.constant 9.99999968E-21 : f32
    %113 = vector.broadcast %cst_47 : f32 to vector<16x1xf32>
    %114 = arith.maximumf %112, %113 : vector<16x1xf32>
    %115 = tpu.reciprocal %114 {approx = true} : vector<16x1xf32> -> vector<16x1xf32>
    %116 = vector.broadcast %115 : vector<16x1xf32> to vector<16x16xf32>
    %117 = arith.mulf %110, %116 : vector<16x16xf32>
    %118 = arith.truncf %117 : vector<16x16xf32> to vector<16x16xbf16>
    %119 = arith.truncf %88 : vector<16x32xf32> to vector<16x32xbf16>
    %cst_48 = arith.constant dense<0.000000e+00> : vector<16x32xf32>
    %120 = tpu.matmul %118, %119, %cst_48 {dimension_numbers = #tpu.dot_dimension_numbers<[1], [0], [0], [1], [0, 0, 1, 1], [], []>} : vector<16x16xbf16>, vector<16x32xbf16>, vector<16x32xf32> -> vector<16x32xf32>
    %121 = arith.addf %120, %89 : vector<16x32xf32>
    %c1_49 = arith.constant 1 : index
    %c0_50 = arith.constant 0 : index
    %122 = vector.load %arg14[%c1_49, %c0_50] : memref<3x32xf32, #tpu.memory_space<vmem>>, vector<1x32xf32>
    %123 = vector.broadcast %122 : vector<1x32xf32> to vector<16x32xf32>
    %124 = arith.addf %121, %123 : vector<16x32xf32>
    %125 = vector.extract_strided_slice %3 {offsets = [0, 1], sizes = [16, 1], strides = [1, 1]} : vector<16x3xf32> to vector<16x1xf32>
    %126 = vector.broadcast %125 : vector<16x1xf32> to vector<16x32xf32>
    %127 = arith.mulf %126, %124 : vector<16x32xf32>
    %128 = arith.addf %87, %127 : vector<16x32xf32>
    %129 = vector.extract_strided_slice %45 {offsets = [0, 64], sizes = [16, 32], strides = [1, 1]} : vector<16x195xf32> to vector<16x32xf32>
    %130 = vector.extract_strided_slice %45 {offsets = [0, 160], sizes = [16, 32], strides = [1, 1]} : vector<16x195xf32> to vector<16x32xf32>
    %131 = vector.extract_strided_slice %45 {offsets = [0, 194], sizes = [16, 1], strides = [1, 1]} : vector<16x195xf32> to vector<16x1xf32>
    %132 = vector.extract_strided_slice %47 {offsets = [2, 0], sizes = [1, 16], strides = [1, 1]} : vector<3x16xf32> to vector<1x16xf32>
    %133 = vector.broadcast %131 : vector<16x1xf32> to vector<16x16xf32>
    %134 = vector.broadcast %132 : vector<1x16xf32> to vector<16x16xf32>
    %135 = arith.addf %133, %134 : vector<16x16xf32>
    %c3 = arith.constant 3 : index
    %136 = memref.load %arg2[%c3] : memref<7xf32, #tpu.memory_space<smem>>
    %137 = vector.broadcast %136 : f32 to vector<16x16xf32>
    %138 = arith.mulf %9, %137 : vector<16x16xf32>
    %139 = arith.addf %135, %138 : vector<16x16xf32>
    %cst_51 = arith.constant 0.000000e+00 : f32
    %140 = vector.broadcast %cst_51 : f32 to vector<16x16xf32>
    %141 = arith.cmpf ogt, %139, %140 : vector<16x16xf32>
    %cst_52 = arith.constant 2.000000e-01 : f32
    %142 = vector.broadcast %cst_52 : f32 to vector<16x16xf32>
    %143 = arith.mulf %142, %139 : vector<16x16xf32>
    %144 = arith.select %141, %139, %143 : vector<16x16xi1>, vector<16x16xf32>
    %cst_53 = arith.constant -1.000000e+30 : f32
    %145 = vector.broadcast %cst_53 : f32 to vector<16x16xf32>
    %146 = arith.select %12, %144, %145 : vector<16x16xi1>, vector<16x16xf32>
    %cst_54 = arith.constant dense<0xFF800000> : vector<16xf32>
    %147 = vector.multi_reduction <maximumf>, %146, %cst_54 [1] : vector<16x16xf32> to vector<16xf32>
    %148 = vector.shape_cast %147 : vector<16xf32> to vector<16x1xf32>
    %149 = vector.broadcast %148 : vector<16x1xf32> to vector<16x16xf32>
    %150 = arith.subf %146, %149 : vector<16x16xf32>
    %151 = math.exp %150 : vector<16x16xf32>
    %cst_55 = arith.constant dense<0.000000e+00> : vector<16xf32>
    %152 = vector.multi_reduction <add>, %151, %cst_55 [1] : vector<16x16xf32> to vector<16xf32>
    %153 = vector.shape_cast %152 : vector<16xf32> to vector<16x1xf32>
    %cst_56 = arith.constant 9.99999968E-21 : f32
    %154 = vector.broadcast %cst_56 : f32 to vector<16x1xf32>
    %155 = arith.maximumf %153, %154 : vector<16x1xf32>
    %156 = tpu.reciprocal %155 {approx = true} : vector<16x1xf32> -> vector<16x1xf32>
    %157 = vector.broadcast %156 : vector<16x1xf32> to vector<16x16xf32>
    %158 = arith.mulf %151, %157 : vector<16x16xf32>
    %159 = arith.truncf %158 : vector<16x16xf32> to vector<16x16xbf16>
    %160 = arith.truncf %129 : vector<16x32xf32> to vector<16x32xbf16>
    %cst_57 = arith.constant dense<0.000000e+00> : vector<16x32xf32>
    %161 = tpu.matmul %159, %160, %cst_57 {dimension_numbers = #tpu.dot_dimension_numbers<[1], [0], [0], [1], [0, 0, 1, 1], [], []>} : vector<16x16xbf16>, vector<16x32xbf16>, vector<16x32xf32> -> vector<16x32xf32>
    %162 = arith.addf %161, %130 : vector<16x32xf32>
    %c2_58 = arith.constant 2 : index
    %c0_59 = arith.constant 0 : index
    %163 = vector.load %arg14[%c2_58, %c0_59] : memref<3x32xf32, #tpu.memory_space<vmem>>, vector<1x32xf32>
    %164 = vector.broadcast %163 : vector<1x32xf32> to vector<16x32xf32>
    %165 = arith.addf %162, %164 : vector<16x32xf32>
    %166 = vector.extract_strided_slice %3 {offsets = [0, 2], sizes = [16, 1], strides = [1, 1]} : vector<16x3xf32> to vector<16x1xf32>
    %167 = vector.broadcast %166 : vector<16x1xf32> to vector<16x32xf32>
    %168 = arith.mulf %167, %165 : vector<16x32xf32>
    %169 = arith.addf %128, %168 : vector<16x32xf32>
    %cst_60 = arith.constant 0.000000e+00 : f32
    %170 = vector.broadcast %cst_60 : f32 to vector<16x32xf32>
    %171 = arith.maximumf %169, %170 : vector<16x32xf32>
    %172 = arith.truncf %171 : vector<16x32xf32> to vector<16x32xbf16>
    %c0_61 = arith.constant 0 : index
    %c0_62 = arith.constant 0 : index
    %173 = vector.load %arg15[%c0_61, %c0_62] : memref<32x195xbf16, #tpu.memory_space<vmem>>, vector<32x195xbf16>
    %cst_63 = arith.constant dense<0.000000e+00> : vector<16x195xf32>
    %174 = tpu.matmul %172, %173, %cst_63 {dimension_numbers = #tpu.dot_dimension_numbers<[1], [0], [0], [1], [0, 0, 1, 1], [], []>} : vector<16x32xbf16>, vector<32x195xbf16>, vector<16x195xf32> -> vector<16x195xf32>
    %c0_64 = arith.constant 0 : index
    %c0_65 = arith.constant 0 : index
    %175 = vector.load %arg16[%c0_64, %c0_65] : memref<3x32xbf16, #tpu.memory_space<vmem>>, vector<3x32xbf16>
    %cst_66 = arith.constant dense<0.000000e+00> : vector<3x16xf32>
    %176 = tpu.matmul %175, %172, %cst_66 {dimension_numbers = #tpu.dot_dimension_numbers<[1], [1], [0], [0], [0, 0, 1, 0], [], []>} : vector<3x32xbf16>, vector<16x32xbf16>, vector<3x16xf32> -> vector<3x16xf32>
    %177 = vector.extract_strided_slice %174 {offsets = [0, 0], sizes = [16, 32], strides = [1, 1]} : vector<16x195xf32> to vector<16x32xf32>
    %178 = vector.extract_strided_slice %174 {offsets = [0, 96], sizes = [16, 32], strides = [1, 1]} : vector<16x195xf32> to vector<16x32xf32>
    %179 = vector.extract_strided_slice %174 {offsets = [0, 192], sizes = [16, 1], strides = [1, 1]} : vector<16x195xf32> to vector<16x1xf32>
    %180 = vector.extract_strided_slice %176 {offsets = [0, 0], sizes = [1, 16], strides = [1, 1]} : vector<3x16xf32> to vector<1x16xf32>
    %181 = vector.broadcast %179 : vector<16x1xf32> to vector<16x16xf32>
    %182 = vector.broadcast %180 : vector<1x16xf32> to vector<16x16xf32>
    %183 = arith.addf %181, %182 : vector<16x16xf32>
    %c4 = arith.constant 4 : index
    %184 = memref.load %arg2[%c4] : memref<7xf32, #tpu.memory_space<smem>>
    %185 = vector.broadcast %184 : f32 to vector<16x16xf32>
    %186 = arith.mulf %9, %185 : vector<16x16xf32>
    %187 = arith.addf %183, %186 : vector<16x16xf32>
    %cst_67 = arith.constant 0.000000e+00 : f32
    %188 = vector.broadcast %cst_67 : f32 to vector<16x16xf32>
    %189 = arith.cmpf ogt, %187, %188 : vector<16x16xf32>
    %cst_68 = arith.constant 2.000000e-01 : f32
    %190 = vector.broadcast %cst_68 : f32 to vector<16x16xf32>
    %191 = arith.mulf %190, %187 : vector<16x16xf32>
    %192 = arith.select %189, %187, %191 : vector<16x16xi1>, vector<16x16xf32>
    %cst_69 = arith.constant -1.000000e+30 : f32
    %193 = vector.broadcast %cst_69 : f32 to vector<16x16xf32>
    %194 = arith.select %12, %192, %193 : vector<16x16xi1>, vector<16x16xf32>
    %cst_70 = arith.constant dense<0xFF800000> : vector<16xf32>
    %195 = vector.multi_reduction <maximumf>, %194, %cst_70 [1] : vector<16x16xf32> to vector<16xf32>
    %196 = vector.shape_cast %195 : vector<16xf32> to vector<16x1xf32>
    %197 = vector.broadcast %196 : vector<16x1xf32> to vector<16x16xf32>
    %198 = arith.subf %194, %197 : vector<16x16xf32>
    %199 = math.exp %198 : vector<16x16xf32>
    %cst_71 = arith.constant dense<0.000000e+00> : vector<16xf32>
    %200 = vector.multi_reduction <add>, %199, %cst_71 [1] : vector<16x16xf32> to vector<16xf32>
    %201 = vector.shape_cast %200 : vector<16xf32> to vector<16x1xf32>
    %cst_72 = arith.constant 9.99999968E-21 : f32
    %202 = vector.broadcast %cst_72 : f32 to vector<16x1xf32>
    %203 = arith.maximumf %201, %202 : vector<16x1xf32>
    %204 = tpu.reciprocal %203 {approx = true} : vector<16x1xf32> -> vector<16x1xf32>
    %205 = vector.broadcast %204 : vector<16x1xf32> to vector<16x16xf32>
    %206 = arith.mulf %199, %205 : vector<16x16xf32>
    %207 = arith.truncf %206 : vector<16x16xf32> to vector<16x16xbf16>
    %208 = arith.truncf %177 : vector<16x32xf32> to vector<16x32xbf16>
    %cst_73 = arith.constant dense<0.000000e+00> : vector<16x32xf32>
    %209 = tpu.matmul %207, %208, %cst_73 {dimension_numbers = #tpu.dot_dimension_numbers<[1], [0], [0], [1], [0, 0, 1, 1], [], []>} : vector<16x16xbf16>, vector<16x32xbf16>, vector<16x32xf32> -> vector<16x32xf32>
    %210 = arith.addf %209, %178 : vector<16x32xf32>
    %c0_74 = arith.constant 0 : index
    %c0_75 = arith.constant 0 : index
    %211 = vector.load %arg17[%c0_74, %c0_75] : memref<3x32xf32, #tpu.memory_space<vmem>>, vector<1x32xf32>
    %212 = vector.broadcast %211 : vector<1x32xf32> to vector<16x32xf32>
    %213 = arith.addf %210, %212 : vector<16x32xf32>
    %214 = vector.extract_strided_slice %3 {offsets = [0, 0], sizes = [16, 1], strides = [1, 1]} : vector<16x3xf32> to vector<16x1xf32>
    %215 = vector.broadcast %214 : vector<16x1xf32> to vector<16x32xf32>
    %216 = arith.mulf %215, %213 : vector<16x32xf32>
    %217 = vector.extract_strided_slice %174 {offsets = [0, 32], sizes = [16, 32], strides = [1, 1]} : vector<16x195xf32> to vector<16x32xf32>
    %218 = vector.extract_strided_slice %174 {offsets = [0, 128], sizes = [16, 32], strides = [1, 1]} : vector<16x195xf32> to vector<16x32xf32>
    %219 = vector.extract_strided_slice %174 {offsets = [0, 193], sizes = [16, 1], strides = [1, 1]} : vector<16x195xf32> to vector<16x1xf32>
    %220 = vector.extract_strided_slice %176 {offsets = [1, 0], sizes = [1, 16], strides = [1, 1]} : vector<3x16xf32> to vector<1x16xf32>
    %221 = vector.broadcast %219 : vector<16x1xf32> to vector<16x16xf32>
    %222 = vector.broadcast %220 : vector<1x16xf32> to vector<16x16xf32>
    %223 = arith.addf %221, %222 : vector<16x16xf32>
    %c5 = arith.constant 5 : index
    %224 = memref.load %arg2[%c5] : memref<7xf32, #tpu.memory_space<smem>>
    %225 = vector.broadcast %224 : f32 to vector<16x16xf32>
    %226 = arith.mulf %9, %225 : vector<16x16xf32>
    %227 = arith.addf %223, %226 : vector<16x16xf32>
    %cst_76 = arith.constant 0.000000e+00 : f32
    %228 = vector.broadcast %cst_76 : f32 to vector<16x16xf32>
    %229 = arith.cmpf ogt, %227, %228 : vector<16x16xf32>
    %cst_77 = arith.constant 2.000000e-01 : f32
    %230 = vector.broadcast %cst_77 : f32 to vector<16x16xf32>
    %231 = arith.mulf %230, %227 : vector<16x16xf32>
    %232 = arith.select %229, %227, %231 : vector<16x16xi1>, vector<16x16xf32>
    %cst_78 = arith.constant -1.000000e+30 : f32
    %233 = vector.broadcast %cst_78 : f32 to vector<16x16xf32>
    %234 = arith.select %12, %232, %233 : vector<16x16xi1>, vector<16x16xf32>
    %cst_79 = arith.constant dense<0xFF800000> : vector<16xf32>
    %235 = vector.multi_reduction <maximumf>, %234, %cst_79 [1] : vector<16x16xf32> to vector<16xf32>
    %236 = vector.shape_cast %235 : vector<16xf32> to vector<16x1xf32>
    %237 = vector.broadcast %236 : vector<16x1xf32> to vector<16x16xf32>
    %238 = arith.subf %234, %237 : vector<16x16xf32>
    %239 = math.exp %238 : vector<16x16xf32>
    %cst_80 = arith.constant dense<0.000000e+00> : vector<16xf32>
    %240 = vector.multi_reduction <add>, %239, %cst_80 [1] : vector<16x16xf32> to vector<16xf32>
    %241 = vector.shape_cast %240 : vector<16xf32> to vector<16x1xf32>
    %cst_81 = arith.constant 9.99999968E-21 : f32
    %242 = vector.broadcast %cst_81 : f32 to vector<16x1xf32>
    %243 = arith.maximumf %241, %242 : vector<16x1xf32>
    %244 = tpu.reciprocal %243 {approx = true} : vector<16x1xf32> -> vector<16x1xf32>
    %245 = vector.broadcast %244 : vector<16x1xf32> to vector<16x16xf32>
    %246 = arith.mulf %239, %245 : vector<16x16xf32>
    %247 = arith.truncf %246 : vector<16x16xf32> to vector<16x16xbf16>
    %248 = arith.truncf %217 : vector<16x32xf32> to vector<16x32xbf16>
    %cst_82 = arith.constant dense<0.000000e+00> : vector<16x32xf32>
    %249 = tpu.matmul %247, %248, %cst_82 {dimension_numbers = #tpu.dot_dimension_numbers<[1], [0], [0], [1], [0, 0, 1, 1], [], []>} : vector<16x16xbf16>, vector<16x32xbf16>, vector<16x32xf32> -> vector<16x32xf32>
    %250 = arith.addf %249, %218 : vector<16x32xf32>
    %c1_83 = arith.constant 1 : index
    %c0_84 = arith.constant 0 : index
    %251 = vector.load %arg17[%c1_83, %c0_84] : memref<3x32xf32, #tpu.memory_space<vmem>>, vector<1x32xf32>
    %252 = vector.broadcast %251 : vector<1x32xf32> to vector<16x32xf32>
    %253 = arith.addf %250, %252 : vector<16x32xf32>
    %254 = vector.extract_strided_slice %3 {offsets = [0, 1], sizes = [16, 1], strides = [1, 1]} : vector<16x3xf32> to vector<16x1xf32>
    %255 = vector.broadcast %254 : vector<16x1xf32> to vector<16x32xf32>
    %256 = arith.mulf %255, %253 : vector<16x32xf32>
    %257 = arith.addf %216, %256 : vector<16x32xf32>
    %258 = vector.extract_strided_slice %174 {offsets = [0, 64], sizes = [16, 32], strides = [1, 1]} : vector<16x195xf32> to vector<16x32xf32>
    %259 = vector.extract_strided_slice %174 {offsets = [0, 160], sizes = [16, 32], strides = [1, 1]} : vector<16x195xf32> to vector<16x32xf32>
    %260 = vector.extract_strided_slice %174 {offsets = [0, 194], sizes = [16, 1], strides = [1, 1]} : vector<16x195xf32> to vector<16x1xf32>
    %261 = vector.extract_strided_slice %176 {offsets = [2, 0], sizes = [1, 16], strides = [1, 1]} : vector<3x16xf32> to vector<1x16xf32>
    %262 = vector.broadcast %260 : vector<16x1xf32> to vector<16x16xf32>
    %263 = vector.broadcast %261 : vector<1x16xf32> to vector<16x16xf32>
    %264 = arith.addf %262, %263 : vector<16x16xf32>
    %c6 = arith.constant 6 : index
    %265 = memref.load %arg2[%c6] : memref<7xf32, #tpu.memory_space<smem>>
    %266 = vector.broadcast %265 : f32 to vector<16x16xf32>
    %267 = arith.mulf %9, %266 : vector<16x16xf32>
    %268 = arith.addf %264, %267 : vector<16x16xf32>
    %cst_85 = arith.constant 0.000000e+00 : f32
    %269 = vector.broadcast %cst_85 : f32 to vector<16x16xf32>
    %270 = arith.cmpf ogt, %268, %269 : vector<16x16xf32>
    %cst_86 = arith.constant 2.000000e-01 : f32
    %271 = vector.broadcast %cst_86 : f32 to vector<16x16xf32>
    %272 = arith.mulf %271, %268 : vector<16x16xf32>
    %273 = arith.select %270, %268, %272 : vector<16x16xi1>, vector<16x16xf32>
    %cst_87 = arith.constant -1.000000e+30 : f32
    %274 = vector.broadcast %cst_87 : f32 to vector<16x16xf32>
    %275 = arith.select %12, %273, %274 : vector<16x16xi1>, vector<16x16xf32>
    %cst_88 = arith.constant dense<0xFF800000> : vector<16xf32>
    %276 = vector.multi_reduction <maximumf>, %275, %cst_88 [1] : vector<16x16xf32> to vector<16xf32>
    %277 = vector.shape_cast %276 : vector<16xf32> to vector<16x1xf32>
    %278 = vector.broadcast %277 : vector<16x1xf32> to vector<16x16xf32>
    %279 = arith.subf %275, %278 : vector<16x16xf32>
    %280 = math.exp %279 : vector<16x16xf32>
    %cst_89 = arith.constant dense<0.000000e+00> : vector<16xf32>
    %281 = vector.multi_reduction <add>, %280, %cst_89 [1] : vector<16x16xf32> to vector<16xf32>
    %282 = vector.shape_cast %281 : vector<16xf32> to vector<16x1xf32>
    %cst_90 = arith.constant 9.99999968E-21 : f32
    %283 = vector.broadcast %cst_90 : f32 to vector<16x1xf32>
    %284 = arith.maximumf %282, %283 : vector<16x1xf32>
    %285 = tpu.reciprocal %284 {approx = true} : vector<16x1xf32> -> vector<16x1xf32>
    %286 = vector.broadcast %285 : vector<16x1xf32> to vector<16x16xf32>
    %287 = arith.mulf %280, %286 : vector<16x16xf32>
    %288 = arith.truncf %287 : vector<16x16xf32> to vector<16x16xbf16>
    %289 = arith.truncf %258 : vector<16x32xf32> to vector<16x32xbf16>
    %cst_91 = arith.constant dense<0.000000e+00> : vector<16x32xf32>
    %290 = tpu.matmul %288, %289, %cst_91 {dimension_numbers = #tpu.dot_dimension_numbers<[1], [0], [0], [1], [0, 0, 1, 1], [], []>} : vector<16x16xbf16>, vector<16x32xbf16>, vector<16x32xf32> -> vector<16x32xf32>
    %291 = arith.addf %290, %259 : vector<16x32xf32>
    %c2_92 = arith.constant 2 : index
    %c0_93 = arith.constant 0 : index
    %292 = vector.load %arg17[%c2_92, %c0_93] : memref<3x32xf32, #tpu.memory_space<vmem>>, vector<1x32xf32>
    %293 = vector.broadcast %292 : vector<1x32xf32> to vector<16x32xf32>
    %294 = arith.addf %291, %293 : vector<16x32xf32>
    %295 = vector.extract_strided_slice %3 {offsets = [0, 2], sizes = [16, 1], strides = [1, 1]} : vector<16x3xf32> to vector<16x1xf32>
    %296 = vector.broadcast %295 : vector<16x1xf32> to vector<16x32xf32>
    %297 = arith.mulf %296, %294 : vector<16x32xf32>
    %298 = arith.addf %257, %297 : vector<16x32xf32>
    %cst_94 = arith.constant 0.000000e+00 : f32
    %299 = vector.broadcast %cst_94 : f32 to vector<16x32xf32>
    %300 = arith.maximumf %298, %299 : vector<16x32xf32>
    %c0_95 = arith.constant 0 : index
    %c0_96 = arith.constant 0 : index
    %301 = vector.load %arg18[%c0_95, %c0_96] : memref<3x32xbf16, #tpu.memory_space<vmem>>, vector<3x32xbf16>
    %302 = arith.truncf %300 : vector<16x32xf32> to vector<16x32xbf16>
    %cst_97 = arith.constant dense<0.000000e+00> : vector<3x16xf32>
    %303 = tpu.matmul %301, %302, %cst_97 {dimension_numbers = #tpu.dot_dimension_numbers<[1], [1], [0], [0], [0, 0, 1, 0], [], []>} : vector<3x32xbf16>, vector<16x32xbf16>, vector<3x16xf32> -> vector<3x16xf32>
    %304 = vector.extract_strided_slice %5 {offsets = [0, 0], sizes = [1, 16], strides = [1, 1]} : vector<3x16xf32> to vector<1x16xf32>
    %305 = vector.extract_strided_slice %5 {offsets = [1, 0], sizes = [1, 16], strides = [1, 1]} : vector<3x16xf32> to vector<1x16xf32>
    %306 = vector.extract_strided_slice %303 {offsets = [0, 0], sizes = [1, 16], strides = [1, 1]} : vector<3x16xf32> to vector<1x16xf32>
    %cst_98 = arith.constant 4.000000e+00 : f32
    %307 = vector.broadcast %cst_98 : f32 to vector<1x16xf32>
    %308 = arith.mulf %306, %307 : vector<1x16xf32>
    %c0_99 = arith.constant 0 : index
    %309 = memref.load %arg2[%c0_99] : memref<7xf32, #tpu.memory_space<smem>>
    %310 = vector.extract_strided_slice %303 {offsets = [2, 0], sizes = [1, 16], strides = [1, 1]} : vector<3x16xf32> to vector<1x16xf32>
    %311 = arith.mulf %310, %304 : vector<1x16xf32>
    %cst_100 = arith.constant dense<0.000000e+00> : vector<1xf32>
    %312 = vector.multi_reduction <add>, %311, %cst_100 [1] : vector<1x16xf32> to vector<1xf32>
    %313 = vector.shape_cast %312 : vector<1xf32> to vector<1x1xf32>
    %314 = vector.extract_strided_slice %303 {offsets = [1, 0], sizes = [1, 16], strides = [1, 1]} : vector<3x16xf32> to vector<1x16xf32>
    %cst_101 = arith.constant 1.000000e+00 : f32
    %315 = vector.broadcast %cst_101 : f32 to vector<1x16xf32>
    %316 = arith.subf %315, %304 : vector<1x16xf32>
    %317 = arith.mulf %314, %316 : vector<1x16xf32>
    %cst_102 = arith.constant dense<0.000000e+00> : vector<1xf32>
    %318 = vector.multi_reduction <add>, %317, %cst_102 [1] : vector<1x16xf32> to vector<1xf32>
    %319 = vector.shape_cast %318 : vector<1xf32> to vector<1x1xf32>
    %320 = arith.addf %313, %319 : vector<1x1xf32>
    %cst_103 = arith.constant 6.000000e+00 : f32
    %321 = arith.mulf %cst_103, %309 : f32
    %322 = vector.broadcast %321 : f32 to vector<1x1xf32>
    %323 = arith.addf %320, %322 : vector<1x1xf32>
    %cst_104 = arith.constant 1.600000e+01 : f32
    %324 = vector.broadcast %cst_104 : f32 to vector<1x1xf32>
    %325 = arith.divf %323, %324 : vector<1x1xf32>
    %326 = vector.shape_cast %325 : vector<1x1xf32> to vector<1x1x1xf32>
    %c0_105 = arith.constant 0 : index
    %c0_106 = arith.constant 0 : index
    %c0_107 = arith.constant 0 : index
    %327 = vector.load %arg20[%c0_105, %c0_106, %c0_107] : memref<1x1x1xf32, #tpu.memory_space<vmem>>, vector<1x1x1xf32>
    tpu.vector_store %arg20[%c0_105, %c0_106, %c0_107], %326 {strides = array<i32>} : memref<1x1x1xf32, #tpu.memory_space<vmem>>, vector<1x1x1xf32>,
    %cst_108 = arith.constant 0.000000e+00 : f32
    %328 = vector.broadcast %cst_108 : f32 to vector<1x16xf32>
    %329 = arith.cmpf ogt, %305, %328 : vector<1x16xf32>
    %cst_109 = arith.constant -1.000000e+30 : f32
    %330 = vector.broadcast %cst_109 : f32 to vector<1x16xf32>
    %331 = arith.select %329, %308, %330 : vector<1x16xi1>, vector<1x16xf32>
    %cst_110 = arith.constant dense<0.000000e+00> : vector<1xf32>
    %332 = vector.multi_reduction <add>, %305, %cst_110 [1] : vector<1x16xf32> to vector<1xf32>
    %333 = vector.shape_cast %332 : vector<1xf32> to vector<1x1xf32>
    %334 = arith.mulf %308, %305 : vector<1x16xf32>
    %cst_111 = arith.constant dense<0.000000e+00> : vector<1xf32>
    %335 = vector.multi_reduction <add>, %334, %cst_111 [1] : vector<1x16xf32> to vector<1xf32>
    %336 = vector.shape_cast %335 : vector<1xf32> to vector<1x1xf32>
    %cst_112 = arith.constant 1.000000e+00 : f32
    %337 = vector.broadcast %cst_112 : f32 to vector<1x1xf32>
    %338 = arith.maximumf %333, %337 : vector<1x1xf32>
    %339 = arith.divf %336, %338 : vector<1x1xf32>
    %cst_113 = arith.constant 1.000000e-03 : f32
    %340 = vector.broadcast %cst_113 : f32 to vector<1x1xf32>
    %341 = arith.subf %333, %340 : vector<1x1xf32>
    %cst_114 = arith.constant 1.000000e-03 : f32
    %342 = arith.maximumf %cst_114, %1 : f32
    %343 = vector.broadcast %342 : f32 to vector<1x1xf32>
    %344 = arith.minimumf %341, %343 : vector<1x1xf32>
    %345 = arith.subf %333, %344 : vector<1x1xf32>
    %346 = arith.divf %344, %345 : vector<1x1xf32>
    %347 = math.log %346 : vector<1x1xf32>
    %348 = arith.subf %347, %339 : vector<1x1xf32>
    %349 = vector.broadcast %348 : vector<1x1xf32> to vector<1x16xf32>
    %350 = arith.addf %331, %349 : vector<1x16xf32>
    %351 = arith.negf %350 : vector<1x16xf32>
    %352 = math.exp %351 : vector<1x16xf32>
    %cst_115 = arith.constant 1.000000e+00 : f32
    %353 = vector.broadcast %cst_115 : f32 to vector<1x16xf32>
    %354 = arith.addf %353, %352 : vector<1x16xf32>
    %355 = arith.divf %353, %354 : vector<1x16xf32>
    %cst_116 = arith.constant dense<0.000000e+00> : vector<1xf32>
    %356 = vector.multi_reduction <add>, %355, %cst_116 [1] : vector<1x16xf32> to vector<1xf32>
    %357 = vector.shape_cast %356 : vector<1xf32> to vector<1x1xf32>
    %358 = vector.broadcast %1 : f32 to vector<1x1xf32>
    %359 = arith.subf %357, %358 : vector<1x1xf32>
    %cst_117 = arith.constant 1.000000e+00 : f32
    %360 = vector.broadcast %cst_117 : f32 to vector<1x16xf32>
    %361 = arith.subf %360, %355 : vector<1x16xf32>
    %362 = arith.mulf %355, %361 : vector<1x16xf32>
    %cst_118 = arith.constant dense<0.000000e+00> : vector<1xf32>
    %363 = vector.multi_reduction <add>, %362, %cst_118 [1] : vector<1x16xf32> to vector<1xf32>
    %364 = vector.shape_cast %363 : vector<1xf32> to vector<1x1xf32>
    %cst_119 = arith.constant 9.99999996E-13 : f32
    %365 = vector.broadcast %cst_119 : f32 to vector<1x1xf32>
    %366 = arith.maximumf %364, %365 : vector<1x1xf32>
    %367 = arith.divf %359, %366 : vector<1x1xf32>
    %cst_120 = arith.constant -2.000000e+00 : f32
    %cst_121 = arith.constant 2.000000e+00 : f32
    %368 = vector.broadcast %cst_120 : f32 to vector<1x1xf32>
    %369 = arith.maximumf %368, %367 : vector<1x1xf32>
    %370 = vector.broadcast %cst_121 : f32 to vector<1x1xf32>
    %371 = arith.minimumf %370, %369 : vector<1x1xf32>
    %372 = math.absf %359 : vector<1x1xf32>
    %cst_122 = arith.constant 9.99999997E-7 : f32
    %373 = vector.broadcast %cst_122 : f32 to vector<1x1xf32>
    %374 = arith.cmpf olt, %372, %373 : vector<1x1xf32>
    %375 = arith.subf %348, %371 : vector<1x1xf32>
    %376 = arith.select %374, %348, %375 : vector<1x1xi1>, vector<1x1xf32>
    %377 = vector.broadcast %376 : vector<1x1xf32> to vector<1x16xf32>
    %378 = arith.addf %331, %377 : vector<1x16xf32>
    %379 = arith.negf %378 : vector<1x16xf32>
    %380 = math.exp %379 : vector<1x16xf32>
    %cst_123 = arith.constant 1.000000e+00 : f32
    %381 = vector.broadcast %cst_123 : f32 to vector<1x16xf32>
    %382 = arith.addf %381, %380 : vector<1x16xf32>
    %383 = arith.divf %381, %382 : vector<1x16xf32>
    %cst_124 = arith.constant dense<0.000000e+00> : vector<1xf32>
    %384 = vector.multi_reduction <add>, %383, %cst_124 [1] : vector<1x16xf32> to vector<1xf32>
    %385 = vector.shape_cast %384 : vector<1xf32> to vector<1x1xf32>
    %386 = vector.broadcast %1 : f32 to vector<1x1xf32>
    %387 = arith.subf %385, %386 : vector<1x1xf32>
    %cst_125 = arith.constant 1.000000e+00 : f32
    %388 = vector.broadcast %cst_125 : f32 to vector<1x16xf32>
    %389 = arith.subf %388, %383 : vector<1x16xf32>
    %390 = arith.mulf %383, %389 : vector<1x16xf32>
    %cst_126 = arith.constant dense<0.000000e+00> : vector<1xf32>
    %391 = vector.multi_reduction <add>, %390, %cst_126 [1] : vector<1x16xf32> to vector<1xf32>
    %392 = vector.shape_cast %391 : vector<1xf32> to vector<1x1xf32>
    %cst_127 = arith.constant 9.99999996E-13 : f32
    %393 = vector.broadcast %cst_127 : f32 to vector<1x1xf32>
    %394 = arith.maximumf %392, %393 : vector<1x1xf32>
    %395 = arith.divf %387, %394 : vector<1x1xf32>
    %cst_128 = arith.constant -2.000000e+00 : f32
    %cst_129 = arith.constant 2.000000e+00 : f32
    %396 = vector.broadcast %cst_128 : f32 to vector<1x1xf32>
    %397 = arith.maximumf %396, %395 : vector<1x1xf32>
    %398 = vector.broadcast %cst_129 : f32 to vector<1x1xf32>
    %399 = arith.minimumf %398, %397 : vector<1x1xf32>
    %400 = math.absf %387 : vector<1x1xf32>
    %cst_130 = arith.constant 9.99999997E-7 : f32
    %401 = vector.broadcast %cst_130 : f32 to vector<1x1xf32>
    %402 = arith.cmpf olt, %400, %401 : vector<1x1xf32>
    %403 = arith.subf %376, %399 : vector<1x1xf32>
    %404 = arith.select %402, %376, %403 : vector<1x1xi1>, vector<1x1xf32>
    %405 = vector.broadcast %404 : vector<1x1xf32> to vector<1x16xf32>
    %406 = arith.addf %331, %405 : vector<1x16xf32>
    %407 = arith.negf %406 : vector<1x16xf32>
    %408 = math.exp %407 : vector<1x16xf32>
    %cst_131 = arith.constant 1.000000e+00 : f32
    %409 = vector.broadcast %cst_131 : f32 to vector<1x16xf32>
    %410 = arith.addf %409, %408 : vector<1x16xf32>
    %411 = arith.divf %409, %410 : vector<1x16xf32>
    %cst_132 = arith.constant dense<0.000000e+00> : vector<1xf32>
    %412 = vector.multi_reduction <add>, %411, %cst_132 [1] : vector<1x16xf32> to vector<1xf32>
    %413 = vector.shape_cast %412 : vector<1xf32> to vector<1x1xf32>
    %414 = vector.broadcast %1 : f32 to vector<1x1xf32>
    %415 = arith.subf %413, %414 : vector<1x1xf32>
    %cst_133 = arith.constant 1.000000e+00 : f32
    %416 = vector.broadcast %cst_133 : f32 to vector<1x16xf32>
    %417 = arith.subf %416, %411 : vector<1x16xf32>
    %418 = arith.mulf %411, %417 : vector<1x16xf32>
    %cst_134 = arith.constant dense<0.000000e+00> : vector<1xf32>
    %419 = vector.multi_reduction <add>, %418, %cst_134 [1] : vector<1x16xf32> to vector<1xf32>
    %420 = vector.shape_cast %419 : vector<1xf32> to vector<1x1xf32>
    %cst_135 = arith.constant 9.99999996E-13 : f32
    %421 = vector.broadcast %cst_135 : f32 to vector<1x1xf32>
    %422 = arith.maximumf %420, %421 : vector<1x1xf32>
    %423 = arith.divf %415, %422 : vector<1x1xf32>
    %cst_136 = arith.constant -2.000000e+00 : f32
    %cst_137 = arith.constant 2.000000e+00 : f32
    %424 = vector.broadcast %cst_136 : f32 to vector<1x1xf32>
    %425 = arith.maximumf %424, %423 : vector<1x1xf32>
    %426 = vector.broadcast %cst_137 : f32 to vector<1x1xf32>
    %427 = arith.minimumf %426, %425 : vector<1x1xf32>
    %428 = math.absf %415 : vector<1x1xf32>
    %cst_138 = arith.constant 9.99999997E-7 : f32
    %429 = vector.broadcast %cst_138 : f32 to vector<1x1xf32>
    %430 = arith.cmpf olt, %428, %429 : vector<1x1xf32>
    %431 = arith.subf %404, %427 : vector<1x1xf32>
    %432 = arith.select %430, %404, %431 : vector<1x1xi1>, vector<1x1xf32>
    %433 = vector.broadcast %432 : vector<1x1xf32> to vector<1x16xf32>
    %434 = arith.addf %331, %433 : vector<1x16xf32>
    %435 = arith.negf %434 : vector<1x16xf32>
    %436 = math.exp %435 : vector<1x16xf32>
    %cst_139 = arith.constant 1.000000e+00 : f32
    %437 = vector.broadcast %cst_139 : f32 to vector<1x16xf32>
    %438 = arith.addf %437, %436 : vector<1x16xf32>
    %439 = arith.divf %437, %438 : vector<1x16xf32>
    %cst_140 = arith.constant dense<0.000000e+00> : vector<1xf32>
    %440 = vector.multi_reduction <add>, %439, %cst_140 [1] : vector<1x16xf32> to vector<1xf32>
    %441 = vector.shape_cast %440 : vector<1xf32> to vector<1x1xf32>
    %442 = vector.broadcast %1 : f32 to vector<1x1xf32>
    %443 = arith.subf %441, %442 : vector<1x1xf32>
    %cst_141 = arith.constant 1.000000e+00 : f32
    %444 = vector.broadcast %cst_141 : f32 to vector<1x16xf32>
    %445 = arith.subf %444, %439 : vector<1x16xf32>
    %446 = arith.mulf %439, %445 : vector<1x16xf32>
    %cst_142 = arith.constant dense<0.000000e+00> : vector<1xf32>
    %447 = vector.multi_reduction <add>, %446, %cst_142 [1] : vector<1x16xf32> to vector<1xf32>
    %448 = vector.shape_cast %447 : vector<1xf32> to vector<1x1xf32>
    %cst_143 = arith.constant 9.99999996E-13 : f32
    %449 = vector.broadcast %cst_143 : f32 to vector<1x1xf32>
    %450 = arith.maximumf %448, %449 : vector<1x1xf32>
    %451 = arith.divf %443, %450 : vector<1x1xf32>
    %cst_144 = arith.constant -2.000000e+00 : f32
    %cst_145 = arith.constant 2.000000e+00 : f32
    %452 = vector.broadcast %cst_144 : f32 to vector<1x1xf32>
    %453 = arith.maximumf %452, %451 : vector<1x1xf32>
    %454 = vector.broadcast %cst_145 : f32 to vector<1x1xf32>
    %455 = arith.minimumf %454, %453 : vector<1x1xf32>
    %456 = math.absf %443 : vector<1x1xf32>
    %cst_146 = arith.constant 9.99999997E-7 : f32
    %457 = vector.broadcast %cst_146 : f32 to vector<1x1xf32>
    %458 = arith.cmpf olt, %456, %457 : vector<1x1xf32>
    %459 = arith.subf %432, %455 : vector<1x1xf32>
    %460 = arith.select %458, %432, %459 : vector<1x1xi1>, vector<1x1xf32>
    %461 = vector.broadcast %460 : vector<1x1xf32> to vector<1x16xf32>
    %462 = arith.addf %331, %461 : vector<1x16xf32>
    %463 = arith.negf %462 : vector<1x16xf32>
    %464 = math.exp %463 : vector<1x16xf32>
    %cst_147 = arith.constant 1.000000e+00 : f32
    %465 = vector.broadcast %cst_147 : f32 to vector<1x16xf32>
    %466 = arith.addf %465, %464 : vector<1x16xf32>
    %467 = arith.divf %465, %466 : vector<1x16xf32>
    %cst_148 = arith.constant dense<0.000000e+00> : vector<1xf32>
    %468 = vector.multi_reduction <add>, %467, %cst_148 [1] : vector<1x16xf32> to vector<1xf32>
    %469 = vector.shape_cast %468 : vector<1xf32> to vector<1x1xf32>
    %470 = vector.broadcast %1 : f32 to vector<1x1xf32>
    %471 = arith.subf %469, %470 : vector<1x1xf32>
    %cst_149 = arith.constant 1.000000e+00 : f32
    %472 = vector.broadcast %cst_149 : f32 to vector<1x16xf32>
    %473 = arith.subf %472, %467 : vector<1x16xf32>
    %474 = arith.mulf %467, %473 : vector<1x16xf32>
    %cst_150 = arith.constant dense<0.000000e+00> : vector<1xf32>
    %475 = vector.multi_reduction <add>, %474, %cst_150 [1] : vector<1x16xf32> to vector<1xf32>
    %476 = vector.shape_cast %475 : vector<1xf32> to vector<1x1xf32>
    %cst_151 = arith.constant 9.99999996E-13 : f32
    %477 = vector.broadcast %cst_151 : f32 to vector<1x1xf32>
    %478 = arith.maximumf %476, %477 : vector<1x1xf32>
    %479 = arith.divf %471, %478 : vector<1x1xf32>
    %cst_152 = arith.constant -2.000000e+00 : f32
    %cst_153 = arith.constant 2.000000e+00 : f32
    %480 = vector.broadcast %cst_152 : f32 to vector<1x1xf32>
    %481 = arith.maximumf %480, %479 : vector<1x1xf32>
    %482 = vector.broadcast %cst_153 : f32 to vector<1x1xf32>
    %483 = arith.minimumf %482, %481 : vector<1x1xf32>
    %484 = math.absf %471 : vector<1x1xf32>
    %cst_154 = arith.constant 9.99999997E-7 : f32
    %485 = vector.broadcast %cst_154 : f32 to vector<1x1xf32>
    %486 = arith.cmpf olt, %484, %485 : vector<1x1xf32>
    %487 = arith.subf %460, %483 : vector<1x1xf32>
    %488 = arith.select %486, %460, %487 : vector<1x1xi1>, vector<1x1xf32>
    %489 = vector.broadcast %488 : vector<1x1xf32> to vector<1x16xf32>
    %490 = arith.addf %331, %489 : vector<1x16xf32>
    %491 = arith.negf %490 : vector<1x16xf32>
    %492 = math.exp %491 : vector<1x16xf32>
    %cst_155 = arith.constant 1.000000e+00 : f32
    %493 = vector.broadcast %cst_155 : f32 to vector<1x16xf32>
    %494 = arith.addf %493, %492 : vector<1x16xf32>
    %495 = arith.divf %493, %494 : vector<1x16xf32>
    %cst_156 = arith.constant dense<0.000000e+00> : vector<1xf32>
    %496 = vector.multi_reduction <add>, %495, %cst_156 [1] : vector<1x16xf32> to vector<1xf32>
    %497 = vector.shape_cast %496 : vector<1xf32> to vector<1x1xf32>
    %498 = vector.broadcast %1 : f32 to vector<1x1xf32>
    %499 = arith.subf %497, %498 : vector<1x1xf32>
    %cst_157 = arith.constant 1.000000e+00 : f32
    %500 = vector.broadcast %cst_157 : f32 to vector<1x16xf32>
    %501 = arith.subf %500, %495 : vector<1x16xf32>
    %502 = arith.mulf %495, %501 : vector<1x16xf32>
    %cst_158 = arith.constant dense<0.000000e+00> : vector<1xf32>
    %503 = vector.multi_reduction <add>, %502, %cst_158 [1] : vector<1x16xf32> to vector<1xf32>
    %504 = vector.shape_cast %503 : vector<1xf32> to vector<1x1xf32>
    %cst_159 = arith.constant 9.99999996E-13 : f32
    %505 = vector.broadcast %cst_159 : f32 to vector<1x1xf32>
    %506 = arith.maximumf %504, %505 : vector<1x1xf32>
    %507 = arith.divf %499, %506 : vector<1x1xf32>
    %cst_160 = arith.constant -2.000000e+00 : f32
    %cst_161 = arith.constant 2.000000e+00 : f32
    %508 = vector.broadcast %cst_160 : f32 to vector<1x1xf32>
    %509 = arith.maximumf %508, %507 : vector<1x1xf32>
    %510 = vector.broadcast %cst_161 : f32 to vector<1x1xf32>
    %511 = arith.minimumf %510, %509 : vector<1x1xf32>
    %512 = math.absf %499 : vector<1x1xf32>
    %cst_162 = arith.constant 9.99999997E-7 : f32
    %513 = vector.broadcast %cst_162 : f32 to vector<1x1xf32>
    %514 = arith.cmpf olt, %512, %513 : vector<1x1xf32>
    %515 = arith.subf %488, %511 : vector<1x1xf32>
    %516 = arith.select %514, %488, %515 : vector<1x1xi1>, vector<1x1xf32>
    %517 = vector.broadcast %516 : vector<1x1xf32> to vector<1x16xf32>
    %518 = arith.addf %331, %517 : vector<1x16xf32>
    %519 = arith.negf %518 : vector<1x16xf32>
    %520 = math.exp %519 : vector<1x16xf32>
    %cst_163 = arith.constant 1.000000e+00 : f32
    %521 = vector.broadcast %cst_163 : f32 to vector<1x16xf32>
    %522 = arith.addf %521, %520 : vector<1x16xf32>
    %523 = arith.divf %521, %522 : vector<1x16xf32>
    %cst_164 = arith.constant dense<0.000000e+00> : vector<1xf32>
    %524 = vector.multi_reduction <add>, %523, %cst_164 [1] : vector<1x16xf32> to vector<1xf32>
    %525 = vector.shape_cast %524 : vector<1xf32> to vector<1x1xf32>
    %526 = vector.broadcast %1 : f32 to vector<1x1xf32>
    %527 = arith.subf %525, %526 : vector<1x1xf32>
    %cst_165 = arith.constant 1.000000e+00 : f32
    %528 = vector.broadcast %cst_165 : f32 to vector<1x16xf32>
    %529 = arith.subf %528, %523 : vector<1x16xf32>
    %530 = arith.mulf %523, %529 : vector<1x16xf32>
    %cst_166 = arith.constant dense<0.000000e+00> : vector<1xf32>
    %531 = vector.multi_reduction <add>, %530, %cst_166 [1] : vector<1x16xf32> to vector<1xf32>
    %532 = vector.shape_cast %531 : vector<1xf32> to vector<1x1xf32>
    %cst_167 = arith.constant 9.99999996E-13 : f32
    %533 = vector.broadcast %cst_167 : f32 to vector<1x1xf32>
    %534 = arith.maximumf %532, %533 : vector<1x1xf32>
    %535 = arith.divf %527, %534 : vector<1x1xf32>
    %cst_168 = arith.constant -2.000000e+00 : f32
    %cst_169 = arith.constant 2.000000e+00 : f32
    %536 = vector.broadcast %cst_168 : f32 to vector<1x1xf32>
    %537 = arith.maximumf %536, %535 : vector<1x1xf32>
    %538 = vector.broadcast %cst_169 : f32 to vector<1x1xf32>
    %539 = arith.minimumf %538, %537 : vector<1x1xf32>
    %540 = math.absf %527 : vector<1x1xf32>
    %cst_170 = arith.constant 9.99999997E-7 : f32
    %541 = vector.broadcast %cst_170 : f32 to vector<1x1xf32>
    %542 = arith.cmpf olt, %540, %541 : vector<1x1xf32>
    %543 = arith.subf %516, %539 : vector<1x1xf32>
    %544 = arith.select %542, %516, %543 : vector<1x1xi1>, vector<1x1xf32>
    %545 = vector.broadcast %544 : vector<1x1xf32> to vector<1x16xf32>
    %546 = arith.addf %331, %545 : vector<1x16xf32>
    %547 = arith.negf %546 : vector<1x16xf32>
    %548 = math.exp %547 : vector<1x16xf32>
    %cst_171 = arith.constant 1.000000e+00 : f32
    %549 = vector.broadcast %cst_171 : f32 to vector<1x16xf32>
    %550 = arith.addf %549, %548 : vector<1x16xf32>
    %551 = arith.divf %549, %550 : vector<1x16xf32>
    %cst_172 = arith.constant dense<0.000000e+00> : vector<1xf32>
    %552 = vector.multi_reduction <add>, %551, %cst_172 [1] : vector<1x16xf32> to vector<1xf32>
    %553 = vector.shape_cast %552 : vector<1xf32> to vector<1x1xf32>
    %554 = vector.broadcast %1 : f32 to vector<1x1xf32>
    %555 = arith.subf %553, %554 : vector<1x1xf32>
    %cst_173 = arith.constant 1.000000e+00 : f32
    %556 = vector.broadcast %cst_173 : f32 to vector<1x16xf32>
    %557 = arith.subf %556, %551 : vector<1x16xf32>
    %558 = arith.mulf %551, %557 : vector<1x16xf32>
    %cst_174 = arith.constant dense<0.000000e+00> : vector<1xf32>
    %559 = vector.multi_reduction <add>, %558, %cst_174 [1] : vector<1x16xf32> to vector<1xf32>
    %560 = vector.shape_cast %559 : vector<1xf32> to vector<1x1xf32>
    %cst_175 = arith.constant 9.99999996E-13 : f32
    %561 = vector.broadcast %cst_175 : f32 to vector<1x1xf32>
    %562 = arith.maximumf %560, %561 : vector<1x1xf32>
    %563 = arith.divf %555, %562 : vector<1x1xf32>
    %cst_176 = arith.constant -2.000000e+00 : f32
    %cst_177 = arith.constant 2.000000e+00 : f32
    %564 = vector.broadcast %cst_176 : f32 to vector<1x1xf32>
    %565 = arith.maximumf %564, %563 : vector<1x1xf32>
    %566 = vector.broadcast %cst_177 : f32 to vector<1x1xf32>
    %567 = arith.minimumf %566, %565 : vector<1x1xf32>
    %568 = math.absf %555 : vector<1x1xf32>
    %cst_178 = arith.constant 9.99999997E-7 : f32
    %569 = vector.broadcast %cst_178 : f32 to vector<1x1xf32>
    %570 = arith.cmpf olt, %568, %569 : vector<1x1xf32>
    %571 = arith.subf %544, %567 : vector<1x1xf32>
    %572 = arith.select %570, %544, %571 : vector<1x1xi1>, vector<1x1xf32>
    %573 = vector.broadcast %572 : vector<1x1xf32> to vector<1x16xf32>
    %574 = arith.addf %331, %573 : vector<1x16xf32>
    %575 = arith.negf %574 : vector<1x16xf32>
    %576 = math.exp %575 : vector<1x16xf32>
    %cst_179 = arith.constant 1.000000e+00 : f32
    %577 = vector.broadcast %cst_179 : f32 to vector<1x16xf32>
    %578 = arith.addf %577, %576 : vector<1x16xf32>
    %579 = arith.divf %577, %578 : vector<1x16xf32>
    %cst_180 = arith.constant dense<0.000000e+00> : vector<1xf32>
    %580 = vector.multi_reduction <add>, %579, %cst_180 [1] : vector<1x16xf32> to vector<1xf32>
    %581 = vector.shape_cast %580 : vector<1xf32> to vector<1x1xf32>
    %582 = vector.broadcast %1 : f32 to vector<1x1xf32>
    %583 = arith.subf %581, %582 : vector<1x1xf32>
    %cst_181 = arith.constant 1.000000e+00 : f32
    %584 = vector.broadcast %cst_181 : f32 to vector<1x16xf32>
    %585 = arith.subf %584, %579 : vector<1x16xf32>
    %586 = arith.mulf %579, %585 : vector<1x16xf32>
    %cst_182 = arith.constant dense<0.000000e+00> : vector<1xf32>
    %587 = vector.multi_reduction <add>, %586, %cst_182 [1] : vector<1x16xf32> to vector<1xf32>
    %588 = vector.shape_cast %587 : vector<1xf32> to vector<1x1xf32>
    %cst_183 = arith.constant 9.99999996E-13 : f32
    %589 = vector.broadcast %cst_183 : f32 to vector<1x1xf32>
    %590 = arith.maximumf %588, %589 : vector<1x1xf32>
    %591 = arith.divf %583, %590 : vector<1x1xf32>
    %cst_184 = arith.constant -2.000000e+00 : f32
    %cst_185 = arith.constant 2.000000e+00 : f32
    %592 = vector.broadcast %cst_184 : f32 to vector<1x1xf32>
    %593 = arith.maximumf %592, %591 : vector<1x1xf32>
    %594 = vector.broadcast %cst_185 : f32 to vector<1x1xf32>
    %595 = arith.minimumf %594, %593 : vector<1x1xf32>
    %596 = math.absf %583 : vector<1x1xf32>
    %cst_186 = arith.constant 9.99999997E-7 : f32
    %597 = vector.broadcast %cst_186 : f32 to vector<1x1xf32>
    %598 = arith.cmpf olt, %596, %597 : vector<1x1xf32>
    %599 = arith.subf %572, %595 : vector<1x1xf32>
    %600 = arith.select %598, %572, %599 : vector<1x1xi1>, vector<1x1xf32>
    %601 = vector.broadcast %600 : vector<1x1xf32> to vector<1x16xf32>
    %602 = arith.addf %331, %601 : vector<1x16xf32>
    %603 = arith.negf %602 : vector<1x16xf32>
    %604 = math.exp %603 : vector<1x16xf32>
    %cst_187 = arith.constant 1.000000e+00 : f32
    %605 = vector.broadcast %cst_187 : f32 to vector<1x16xf32>
    %606 = arith.addf %605, %604 : vector<1x16xf32>
    %607 = arith.divf %605, %606 : vector<1x16xf32>
    %cst_188 = arith.constant dense<0.000000e+00> : vector<1xf32>
    %608 = vector.multi_reduction <add>, %607, %cst_188 [1] : vector<1x16xf32> to vector<1xf32>
    %609 = vector.shape_cast %608 : vector<1xf32> to vector<1x1xf32>
    %610 = vector.broadcast %1 : f32 to vector<1x1xf32>
    %611 = arith.subf %609, %610 : vector<1x1xf32>
    %cst_189 = arith.constant 1.000000e+00 : f32
    %612 = vector.broadcast %cst_189 : f32 to vector<1x16xf32>
    %613 = arith.subf %612, %607 : vector<1x16xf32>
    %614 = arith.mulf %607, %613 : vector<1x16xf32>
    %cst_190 = arith.constant dense<0.000000e+00> : vector<1xf32>
    %615 = vector.multi_reduction <add>, %614, %cst_190 [1] : vector<1x16xf32> to vector<1xf32>
    %616 = vector.shape_cast %615 : vector<1xf32> to vector<1x1xf32>
    %cst_191 = arith.constant 9.99999996E-13 : f32
    %617 = vector.broadcast %cst_191 : f32 to vector<1x1xf32>
    %618 = arith.maximumf %616, %617 : vector<1x1xf32>
    %619 = arith.divf %611, %618 : vector<1x1xf32>
    %cst_192 = arith.constant -2.000000e+00 : f32
    %cst_193 = arith.constant 2.000000e+00 : f32
    %620 = vector.broadcast %cst_192 : f32 to vector<1x1xf32>
    %621 = arith.maximumf %620, %619 : vector<1x1xf32>
    %622 = vector.broadcast %cst_193 : f32 to vector<1x1xf32>
    %623 = arith.minimumf %622, %621 : vector<1x1xf32>
    %624 = math.absf %611 : vector<1x1xf32>
    %cst_194 = arith.constant 9.99999997E-7 : f32
    %625 = vector.broadcast %cst_194 : f32 to vector<1x1xf32>
    %626 = arith.cmpf olt, %624, %625 : vector<1x1xf32>
    %627 = arith.subf %600, %623 : vector<1x1xf32>
    %628 = arith.select %626, %600, %627 : vector<1x1xi1>, vector<1x1xf32>
    %629 = vector.broadcast %628 : vector<1x1xf32> to vector<1x16xf32>
    %630 = arith.addf %331, %629 : vector<1x16xf32>
    %631 = arith.negf %630 : vector<1x16xf32>
    %632 = math.exp %631 : vector<1x16xf32>
    %cst_195 = arith.constant 1.000000e+00 : f32
    %633 = vector.broadcast %cst_195 : f32 to vector<1x16xf32>
    %634 = arith.addf %633, %632 : vector<1x16xf32>
    %635 = arith.divf %633, %634 : vector<1x16xf32>
    %636 = vector.shape_cast %635 : vector<1x16xf32> to vector<1x1x16xf32>
    %c0_196 = arith.constant 0 : index
    %c0_197 = arith.constant 0 : index
    %c0_198 = arith.constant 0 : index
    %637 = vector.load %arg19[%c0_196, %c0_197, %c0_198] : memref<1x1x16xf32, #tpu.memory_space<vmem>>, vector<1x1x16xf32>
    tpu.vector_store %arg19[%c0_196, %c0_197, %c0_198], %636 {strides = array<i32>} : memref<1x1x16xf32, #tpu.memory_space<vmem>>, vector<1x1x16xf32>,
    return
  }
  func.func @transform_0(%arg0: i32, %arg1: memref<8xf32, #tpu.memory_space<smem>>, %arg2: memref<7xf32, #tpu.memory_space<smem>>) -> (i32, i32, i32) {
    %c0_i32 = arith.constant 0 : i32
    %c0_i32_0 = arith.constant 0 : i32
    %c0_i32_1 = arith.constant 0 : i32
    return %arg0, %c0_i32, %c0_i32_0 : i32, i32, i32
  }
  func.func @transform_1(%arg0: i32, %arg1: memref<8xf32, #tpu.memory_space<smem>>, %arg2: memref<7xf32, #tpu.memory_space<smem>>) -> (i32, i32, i32) {
    %c0_i32 = arith.constant 0 : i32
    %c0_i32_0 = arith.constant 0 : i32
    %c0_i32_1 = arith.constant 0 : i32
    return %arg0, %c0_i32, %c0_i32_0 : i32, i32, i32
  }
  func.func @transform_2(%arg0: i32, %arg1: memref<8xf32, #tpu.memory_space<smem>>, %arg2: memref<7xf32, #tpu.memory_space<smem>>) -> (i32, i32, i32) {
    %c0_i32 = arith.constant 0 : i32
    %c0_i32_0 = arith.constant 0 : i32
    %c0_i32_1 = arith.constant 0 : i32
    return %arg0, %c0_i32, %c0_i32_0 : i32, i32, i32
  }
  func.func @transform_3(%arg0: i32, %arg1: memref<8xf32, #tpu.memory_space<smem>>, %arg2: memref<7xf32, #tpu.memory_space<smem>>) -> (i32, i32, i32) {
    %c0_i32 = arith.constant 0 : i32
    %c0_i32_0 = arith.constant 0 : i32
    %c0_i32_1 = arith.constant 0 : i32
    return %arg0, %c0_i32, %c0_i32_0 : i32, i32, i32
  }
  func.func @transform_4(%arg0: i32, %arg1: memref<8xf32, #tpu.memory_space<smem>>, %arg2: memref<7xf32, #tpu.memory_space<smem>>) -> (i32, i32, i32) {
    %c0_i32 = arith.constant 0 : i32
    %c0_i32_0 = arith.constant 0 : i32
    %c0_i32_1 = arith.constant 0 : i32
    return %arg0, %c0_i32, %c0_i32_0 : i32, i32, i32
  }
  func.func @transform_5(%arg0: i32, %arg1: memref<8xf32, #tpu.memory_space<smem>>, %arg2: memref<7xf32, #tpu.memory_space<smem>>) -> (i32, i32, i32) {
    %c0_i32 = arith.constant 0 : i32
    %c0_i32_0 = arith.constant 0 : i32
    %c0_i32_1 = arith.constant 0 : i32
    return %arg0, %c0_i32, %c0_i32_0 : i32, i32, i32
  }
  func.func @transform_6(%arg0: i32, %arg1: memref<8xf32, #tpu.memory_space<smem>>, %arg2: memref<7xf32, #tpu.memory_space<smem>>) -> (i32, i32) {
    %c0_i32 = arith.constant 0 : i32
    %c0_i32_0 = arith.constant 0 : i32
    %c0_i32_1 = arith.constant 0 : i32
    return %c0_i32, %c0_i32_0 : i32, i32
  }
  func.func @transform_7(%arg0: i32, %arg1: memref<8xf32, #tpu.memory_space<smem>>, %arg2: memref<7xf32, #tpu.memory_space<smem>>) -> (i32, i32) {
    %c0_i32 = arith.constant 0 : i32
    %c0_i32_0 = arith.constant 0 : i32
    %c0_i32_1 = arith.constant 0 : i32
    return %c0_i32, %c0_i32_0 : i32, i32
  }
  func.func @transform_8(%arg0: i32, %arg1: memref<8xf32, #tpu.memory_space<smem>>, %arg2: memref<7xf32, #tpu.memory_space<smem>>) -> (i32, i32) {
    %c0_i32 = arith.constant 0 : i32
    %c0_i32_0 = arith.constant 0 : i32
    %c0_i32_1 = arith.constant 0 : i32
    return %c0_i32, %c0_i32_0 : i32, i32
  }
  func.func @transform_9(%arg0: i32, %arg1: memref<8xf32, #tpu.memory_space<smem>>, %arg2: memref<7xf32, #tpu.memory_space<smem>>) -> (i32, i32) {
    %c0_i32 = arith.constant 0 : i32
    %c0_i32_0 = arith.constant 0 : i32
    %c0_i32_1 = arith.constant 0 : i32
    return %c0_i32, %c0_i32_0 : i32, i32
  }
  func.func @transform_10(%arg0: i32, %arg1: memref<8xf32, #tpu.memory_space<smem>>, %arg2: memref<7xf32, #tpu.memory_space<smem>>) -> (i32, i32) {
    %c0_i32 = arith.constant 0 : i32
    %c0_i32_0 = arith.constant 0 : i32
    %c0_i32_1 = arith.constant 0 : i32
    return %c0_i32, %c0_i32_0 : i32, i32
  }
  func.func @transform_11(%arg0: i32, %arg1: memref<8xf32, #tpu.memory_space<smem>>, %arg2: memref<7xf32, #tpu.memory_space<smem>>) -> (i32, i32) {
    %c0_i32 = arith.constant 0 : i32
    %c0_i32_0 = arith.constant 0 : i32
    %c0_i32_1 = arith.constant 0 : i32
    return %c0_i32, %c0_i32_0 : i32, i32
  }
  func.func @transform_12(%arg0: i32, %arg1: memref<8xf32, #tpu.memory_space<smem>>, %arg2: memref<7xf32, #tpu.memory_space<smem>>) -> (i32, i32) {
    %c0_i32 = arith.constant 0 : i32
    %c0_i32_0 = arith.constant 0 : i32
    %c0_i32_1 = arith.constant 0 : i32
    return %c0_i32, %c0_i32_0 : i32, i32
  }
  func.func @transform_13(%arg0: i32, %arg1: memref<8xf32, #tpu.memory_space<smem>>, %arg2: memref<7xf32, #tpu.memory_space<smem>>) -> (i32, i32) {
    %c0_i32 = arith.constant 0 : i32
    %c0_i32_0 = arith.constant 0 : i32
    %c0_i32_1 = arith.constant 0 : i32
    return %c0_i32, %c0_i32_0 : i32, i32
  }
  func.func @transform_14(%arg0: i32, %arg1: memref<8xf32, #tpu.memory_space<smem>>, %arg2: memref<7xf32, #tpu.memory_space<smem>>) -> (i32, i32) {
    %c0_i32 = arith.constant 0 : i32
    %c0_i32_0 = arith.constant 0 : i32
    %c0_i32_1 = arith.constant 0 : i32
    return %c0_i32, %c0_i32_0 : i32, i32
  }
  func.func @transform_15(%arg0: i32, %arg1: memref<8xf32, #tpu.memory_space<smem>>, %arg2: memref<7xf32, #tpu.memory_space<smem>>) -> (i32, i32) {
    %c0_i32 = arith.constant 0 : i32
    %c0_i32_0 = arith.constant 0 : i32
    %c0_i32_1 = arith.constant 0 : i32
    return %c0_i32, %c0_i32_0 : i32, i32
  }
  func.func @transform_16(%arg0: i32, %arg1: memref<8xf32, #tpu.memory_space<smem>>, %arg2: memref<7xf32, #tpu.memory_space<smem>>) -> (i32, i32, i32) {
    %c0_i32 = arith.constant 0 : i32
    %c0_i32_0 = arith.constant 0 : i32
    %c0_i32_1 = arith.constant 0 : i32
    return %arg0, %c0_i32, %c0_i32_0 : i32, i32, i32
  }
  func.func @transform_17(%arg0: i32, %arg1: memref<8xf32, #tpu.memory_space<smem>>, %arg2: memref<7xf32, #tpu.memory_space<smem>>) -> (i32, i32, i32) {
    %c0_i32 = arith.constant 0 : i32
    %c0_i32_0 = arith.constant 0 : i32
    %c0_i32_1 = arith.constant 0 : i32
    return %arg0, %c0_i32, %c0_i32_0 : i32, i32, i32
  }
}

</mosaic_0001>

<bundles_post_ra>
// kernel: cnf_graph_model_forward.1
= control target key start
LH: loop header
LB: loop body
LE: loop exit
PB: predicated region body
PF: predicated region fallthrough
CT: control target
= control target key end

     0   :  { %s2623_s23 = smov [#allocation4]   ;;  %s3213_s0 = inlined_call_operand.hbm [shape: f32[8], index: 0, kind: input, shape index: {}]   ;;  %s3214_s2 = inlined_call_operand.vmem [shape: f32[8,16,5], index: 2, kind: input, shape index: {}]   ;;  %s3215_s3 = inlined_call_operand.vmem [shape: f32[8,1,3], index: 3, kind: input, shape index: {}]   ;;  %s3216_s4 = inlined_call_operand.vmem [shape: f32[8,16,3], index: 4, kind: input, shape index: {}]   ;;  %s3217_s5 = inlined_call_operand.vmem [shape: f32[8,3,16], index: 5, kind: input, shape index: {}]   ;;  %s3218_s6 = inlined_call_operand.vmem [shape: f32[8,16,16], index: 6, kind: input, shape index: {}]   ;;  %s3219_s7 = inlined_call_operand.vmem [shape: f32[8,16,16], index: 7, kind: input, shape index: {}]   ;;  %s3220_s8 = inlined_call_operand.vmem [shape: bf16[5,64], index: 8, kind: input, shape index: {}]   ;;  %s3221_s9 = inlined_call_operand.vmem [shape: bf16[3,64], index: 9, kind: input, shape index: {}]   ;;  %s3222_s10 = inlined_call_operand.vmem [shape: f32[1,64], index: 10, kind: input, shape index: {}]   ;;  %s3223_s11 = inlined_call_operand.vmem [shape: bf16[32,195], index: 11, kind: input, shape index: {}]   ;;  %s3224_s12 = inlined_call_operand.vmem [shape: bf16[3,32], index: 12, kind: input, shape index: {}]   ;;  %s3225_s13 = inlined_call_operand.vmem [shape: f32[3,32], index: 13, kind: input, shape index: {}, may-alias: {13,16}]   ;;  %s3226_s14 = inlined_call_operand.vmem [shape: bf16[32,195], index: 14, kind: input, shape index: {}]   ;;  %s3227_s15 = inlined_call_operand.vmem [shape: bf16[3,32], index: 15, kind: input, shape index: {}]   ;;  %s3228_s16 = inlined_call_operand.vmem [shape: f32[3,32], index: 16, kind: input, shape index: {}, may-alias: {13,16}]   ;;  %s3229_s17 = inlined_call_operand.vmem [shape: bf16[3,32], index: 17, kind: input, shape index: {}]   ;;  %s3230_s18 = inlined_call_operand.vmem [shape: f32[8,1,16], index: 18, kind: output, shape index: {0}]   ;;  %s3231_s19 = inlined_call_operand.vmem [shape: f32[8,1,1], index: 19, kind: output, shape index: {1}]   ;;  %s3232_s1 = inlined_call_operand.hbm [shape: f32[7], index: 1, kind: input, shape index: {}]  }
   0x1   :  { %3233 = sst [smem:[#allocation6_spill]] %s3213_s0  ;;  %s31_s22 = sshll.u32 %s3232_s1, 4  ;;  %s32_s22 = int_to_ptr.hbm [resolvable:$true] %s31_s22 }
   0x2   :  { %3234 = sst [smem:[#allocation7_spill]] %s3214_s2 }
   0x3   :  { %3235 = sst [smem:[#allocation8_spill]] %s3215_s3  ;;  %s2622_s3 = smov [#allocation3]  }
   0x4   :  { %3236 = sst [smem:[#allocation9_spill]] %s3216_s4 }
   0x5   :  { %3237 = sst [smem:[#allocation10_spill]] %s3217_s5 }
   0x6   :  { %s3238_s20 = sld [smem:[#allocation6_spill]] }
   0xc   :  { %s26_s5 = sshll.u32 %s3238_s20, 4  ;;  %s27_s5 = int_to_ptr.hbm [resolvable:$true] %s26_s5 }
   0xd   :  { %29 = dma.hbm_to_smem %s27_s5, 16, %s2622_s3, [#allocation2] }
   0xe   :  { %34 = dma.hbm_to_smem %s32_s22, 16, %s2623_s23, [#allocation2] }
   0xf   :  { %2616 = dma.done.wait [#allocation2], 32 }
  0x10   :  { %2617 = vsyncadd [#allocation2], 4294967264 }
  0x11   :  { %37 = sfence }
  0x12   :  { %s2742_s24 = smov 0  }
  0x13 LB: > { %s2748_s1 = sadd.s32 4294967295, %s2620_s24   ;;  %p2308_p0 = scmp.ge.s32.totalorder %s2620_s24, 1  ;;  %s2620_s24 = sphi %s2742_s24, %s43_s24  }
  0x14   : > { %p552_p1 = scmp.lt.s32.totalorder %s2620_s24, 9 }
  0x16   : > { %p553_p2 = pnand %p2308_p0, %p552_p1 }
  0x17   : > { %p627_p3 = scmp.lt.s32.totalorder (!%p553_p2), %s2748_s1, 7  ;;  %s3239_s0 = sld [smem:[#allocation8_spill]] (!%p553_p2) }
  0x18   : > { %556 = sbr.rel (%p553_p2) target bundleno = 4927 (0x133f), region = 84  ;;  %s3240_s22 = sld [smem:[#allocation7_spill]] (!%p553_p2) }
  0x19   : > { %s3241_s25 = sld [smem:[#allocation9_spill]] (!%p553_p2)  ;;  %s2626_s29 = smov (!%p553_p2), 96  }
  0x1a   : > { %s2856_s23 = sld [smem:[#allocation4 + $0x3]] (!%p553_p2)  ;;  %s2630_s21 = smov (!%p553_p2), 64  }
  0x1b   : > { %s2631_s2 = smov (!%p553_p2), 32   ;;  %s2368_s5 = sld [smem:[#allocation4 + $0x5]] (!%p553_p2) }
  0x1d   : > { %v677_v0 = vld [vmem:[%s3221_s9] sm:$0x3]  ;;  %vm682_vm0 = vcmask 1040384   ;;  %vm683_vm1 = vcmask 1041408   ;;  %vm707_vm2 = vcmask 1042432   ;;  %v2624_v1 = vmov 65535  }
  0x1e   : > { %v684_v2 = vsel %vm682_vm0, 4294967295, %v2624_v1  ;;  %v674_v3 = vld [vmem:[%s3220_s8] sm:$0x7]  ;;  %v708_v4 = vsel %vm683_vm1, 4294967295, %v2624_v1  ;;  %s2760_s27 = scalar_select %p627_p3, %s2748_s1, 7  ;;  %v2625_v9 = vmov 0  }
  0x1f   : > { %v685_v5 = vsel %vm683_vm1, %v684_v2, 0  ;;  %v709_v6 = vsel %vm707_vm2, %v708_v4, 0  ;;  %2431 = vset.pattern.permute.xlu0 %v2625_v9  ;;  %2432 = vset.pattern.permute.xlu1 %v2625_v9  ;;  %vm678_vm3 = vcmask 23552   ;;  %vm703_vm4 = vcmask 39936   ;;  %v2452_v22 = vld [vmem:[%s3222_s10] ss:$0 sm:$0xff] }
  0x20   : > { %v687_v7 = vand.u32 %v685_v5, %v677_v0  ;;  %v711_v8 = vand.u32 %v709_v6, %v674_v3  ;;  %s634_s30 = scalar_lea.vmem %s3239_s0, %s2760_s27  ;;  %s2769_s20 = sshll.u32 %s2760_s27, 4  ;;  %v2332_v61 = vld [vmem:[%s3223_s11 + $0x10] sm:$0xf]  ;;  %v2404_v62 = vld [vmem:[%s3223_s11 + $0x14] sm:$0xf0]  ;;  %vm834_vm13 = vcmask 261120  }
  0x21   : > { %v675_v10 = vld [vmem:[%s634_s30] sm:$0x1]  ;;  %s631_s3 = scalar_lea.vmem %s3240_s22, %s2769_s20  ;;  %s639_s4 = scalar_lea.vmem %s3241_s25, %s2769_s20  ;;  %v2403_v63 = vld [vmem:[%s3223_s11 + $0x14] sm:$0xf]  ;;  %v2333_v0 = vor.u32 %v2404_v62, %v2332_v61  ;;  %v2334_v1 = vld [vmem:[%s3223_s11 + $0x18] sm:$0xf0] }
  0x22   : > { %696 = vmatpush.bf16.msra.mxu0 %v687_v7  ;;  %720 = vmatpush.bf16.msra.mxu1 %v711_v8  ;;  %v676_v11 = vpack.c.bf16 %v675_v10, %v675_v10  ;;  %v671_v12 = vld [vmem:[%s631_s3] sm:$0xff]  ;;  %v672_v13 = vld [vmem:[%s631_s3 + $0x8] sm:$0xff]  ;;  %v2337_v2 = vor.u32 %v2403_v63, %v2334_v1  ;;  %v2627_v10 = vmov 66   ;;  %s2874_s0 = scalar_lea.vmem %s3218_s6, %s2769_s20  ;;  %vm910_vm0 = vcmask 130048   ;;  %s2343_s30 = sld [smem:[#allocation4 + $0x2]] }
  0x23   : > { %v673_v14 = vpack.c.bf16 %v672_v13, %v671_v12  ;;  %v2779_v15 = vld [vmem:[%s639_s4] sm:$0xff]  ;;  %v2783_v17 = vld [vmem:[%s639_s4 + $0x8] sm:$0xff]  ;;  %844 = vmatpush.bf16.msra.mxu2 %v2333_v0  ;;  %2434 = vset.pattern.permute.xlu2 %v2627_v10  ;;  %s2862_s4 = scalar_lea.vmem %s3219_s7, %s2769_s20  ;;  %s2886_s20 = sld [smem:[#allocation4 + $0x1]] }
  0x24   : > { %v785_v16 = vsub.f32 1.0, %v2779_v15  ;;  %775 = vperm.xlu1 %2432, %v2779_v15   ;;  %v786_v18 = vsub.f32 1.0, %v2783_v17  ;;  %858 = vmatpush.bf16.msra.mxu3 %v2337_v2  ;;  %v2324_v3 = vld [vmem:[%s3223_s11] sm:$0xf]  ;;  %v2402_v4 = vld [vmem:[%s3223_s11 + $0x4] sm:$0xf0]  ;;  %s659_s28 = scalar_lea.vmem %s3231_s19, %s2760_s27 }
  0x25   : > { %2318 = vmatmul.msk.bf16.vlgmr.msra.gmra.mxu0 %vm678_vm3, %v676_v11  ;;  %2319 = vmatmul.msk.bf16.vlgmr.msra.gmra.mxu1 %vm703_vm4, %v673_v14  ;;  %v2401_v5 = vld [vmem:[%s3223_s11 + $0x4] sm:$0xf]  ;;  %v2325_v6 = vor.u32 %v2402_v4, %v2324_v3  ;;  %v2326_v7 = vld [vmem:[%s3223_s11 + $0x8] sm:$0xf0]  ;;  %v2628_v11 = vmov 65   ;;  %s3056_s25 = sld [smem:[#allocation4 + $0x6]] }
  0x26   : > { %789 = vperm.xlu0 %2431, %v785_v16   ;;  %v2329_v8 = vor.u32 %v2401_v5, %v2326_v7  ;;  %v2901_v2 = vld [vmem:[%s2874_s0 + $0x8] sm:$0xff] }
  0x27   : > { %845 = vmatpush.bf16.msra.mxu2 %v2325_v6  ;;  %vm670_vm3 = vcmp.gt.f32.partialorder %v2901_v2, 0.0 }
  0x28   : > { %859 = vmatpush.bf16.msra.mxu3 %v2329_v8 }
  0x2c   : > { %780 = vperm.xlu1 %2432, %v2783_v17  }
  0x2e   : > { %794 = vperm.xlu0 %2431, %v786_v18  }
  0x34   : > { %2435 = vset.pattern.permute.xlu1 %v2628_v11 }
  0x36   : > { %2433 = vset.pattern.permute.xlu0 %v2628_v11 }
  0x96   : > { %v2819_v12 = vpop.permute.xlu1 %775 }
  0x98   : > { %v790_v45 = vpop.permute.xlu0 %789 }
  0x9e   : > { %v2821_v14 = vpop.permute.xlu1 %780 }
  0xa0   : > { %v795_v59 = vpop.permute.xlu0 %794 }
  0xa2   : > { %v698_v19 = vpop.f32.mrf.mxu0  ;;  %v722_v21 = vpop.f32.mrf.mxu1 }
  0xa3   : > { %v702_v20 = vperm.slane %v698_v19, 0 }
  0xa5   : > { %v723_v23 = vadd.f32 %v722_v21, %v702_v20 }
  0xa7   : > { %v731_v24 = vadd.f32 %v2452_v22, %v723_v23 }
  0xa9   : > { %v2320_v25 = vmul.f32 -1.442695, %v731_v24 }
  0xaa   : > { %v700_v26 = vpop.f32.mrf.mxu0  ;;  %v724_v27 = vpop.f32.mrf.mxu1 }
  0xab   : > { %2459 = vpow2.f32 %v2320_v25  ;;  %v725_v28 = vadd.f32 %v724_v27, %v702_v20 }
  0xad   : > { %v732_v29 = vadd.f32 %v2452_v22, %v725_v28 }
  0xaf   : > { %v2321_v30 = vmul.f32 -1.442695, %v732_v29 }
  0xb1   : > { %v2460_v31 = vpop.eup %2459  ;;  %2461 = vpow2.f32 %v2321_v30 }
  0xb2   : > { %v739_v32 = vadd.f32 1.0, %v2460_v31  ;;  %v2629_v31 = vmov 64  }
  0xb4   : > { %2463 = vrcp.f32 %v739_v32  ;;  %v752_v38 = vand.u32 2147483648, %v739_v32  ;;  %v750_v40 = vand.u32 2147483647, %v739_v32  ;;  %vm746_vm6 = vweird.f32 %v739_v32 }
  0xb6   : > { %v753_v43 = vor.u32 1.1754944e-38, %v752_v38  ;;  %vm751_vm8 = vcmp.eq.f32.partialorder %v750_v40, 8.507059e+37 }
  0xb7   : > { %v2462_v33 = vpop.eup %2461 }
  0xb8   : > { %v740_v34 = vadd.f32 1.0, %v2462_v33  ;;  %v2865_v33 = vld [vmem:[%s2862_s4] sm:$0xff] }
  0xba   : > { %v2464_v35 = vpop.eup %2463  ;;  %2465 = vrcp.f32 %v740_v34  ;;  %v767_v50 = vand.u32 2147483648, %v740_v34  ;;  %v765_v52 = vand.u32 2147483647, %v740_v34  ;;  %vm761_vm10 = vweird.f32 %v740_v34 }
  0xbb   : > { %v742_v36 = vmul.f32 %v2464_v35, %v739_v32  ;;  %vm747_vm5 = vweird.f32 %v2464_v35 }
  0xbc   : > { %vm748_vm7 = vmor %vm746_vm6, %vm747_vm5  ;;  %v768_v55 = vor.u32 1.1754944e-38, %v767_v50  ;;  %vm766_vm12 = vcmp.eq.f32.partialorder %v765_v52, 8.507059e+37 }
  0xbd   : > { %v743_v37 = vsub.f32 1.0, %v742_v36 }
  0xbf   : > { %v744_v39 = vmul.f32 %v2464_v35, %v743_v37 }
  0xc0   : > { %v2466_v41 = vpop.eup %2465 }
  0xc1   : > { %v745_v42 = vadd.f32 %v2464_v35, %v744_v39  ;;  %v757_v44 = vmul.f32 %v2466_v41, %v740_v34  ;;  %vm762_vm9 = vweird.f32 %v2466_v41  ;;  %v1067_v34 = vstv %s2856_s23  ;;  %v2877_v39 = vld [vmem:[%s2874_s0] sm:$0xff]  ;;  %s3046_s23 = sld [smem:[#allocation4 + $0x4]] }
  0xc2   : > { %vm763_vm11 = vmor %vm761_vm10, %vm762_vm9  ;;  %v1068_v36 = vmul.f32 %v1067_v34, %v2865_v33  ;;  %vm669_vm14 = vcmp.gt.f32.partialorder %v2877_v39, 0.0 }
  0xc3   : > { %v749_v46 = vsel %vm748_vm7, %v2464_v35, %v745_v42  ;;  %v758_v48 = vsub.f32 1.0, %v757_v44 }
  0xc4   : > { %v754_v47 = vsel %vm751_vm8, %v753_v43, %v749_v46  ;;  %v897_v46 = vstv %s2886_s20 }
  0xc5   : > { %v771_v49 = vmul.f32 %v754_v47, %v731_v24  ;;  %v759_v51 = vmul.f32 %v2466_v41, %v758_v48  ;;  %v866_v24 = vld [vmem:[%s3224_s12] sm:$0x3]  ;;  %v980_v48 = vstv %s2343_s30  ;;  %v898_v50 = vmul.f32 %v897_v46, %v2865_v33  ;;  %s656_s30 = scalar_lea.vmem %s3230_s18, %s2760_s27 }
  0xc6   : > { %v981_v52 = vmul.f32 %v980_v48, %v2865_v33 }
  0xc7   : > { %v797_v53 = vmul.f32 %v790_v45, %v771_v49  ;;  %v760_v54 = vadd.f32 %v2466_v41, %v759_v51  ;;  %v783_v16 = vmul.f32 %v2819_v12, %v771_v49 }
  0xc9   : > { %801 = vrot.lane.b32.xlu2 %v797_v53, %s2626_s29  ;;  %v764_v56 = vsel %vm763_vm11, %v2466_v41, %v760_v54 }
  0xca   : > { %v769_v57 = vsel %vm766_vm12, %v768_v55, %v764_v56 }
  0xcb   : > { %v772_v58 = vmul.f32 %v769_v57, %v732_v29  ;;  %v2894_v57 = vld [vmem:[%s2862_s4 + $0x8] sm:$0xff]  ;;  %s3242_s4 = sld [smem:[#allocation10_spill]] }
  0xcc   : > { %v982_v61 = vmul.f32 %v980_v48, %v2894_v57  ;;  %v899_v8 = vmul.f32 %v897_v46, %v2894_v57 }
  0xcd   : > { %v798_v60 = vmul.f32 %v795_v59, %v772_v58  ;;  %v784_v18 = vmul.f32 %v2821_v14, %v772_v58 }
  0xd1   : > { %803 = vrot.lane.b32.xlu2 %v798_v60, %s2626_s29 }
 0x123   : > { %v802_v13 = vpop.permute.xlu2 %801 }
 0x124   : > { %v807_v20 = vadd.f32 %v802_v13, %v783_v16 }
 0x12b   : > { %v804_v19 = vpop.permute.xlu2 %803 }
 0x12c   : > { %v808_v21 = vadd.f32 %v804_v19, %v784_v18  ;;  %v1069_v18 = vmul.f32 %v1067_v34, %v2894_v57 }
 0x12e   : > { %v809_v22 = vpack.c.bf16 %v808_v21, %v807_v20 }
 0x130   : > { %2338 = vmatmul.msk.bf16.vlgmr.msra.gmra.mxu2 %vm834_vm13, %v809_v22  ;;  %2339 = vmatmul.msk.bf16.vlgmr.msra.gmra.mxu3 %vm834_vm13, %v809_v22  ;;  %v836_v23 = vsel %vm834_vm13, %v809_v22, 0 }
 0x131   : > { %877 = vmatpush.bf16.xpose.msrb.mxu0 %v836_v23 }
 0x138   : > { %2340 = vmatmul.msk.bf16.vlgmr.msrb.gmra.mxu0 %vm834_vm13, %v866_v24 }
 0x1b3   : > { %v2832_v25 = vpop.f32.mrf.mxu2  ;;  %v2834_v26 = vpop.f32.mrf.mxu3 }
 0x1b4   : > { %1056 = vperm.xlu2 %2434, %v2834_v26   ;;  %969 = vperm.xlu0 %2433, %v2834_v26  }
 0x1b5   : > { %v2838_v27 = vpop.f32.mrf.mxu0 }
 0x1b6   : > { %v1063_v35 = vperm.slane %v2838_v27, 2  ;;  %v893_v45 = vperm.slane %v2838_v27, 0  ;;  %v976_v49 = vperm.slane %v2838_v27, 1 }
 0x1bb   : > { %v2840_v28 = vpop.f32.mrf.mxu2  ;;  %v2842_v29 = vpop.f32.mrf.mxu3 }
 0x1bc   : > { %v2846_v30 = vpack.c.bf16 %v2840_v28, %v2832_v25  ;;  %2437 = vset.pattern.permute.xlu2 %v2629_v31  ;;  %2438 = vset.pattern.permute.xlu0 %v2629_v31 }
 0x1bd   : > { %973 = vperm.xlu1 %2435, %v2842_v29   ;;  %885 = vperm.xlu2 %2437, %v2834_v26   ;;  %v881_v32 = vpop.f32.mrf.mxu0 }
 0x1be   : > { %890 = vperm.xlu0 %2438, %v2842_v29   ;;  %955 = vmatpush.bf16.msrb.mxu1 %v2846_v30 }
 0x1c5   : > { %2436 = vset.pattern.permute.xlu1 %v2627_v10 }
 0x1c6   : > { %1060 = vperm.xlu1 %2436, %v2842_v29  }
 0x20e   : > { %v1057_v37 = vpop.permute.xlu2 %1056 }
 0x20f   : > { %v1064_v38 = vadd.f32 %v1063_v35, %v1057_v37 }
 0x211   : > { %v1070_v40 = vadd.f32 %v1068_v36, %v1064_v38 }
 0x213   : > { %vm1072_vm15 = vcmp.gt.f32.partialorder %v1070_v40, 0.0  ;;  %v1074_v41 = vmul.f32 0.2, %v1070_v40 }
 0x215   : > { %v1076_v42 = vsel %vm1072_vm15, %v1070_v40, %v1074_v41  ;;  %vm1539_vm15 = vcmask 122880  }
 0x216   : > { %v2882_v43 = vsel %vm669_vm14, %v1076_v42, -1e+30 }
 0x217   : > { %v1080_v44 = vsel %vm910_vm0, %v2882_v43, -inf  ;;  %v886_v47 = vpop.permute.xlu2 %885 }
 0x218   : > { %1081 = vmax.xlane.f32.xlu0 %v1080_v44  ;;  %v894_v51 = vadd.f32 %v893_v45, %v886_v47 }
 0x21a   : > { %v900_v55 = vadd.f32 %v898_v50, %v894_v51 }
 0x21c   : > { %v904_v60 = vmul.f32 0.2, %v900_v55  ;;  %vm902_vm2 = vcmp.gt.f32.partialorder %v900_v55, 0.0 }
 0x21e   : > { %v906_v3 = vsel %vm902_vm2, %v900_v55, %v904_v60 }
 0x21f   : > { %v908_v7 = vsel %vm669_vm14, %v906_v3, -1e+30 }
 0x220   : > { %v911_v20 = vsel %vm910_vm0, %v908_v7, -inf }
 0x226   : > { %v970_v53 = vpop.permute.xlu0 %969 }
 0x227   : > { %v977_v54 = vadd.f32 %v976_v49, %v970_v53 }
 0x229   : > { %v983_v56 = vadd.f32 %v981_v52, %v977_v54 }
 0x22b   : > { %vm985_vm1 = vcmp.gt.f32.partialorder %v983_v56, 0.0  ;;  %v987_v58 = vmul.f32 0.2, %v983_v56 }
 0x22d   : > { %v989_v59 = vsel %vm985_vm1, %v983_v56, %v987_v58 }
 0x22e   : > { %v991_v62 = vsel %vm669_vm14, %v989_v59, -1e+30 }
 0x22f   : > { %v974_v63 = vpop.permute.xlu1 %973  ;;  %v993_v0 = vsel %vm910_vm0, %v991_v62, -inf }
 0x230   : > { %v978_v1 = vadd.f32 %v976_v49, %v974_v63  ;;  %994 = vmax.xlane.f32.xlu1 %v993_v0  ;;  %v891_v5 = vpop.permute.xlu0 %890 }
 0x231   : > { %v895_v16 = vadd.f32 %v893_v45, %v891_v5 }
 0x232   : > { %v984_v4 = vadd.f32 %v982_v61, %v978_v1 }
 0x233   : > { %v901_v24 = vadd.f32 %v899_v8, %v895_v16 }
 0x234   : > { %vm986_vm4 = vcmp.gt.f32.partialorder %v984_v4, 0.0  ;;  %v988_v6 = vmul.f32 0.2, %v984_v4 }
 0x235   : > { %v905_v37 = vmul.f32 0.2, %v901_v24  ;;  %vm903_vm6 = vcmp.gt.f32.partialorder %v901_v24, 0.0 }
 0x236   : > { %v990_v13 = vsel %vm986_vm4, %v984_v4, %v988_v6 }
 0x237   : > { %v992_v19 = vsel %vm670_vm3, %v990_v13, -1e+30  ;;  %v907_v40 = vsel %vm903_vm6, %v901_v24, %v905_v37 }
 0x238   : > { %v1061_v21 = vpop.permute.xlu1 %1060  ;;  %v996_v22 = vsel %vm910_vm0, %v992_v19, -inf  ;;  %912 = vmax.xlane.f32.xlu1 %v911_v20  ;;  %v909_v41 = vsel %vm670_vm3, %v907_v40, -1e+30 }
 0x239   : > { %v1065_v23 = vadd.f32 %v1063_v35, %v1061_v21  ;;  %997 = vmax.xlane.f32.xlu2 %v996_v22  ;;  %v914_v35 = vsel %vm910_vm0, %v909_v41, -inf }
 0x23b   : > { %v1071_v27 = vadd.f32 %v1069_v18, %v1065_v23  ;;  %v2632_v23 = vmov 1  }
 0x23c   : > { %2439 = vset.pattern.permute.xlu1 %v2632_v23  ;;  %2440 = vset.pattern.permute.xlu0 %v2632_v23 }
 0x23d   : > { %vm1073_vm5 = vcmp.gt.f32.partialorder %v1071_v27, 0.0  ;;  %v1075_v32 = vmul.f32 0.2, %v1071_v27 }
 0x23f   : > { %v1077_v36 = vsel %vm1073_vm5, %v1071_v27, %v1075_v32 }
 0x240   : > { %v1079_v34 = vsel %vm670_vm3, %v1077_v36, -1e+30 }
 0x241   : > { %v1083_v38 = vsel %vm910_vm0, %v1079_v34, -inf }
 0x242   : > { %1084 = vmax.xlane.f32.xlu2 %v1083_v38 }
 0x24a   : > { %915 = vmax.xlane.f32.xlu2 %v914_v35 }
 0x28b   : > { %v1082_v42 = vpop.xlane.xlu0 %1081 }
 0x28c   : > { %v1086_v44 = vsub.f32 %v2882_v43, %v1082_v42 }
 0x28e   : > { %v1088_v45 = vmul.f32 1.442695, %v1086_v44 }
 0x290   : > { %2467 = vpow2.f32 %v1088_v45 }
 0x296   : > { %v2919_v46 = vpop.eup %2467 }
 0x297   : > { %v1092_v47 = vsel %vm910_vm0, %v2919_v46, 0.0 }
 0x298   : > { %1093 = vadd.xlane.f32.xlu0 %v1092_v47 }
 0x2a3   : > { %v995_v48 = vpop.xlane.xlu1 %994 }
 0x2a4   : > { %v999_v49 = vsub.f32 %v991_v62, %v995_v48 }
 0x2a6   : > { %v1001_v50 = vmul.f32 1.442695, %v999_v49 }
 0x2a8   : > { %2469 = vpow2.f32 %v1001_v50 }
 0x2ab   : > { %v913_v51 = vpop.xlane.xlu1 %912 }
 0x2ac   : > { %v998_v52 = vpop.xlane.xlu2 %997  ;;  %v917_v53 = vsub.f32 %v908_v7, %v913_v51 }
 0x2ad   : > { %v1000_v55 = vsub.f32 %v992_v19, %v998_v52  ;;  %v2357_v52 = vld [vmem:[%s3226_s14 + $0x10] sm:$0xf] }
 0x2ae   : > { %v2923_v54 = vpop.eup %2469  ;;  %v919_v56 = vmul.f32 1.442695, %v917_v53  ;;  %v2407_v53 = vld [vmem:[%s3226_s14 + $0x14] sm:$0xf] }
 0x2af   : > { %v1005_v43 = vsel %vm910_vm0, %v2923_v54, 0.0  ;;  %v1003_v58 = vmul.f32 1.442695, %v1000_v55 }
 0x2b0   : > { %2471 = vpow2.f32 %v919_v56  ;;  %1006 = vadd.xlane.f32.xlu1 %v1005_v43  ;;  %v2349_v43 = vld [vmem:[%s3226_s14] sm:$0xf] }
 0x2b1   : > { %2473 = vpow2.f32 %v1003_v58  ;;  %v2406_v58 = vld [vmem:[%s3226_s14 + $0x4] sm:$0xf0] }
 0x2b5   : > { %v1085_v59 = vpop.xlane.xlu2 %1084 }
 0x2b6   : > { %v2927_v60 = vpop.eup %2471  ;;  %v1087_v61 = vsub.f32 %v1079_v34, %v1085_v59  ;;  %v2405_v59 = vld [vmem:[%s3226_s14 + $0x4] sm:$0xf] }
 0x2b7   : > { %v923_v62 = vsel %vm910_vm0, %v2927_v60, 0.0  ;;  %v2931_v0 = vpop.eup %2473 }
 0x2b8   : > { %v1090_v63 = vmul.f32 1.442695, %v1087_v61  ;;  %924 = vadd.xlane.f32.xlu2 %v923_v62  ;;  %v1008_v4 = vsel %vm910_vm0, %v2931_v0, 0.0  ;;  %v2351_v61 = vld [vmem:[%s3226_s14 + $0x8] sm:$0xf0] }
 0x2b9   : > { %v2354_v62 = vor.u32 %v2405_v59, %v2351_v61 }
 0x2ba   : > { %2475 = vpow2.f32 %v1090_v63 }
 0x2bd   : > { %v916_v1 = vpop.xlane.xlu2 %915 }
 0x2be   : > { %v918_v3 = vsub.f32 %v909_v41, %v916_v1 }
 0x2c0   : > { %v2476_v5 = vpop.eup %2475  ;;  %v921_v6 = vmul.f32 1.442695, %v918_v3  ;;  %1009 = vadd.xlane.f32.xlu2 %v1008_v4  ;;  %v2455_v4 = vld [vmem:[%s3225_s13 + $0x1] ss:$0 sm:$0xff] }
 0x2c1   : > { %v1095_v7 = vsel %vm910_vm0, %v2476_v5, 0.0 }
 0x2c2   : > { %2477 = vpow2.f32 %v921_v6  ;;  %1096 = vadd.xlane.f32.xlu1 %v1095_v7 }
 0x2c8   : > { %v2478_v8 = vpop.eup %2477 }
 0x2c9   : > { %v926_v13 = vsel %vm910_vm0, %v2478_v8, 0.0 }
 0x2ca   : > { %927 = vadd.xlane.f32.xlu0 %v926_v13  ;;  %v2454_v13 = vld [vmem:[%s3225_s13] ss:$0 sm:$0xff] }
 0x2d8   : > { %1105 = vrot.lane.b32.xlu2 %v2846_v30, %s2630_s21 }
 0x2db   : > { %1019 = vrot.lane.b32.xlu1 %v2846_v30, %s2626_s29 }
 0x2de   : > { %939 = vrot.lane.b32.xlu0 %v2832_v25, %s2631_s2  ;;  %v2633_v25 = vmov 2  }
 0x2df   : > { %2441 = vset.pattern.permute.xlu2 %v2633_v25 }
 0x2e0   : > { %1110 = vrot.lane.b32.xlu2 %v2842_v29, %s2626_s29 }
 0x2e3   : > { %941 = vrot.lane.b32.xlu1 %v2840_v28, %s2631_s2 }
 0x2e6   : > { %1108 = vrot.lane.b32.xlu0 %v2834_v26, %s2626_s29 }
 0x2e8   : > { %1136 = vperm.xlu2 %2441, %v2779_v15  }
 0x2eb   : > { %1044 = vperm.xlu1 %2439, %v2779_v15  }
 0x2ee   : > { %1048 = vperm.xlu0 %2440, %v2783_v17  }
 0x2f0   : > { %2443 = vset.pattern.permute.xlu2 %v2629_v31 }
 0x2f3   : > { %2442 = vset.pattern.permute.xlu1 %v2633_v25 }
 0x2f4   : > { %1140 = vperm.xlu1 %2442, %v2783_v17  }
 0x2f6   : > { %2444 = vset.pattern.permute.xlu0 %v2628_v11 }
 0x2fc   : > { %2445 = vset.pattern.permute.xlu1 %v2629_v31  ;;  %v2408_v31 = vld [vmem:[%s3226_s14 + $0x14] sm:$0xf0] }
 0x2fd   : > { %v2358_v55 = vor.u32 %v2408_v31, %v2357_v52  ;;  %v1205_v52 = vld [vmem:[%s3227_s15] sm:$0x3] }
 0x2ff   : > { %1183 = vmatpush.bf16.msra.mxu0 %v2358_v55 }
 0x30b   : > { %v1094_v19 = vpop.xlane.xlu0 %1093 }
 0x30c   : > { %v1098_v20 = vmax.f32 %v1094_v19, 1e-20 }
 0x30e   : > { %2479 = vrcp.f32 %v1098_v20 }
 0x314   : > { %v2480_v27 = vpop.eup %2479 }
 0x315   : > { %v1102_v38 = vmul.f32 %v2480_v27, %v2919_v46 }
 0x323   : > { %v1007_v18 = vpop.xlane.xlu1 %1006 }
 0x324   : > { %v1011_v41 = vmax.f32 %v1007_v18, 1e-20 }
 0x32b   : > { %v925_v16 = vpop.xlane.xlu2 %924 }
 0x32c   : > { %v929_v28 = vmax.f32 %v925_v16, 1e-20 }
 0x333   : > { %v1010_v21 = vpop.xlane.xlu2 %1009 }
 0x334   : > { %v1012_v37 = vmax.f32 %v1010_v21, 1e-20 }
 0x335   : > { %v1097_v22 = vpop.xlane.xlu1 %1096 }
 0x336   : > { %v1099_v30 = vmax.f32 %v1097_v22, 1e-20 }
 0x338   : > { %2481 = vrcp.f32 %v1099_v30  ;;  %v2453_v30 = vld [vmem:[%s3225_s13 + $0x2] ss:$0 sm:$0xff] }
 0x339   : > { %2483 = vrcp.f32 %v929_v28 }
 0x33b   : > { %v1106_v24 = vpop.permute.xlu2 %1105 }
 0x33c   : > { %1124 = vmatpush.bf16.msrb.mxu3 %v1106_v24 }
 0x33d   : > { %v928_v32 = vpop.xlane.xlu0 %927 }
 0x33e   : > { %v2482_v36 = vpop.eup %2481  ;;  %v930_v34 = vmax.f32 %v928_v32, 1e-20 }
 0x33f   : > { %v1103_v40 = vmul.f32 %v2482_v36, %v2476_v5  ;;  %v2484_v15 = vpop.eup %2483 }
 0x340   : > { %2485 = vrcp.f32 %v930_v34  ;;  %v933_v44 = vmul.f32 %v2484_v15, %v2927_v60  ;;  %v2350_v60 = vor.u32 %v2406_v58, %v2349_v43 }
 0x341   : > { %v1104_v35 = vpack.c.bf16 %v1103_v40, %v1102_v38  ;;  %2487 = vrcp.f32 %v1012_v37 }
 0x342   : > { %2489 = vrcp.f32 %v1011_v41  ;;  %1184 = vmatpush.bf16.msra.mxu0 %v2350_v60 }
 0x343   : > { %2346 = vmatmul.msk.bf16.vlgmr.msrb.gmra.mxu3 %vm910_vm0, %v1104_v35  ;;  %v1111_v6 = vpop.permute.xlu2 %1110 }
 0x346   : > { %v2486_v42 = vpop.eup %2485 }
 0x347   : > { %v934_v45 = vmul.f32 %v2486_v42, %v2478_v8  ;;  %v2488_v46 = vpop.eup %2487 }
 0x348   : > { %v2490_v48 = vpop.eup %2489  ;;  %v1016_v49 = vmul.f32 %v2488_v46, %v2931_v0 }
 0x349   : > { %v935_v47 = vpack.c.bf16 %v934_v45, %v933_v44  ;;  %v1015_v17 = vmul.f32 %v2490_v48, %v2923_v54  ;;  %v2359_v54 = vld [vmem:[%s3226_s14 + $0x18] sm:$0xf0] }
 0x34a   : > { %v2362_v56 = vor.u32 %v2407_v53, %v2359_v54 }
 0x34b   : > { %2342 = vmatmul.msk.bf16.vlgmr.msrb.gmra.mxu1 %vm910_vm0, %v935_v47  ;;  %v1017_v51 = vpack.c.bf16 %v1016_v49, %v1015_v17  ;;  %v3002_v34 = vpop.permute.xlu2 %1136 }
 0x34c   : > { %1197 = vmatpush.bf16.msra.mxu1 %v2362_v56 }
 0x34d   : > { %v1020_v50 = vpop.permute.xlu1 %1019 }
 0x34e   : > { %1032 = vmatpush.bf16.msrb.mxu2 %v1020_v50 }
 0x350   : > { %1198 = vmatpush.bf16.msra.mxu1 %v2354_v62  ;;  %v940_v63 = vpop.permute.xlu0 %939 }
 0x351   : > { %2344 = vmatmul.msk.bf16.vlgmr.msrb.gmra.mxu2 %vm910_vm0, %v1017_v51 }
 0x355   : > { %v942_v1 = vpop.permute.xlu1 %941 }
 0x358   : > { %v1109_v7 = vpop.permute.xlu0 %1108 }
 0x35d   : > { %v2994_v18 = vpop.permute.xlu1 %1044 }
 0x360   : > { %v3004_v38 = vpop.permute.xlu0 %1048 }
 0x366   : > { %v3006_v15 = vpop.permute.xlu1 %1140 }
 0x3c6   : > { %v1126_v3 = vpop.f32.mrf.mxu3 }
 0x3c7   : > { %v1127_v22 = vadd.f32 %v1126_v3, %v1109_v7 }
 0x3c8   : > { %v957_v0 = vpop.f32.mrf.mxu1 }
 0x3c9   : > { %v958_v8 = vadd.f32 %v957_v0, %v940_v63  ;;  %v1133_v32 = vadd.f32 %v2453_v30, %v1127_v22  ;;  %v1318_v63 = vstv %s2368_s5  ;;  %v1397_v22 = vstv %s3056_s25  ;;  %s3142_s25 = sld [smem:[#allocation3 + %s2748_s1]] }
 0x3ca   : > { %s1493_s1 = sld [smem:[#allocation4]] }
 0x3cb   : > { %v964_v23 = vadd.f32 %v2454_v13, %v958_v8  ;;  %v1143_v42 = vmul.f32 %v3002_v34, %v1133_v32 }
 0x3cd   : > { %v966_v36 = vmul.f32 %v964_v23, %v2819_v12  ;;  %v1399_v23 = vmul.f32 %v1397_v22, %v2894_v57 }
 0x3ce   : > { %v1128_v21 = vpop.f32.mrf.mxu3 }
 0x3cf   : > { %v1129_v28 = vadd.f32 %v1128_v21, %v1111_v6 }
 0x3d0   : > { %v959_v19 = vpop.f32.mrf.mxu1 }
 0x3d1   : > { %v960_v25 = vadd.f32 %v959_v19, %v942_v1  ;;  %v1134_v40 = vadd.f32 %v2453_v30, %v1129_v28  ;;  %v1319_v28 = vmul.f32 %v1318_v63, %v2865_v33 }
 0x3d3   : > { %v1144_v46 = vmul.f32 %v3006_v15, %v1134_v40 }
 0x3d4   : > { %v1034_v5 = vpop.f32.mrf.mxu2 }
 0x3d5   : > { %v1035_v16 = vadd.f32 %v1034_v5, %v2834_v26  ;;  %v965_v26 = vadd.f32 %v2454_v13, %v960_v25 }
 0x3d7   : > { %v1041_v20 = vadd.f32 %v2455_v4, %v1035_v16  ;;  %v967_v44 = vmul.f32 %v965_v26, %v2821_v14 }
 0x3d9   : > { %v1051_v24 = vmul.f32 %v2994_v18, %v1041_v20 }
 0x3db   : > { %v1053_v41 = vadd.f32 %v1051_v24, %v966_v36 }
 0x3dc   : > { %v1036_v27 = vpop.f32.mrf.mxu2 }
 0x3dd   : > { %v1037_v37 = vadd.f32 %v1036_v27, %v2842_v29  ;;  %v1145_v47 = vadd.f32 %v1143_v42, %v1053_v41 }
 0x3df   : > { %v1042_v35 = vadd.f32 %v2455_v4, %v1037_v37  ;;  %v1147_v49 = vmax.f32 %v1145_v47, 0.0 }
 0x3e1   : > { %v1052_v45 = vmul.f32 %v3004_v38, %v1042_v35 }
 0x3e3   : > { %v1054_v48 = vadd.f32 %v1052_v45, %v967_v44 }
 0x3e5   : > { %v1146_v29 = vadd.f32 %v1144_v46, %v1054_v48 }
 0x3e7   : > { %v1148_v17 = vmax.f32 %v1146_v29, 0.0 }
 0x3e9   : > { %v1149_v50 = vpack.c.bf16 %v1148_v17, %v1147_v49 }
 0x3eb   : > { %2363 = vmatmul.msk.bf16.vlgmr.msra.gmra.mxu0 %vm834_vm13, %v1149_v50  ;;  %2364 = vmatmul.msk.bf16.vlgmr.msra.gmra.mxu1 %vm834_vm13, %v1149_v50  ;;  %v1175_v51 = vsel %vm834_vm13, %v1149_v50, 0 }
 0x3ec   : > { %1216 = vmatpush.bf16.xpose.msra.mxu2 %v1175_v51 }
 0x3f3   : > { %2365 = vmatmul.msk.bf16.vlgmr.msra.gmra.mxu2 %vm834_vm13, %v1205_v52 }
 0x468   : > { %v3019_v31 = vpop.f32.mrf.mxu0  ;;  %v3021_v53 = vpop.f32.mrf.mxu1 }
 0x469   : > { %1307 = vperm.xlu0 %2444, %v3021_v53   ;;  %1224 = vperm.xlu2 %2443, %v3021_v53  }
 0x470   : > { %v3025_v55 = vpop.f32.mrf.mxu0  ;;  %v3027_v54 = vpop.f32.mrf.mxu1 }
 0x471   : > { %v3031_v56 = vpack.c.bf16 %v3025_v55, %v3019_v31  ;;  %2447 = vset.pattern.permute.xlu2 %v2628_v11  ;;  %1229 = vperm.xlu1 %2445, %v3027_v54   ;;  %v1236_v11 = vstv %s3046_s23 }
 0x472   : > { %1311 = vperm.xlu2 %2447, %v3027_v54   ;;  %2451 = vset.pattern.permute.xlu0 %v2625_v9  ;;  %v1237_v60 = vmul.f32 %v1236_v11, %v2865_v33  ;;  %v1238_v37 = vmul.f32 %v1236_v11, %v2894_v57 }
 0x473   : > { %1293 = vmatpush.bf16.msra.mxu3 %v3031_v56 }
 0x476   : > { %v3038_v43 = vpop.f32.mrf.mxu2 }
 0x477   : > { %v1232_v59 = vperm.slane %v3038_v43, 0  ;;  %v1314_v1 = vperm.slane %v3038_v43, 1  ;;  %v1393_v21 = vperm.slane %v3038_v43, 2 }
 0x479   : > { %2446 = vset.pattern.permute.xlu1 %v2627_v10 }
 0x47a   : > { %2448 = vset.pattern.permute.xlu2 %v2627_v10  ;;  %1386 = vperm.xlu1 %2446, %v3021_v53  }
 0x47b   : > { %1390 = vperm.xlu2 %2448, %v3027_v54  }
 0x47e   : > { %v1220_v58 = vpop.f32.mrf.mxu2 }
 0x482   : > { %2450 = vset.pattern.permute.xlu1 %v2625_v9 }
 0x483   : > { %2449 = vset.pattern.permute.xlu2 %v2625_v9  ;;  %v1320_v9 = vmul.f32 %v1318_v63, %v2894_v57  ;;  %v1398_v57 = vmul.f32 %v1397_v22, %v2865_v33 }
 0x4c3   : > { %v1225_v61 = vpop.permute.xlu2 %1224 }
 0x4c4   : > { %v1233_v10 = vadd.f32 %v1232_v59, %v1225_v61 }
 0x4c6   : > { %v1239_v62 = vadd.f32 %v1237_v60, %v1233_v10 }
 0x4c8   : > { %vm1241_vm7 = vcmp.gt.f32.partialorder %v1239_v62, 0.0  ;;  %v1243_v0 = vmul.f32 0.2, %v1239_v62 }
 0x4ca   : > { %v1245_v3 = vsel %vm1241_vm7, %v1239_v62, %v1243_v0 }
 0x4cb   : > { %v1247_v4 = vsel %vm669_vm14, %v1245_v3, -1e+30 }
 0x4cc   : > { %v1312_v5 = vpop.permute.xlu2 %1311  ;;  %v1249_v6 = vsel %vm910_vm0, %v1247_v4, -inf }
 0x4cd   : > { %v1316_v7 = vadd.f32 %v1314_v1, %v1312_v5  ;;  %1250 = vmax.xlane.f32.xlu1 %v1249_v6 }
 0x4cf   : > { %v1322_v8 = vadd.f32 %v1320_v9, %v1316_v7 }
 0x4d1   : > { %vm1324_vm8 = vcmp.gt.f32.partialorder %v1322_v8, 0.0  ;;  %v1326_v13 = vmul.f32 0.2, %v1322_v8 }
 0x4d3   : > { %v1328_v16 = vsel %vm1324_vm8, %v1322_v8, %v1326_v13 }
 0x4d4   : > { %v1330_v19 = vsel %vm670_vm3, %v1328_v16, -1e+30 }
 0x4d5   : > { %v1334_v20 = vsel %vm910_vm0, %v1330_v19, -inf  ;;  %v1391_v30 = vpop.permute.xlu2 %1390 }
 0x4d6   : > { %1335 = vmax.xlane.f32.xlu1 %v1334_v20  ;;  %v1395_v25 = vadd.f32 %v1393_v21, %v1391_v30 }
 0x4d8   : > { %v1401_v32 = vadd.f32 %v1399_v23, %v1395_v25 }
 0x4da   : > { %v1405_v41 = vmul.f32 0.2, %v1401_v32  ;;  %vm1403_vm10 = vcmp.gt.f32.partialorder %v1401_v32, 0.0 }
 0x4db   : > { %v1308_v24 = vpop.permute.xlu0 %1307 }
 0x4dc   : > { %v1315_v27 = vadd.f32 %v1314_v1, %v1308_v24  ;;  %v1407_v47 = vsel %vm1403_vm10, %v1401_v32, %v1405_v41 }
 0x4dd   : > { %v1409_v29 = vsel %vm670_vm3, %v1407_v47, -1e+30 }
 0x4de   : > { %v1321_v36 = vadd.f32 %v1319_v28, %v1315_v27  ;;  %v1413_v51 = vsel %vm910_vm0, %v1409_v29, -inf }
 0x4e0   : > { %vm1323_vm9 = vcmp.gt.f32.partialorder %v1321_v36, 0.0  ;;  %v1325_v26 = vmul.f32 0.2, %v1321_v36 }
 0x4e2   : > { %v1327_v40 = vsel %vm1323_vm9, %v1321_v36, %v1325_v26 }
 0x4e3   : > { %v1230_v35 = vpop.permute.xlu1 %1229  ;;  %v1329_v42 = vsel %vm669_vm14, %v1327_v40, -1e+30 }
 0x4e4   : > { %v1234_v44 = vadd.f32 %v1232_v59, %v1230_v35  ;;  %v1331_v45 = vsel %vm910_vm0, %v1329_v42, -inf }
 0x4e5   : > { %1332 = vmax.xlane.f32.xlu2 %v1331_v45 }
 0x4e6   : > { %v1240_v46 = vadd.f32 %v1238_v37, %v1234_v44 }
 0x4e8   : > { %vm1242_vm11 = vcmp.gt.f32.partialorder %v1240_v46, 0.0  ;;  %v1244_v48 = vmul.f32 0.2, %v1240_v46 }
 0x4ea   : > { %v1246_v49 = vsel %vm1242_vm11, %v1240_v46, %v1244_v48 }
 0x4eb   : > { %v1248_v17 = vsel %vm670_vm3, %v1246_v49, -1e+30 }
 0x4ec   : > { %v1387_v50 = vpop.permute.xlu1 %1386  ;;  %v1252_v52 = vsel %vm910_vm0, %v1248_v17, -inf }
 0x4ed   : > { %v1394_v43 = vadd.f32 %v1393_v21, %v1387_v50  ;;  %1414 = vmax.xlane.f32.xlu2 %v1413_v51  ;;  %1253 = vmax.xlane.f32.xlu0 %v1252_v52 }
 0x4ef   : > { %v1400_v58 = vadd.f32 %v1398_v57, %v1394_v43 }
 0x4f1   : > { %vm1402_vm12 = vcmp.gt.f32.partialorder %v1400_v58, 0.0  ;;  %v1404_v11 = vmul.f32 0.2, %v1400_v58 }
 0x4f3   : > { %v1406_v59 = vsel %vm1402_vm12, %v1400_v58, %v1404_v11 }
 0x4f4   : > { %v1408_v60 = vsel %vm669_vm14, %v1406_v59, -1e+30  ;;  %vm1507_vm14 = vcmask 123905  }
 0x4f5   : > { %v1410_v33 = vsel %vm910_vm0, %v1408_v60, -inf }
 0x4f6   : > { %1411 = vmax.xlane.f32.xlu0 %v1410_v33 }
 0x540   : > { %v1251_v2 = vpop.xlane.xlu1 %1250 }
 0x541   : > { %v1255_v61 = vsub.f32 %v1247_v4, %v1251_v2 }
 0x543   : > { %v1257_v10 = vmul.f32 1.442695, %v1255_v61 }
 0x545   : > { %2491 = vpow2.f32 %v1257_v10 }
 0x549   : > { %v1336_v62 = vpop.xlane.xlu1 %1335 }
 0x54a   : > { %v1338_v63 = vsub.f32 %v1330_v19, %v1336_v62 }
 0x54b   : > { %v3079_v0 = vpop.eup %2491 }
 0x54c   : > { %v1341_v1 = vmul.f32 1.442695, %v1338_v63  ;;  %v1261_v3 = vsel %vm910_vm0, %v3079_v0, 0.0 }
 0x54d   : > { %1262 = vadd.xlane.f32.xlu1 %v1261_v3 }
 0x54e   : > { %2493 = vpow2.f32 %v1341_v1  ;;  %v2457_v1 = vld [vmem:[%s3228_s16] ss:$0 sm:$0xff] }
 0x554   : > { %v2494_v9 = vpop.eup %2493 }
 0x555   : > { %v1346_v39 = vsel %vm910_vm0, %v2494_v9, 0.0 }
 0x556   : > { %1347 = vadd.xlane.f32.xlu1 %v1346_v39 }
 0x558   : > { %v1333_v5 = vpop.xlane.xlu2 %1332 }
 0x559   : > { %v1337_v6 = vsub.f32 %v1329_v42, %v1333_v5 }
 0x55b   : > { %v1339_v7 = vmul.f32 1.442695, %v1337_v6  ;;  %v2456_v6 = vld [vmem:[%s3228_s16 + $0x1] ss:$0 sm:$0xff] }
 0x55d   : > { %2495 = vpow2.f32 %v1339_v7 }
 0x560   : > { %v1415_v4 = vpop.xlane.xlu2 %1414  ;;  %v1254_v8 = vpop.xlane.xlu0 %1253 }
 0x561   : > { %v1417_v13 = vsub.f32 %v1409_v29, %v1415_v4  ;;  %v1256_v23 = vsub.f32 %v1248_v17, %v1254_v8 }
 0x563   : > { %v2496_v16 = vpop.eup %2495  ;;  %v1420_v19 = vmul.f32 1.442695, %v1417_v13  ;;  %v1259_v24 = vmul.f32 1.442695, %v1256_v23 }
 0x564   : > { %v1343_v20 = vsel %vm910_vm0, %v2496_v16, 0.0 }
 0x565   : > { %2497 = vpow2.f32 %v1420_v19  ;;  %1344 = vadd.xlane.f32.xlu2 %v1343_v20  ;;  %v2458_v19 = vld [vmem:[%s3228_s16 + $0x2] ss:$0 sm:$0xff] }
 0x569   : > { %v1412_v21 = vpop.xlane.xlu0 %1411 }
 0x56a   : > { %v1416_v22 = vsub.f32 %v1408_v60, %v1412_v21 }
 0x56b   : > { %v2498_v30 = vpop.eup %2497 }
 0x56c   : > { %v1418_v25 = vmul.f32 1.442695, %v1416_v22  ;;  %v1425_v28 = vsel %vm910_vm0, %v2498_v30, 0.0 }
 0x56d   : > { %1426 = vadd.xlane.f32.xlu2 %v1425_v28 }
 0x56e   : > { %2499 = vpow2.f32 %v1418_v25 }
 0x56f   : > { %1357 = vrot.lane.b32.xlu1 %v3031_v56, %s2626_s29  ;;  %2501 = vpow2.f32 %v1259_v24 }
 0x574   : > { %v2500_v27 = vpop.eup %2499 }
 0x575   : > { %v1422_v32 = vsel %vm910_vm0, %v2500_v27, 0.0  ;;  %v2502_v36 = vpop.eup %2501 }
 0x576   : > { %1423 = vadd.xlane.f32.xlu0 %v1422_v32  ;;  %v1264_v26 = vsel %vm910_vm0, %v2502_v36, 0.0 }
 0x577   : > { %1438 = vrot.lane.b32.xlu1 %v3021_v53, %s2626_s29 }
 0x57e   : > { %1265 = vadd.xlane.f32.xlu0 %v1264_v26 }
 0x585   : > { %1277 = vrot.lane.b32.xlu2 %v3019_v31, %s2631_s2 }
 0x58d   : > { %1440 = vrot.lane.b32.xlu2 %v3027_v54, %s2626_s29  ;;  %s2313_s29 = sshll.u32 %s2760_s27, 2 }
 0x58e   : > { %s3108_s26 = scalar_lea.vmem %s3242_s4, %s2313_s29  ;;  %s2634_s29 = smov 0.001  }
 0x58f   : > { %v3114_v3 = vld [vmem:[%s3108_s26] sm:$0x7] }
 0x590   : > { %v1533_v39 = vsel %vm1507_vm14, %v3114_v3, 0.0  ;;  %vm1528_vm7 = vcmp.gt.f32.partialorder %v3114_v3, 0.0 }
 0x592   : > { %1435 = vrot.lane.b32.xlu0 %v3031_v56, %s2630_s21  ;;  %s1563_s21 = smax.f32 %s2634_s29, %s3142_s25 }
 0x59a   : > { %1279 = vrot.lane.b32.xlu0 %v3025_v55, %s2631_s2  ;;  %s1515_s2 = smul.f32 6.0, %s1493_s1 }
 0x5c0   : > { %v1263_v37 = vpop.xlane.xlu1 %1262 }
 0x5c1   : > { %v1267_v29 = vmax.f32 %v1263_v37, 1e-20 }
 0x5c4   : > { %1534 = vadd.xlane.f32.xlu0 %v1533_v39 }
 0x5c9   : > { %v1348_v40 = vpop.xlane.xlu1 %1347 }
 0x5ca   : > { %v1350_v41 = vmax.f32 %v1348_v40, 1e-20 }
 0x5cc   : > { %2503 = vrcp.f32 %v1350_v41 }
 0x5d2   : > { %v2504_v44 = vpop.eup %2503 }
 0x5d3   : > { %v1354_v31 = vmul.f32 %v2504_v44, %v2494_v9 }
 0x5d8   : > { %v1345_v35 = vpop.xlane.xlu2 %1344 }
 0x5d9   : > { %v1349_v42 = vmax.f32 %v1345_v35, 1e-20 }
 0x5db   : > { %2505 = vrcp.f32 %v1349_v42 }
 0x5dc   : > { %2507 = vrcp.f32 %v1267_v29 }
 0x5e0   : > { %v1427_v57 = vpop.xlane.xlu2 %1426 }
 0x5e1   : > { %v2506_v45 = vpop.eup %2505  ;;  %v1358_v46 = vpop.permute.xlu1 %1357  ;;  %v1429_v50 = vmax.f32 %v1427_v57, 1e-20  ;;  %v1564_v57 = vstv %s1563_s21 }
 0x5e2   : > { %v1353_v47 = vmul.f32 %v2506_v45, %v2496_v16  ;;  %1370 = vmatpush.bf16.msrb.mxu0 %v1358_v46  ;;  %v2508_v51 = vpop.eup %2507 }
 0x5e3   : > { %v1271_v43 = vmul.f32 %v2508_v51, %v3079_v0 }
 0x5e4   : > { %v1355_v48 = vpack.c.bf16 %v1354_v31, %v1353_v47 }
 0x5e6   : > { %2369 = vmatmul.msk.bf16.vlgmr.msrb.gmra.mxu0 %vm910_vm0, %v1355_v48 }
 0x5e8   : > { %v1278_v63 = vpop.permute.xlu2 %1277 }
 0x5e9   : > { %v1424_v56 = vpop.xlane.xlu0 %1423  ;;  %v1439_v4 = vpop.permute.xlu1 %1438 }
 0x5ea   : > { %v1428_v17 = vmax.f32 %v1424_v56, 1e-20 }
 0x5f1   : > { %v1266_v49 = vpop.xlane.xlu0 %1265 }
 0x5f2   : > { %v1268_v55 = vmax.f32 %v1266_v49, 1e-20 }
 0x5f4   : > { %2509 = vrcp.f32 %v1268_v55 }
 0x5f5   : > { %2511 = vrcp.f32 %v1428_v17 }
 0x5f6   : > { %2513 = vrcp.f32 %v1429_v50 }
 0x5fa   : > { %v2510_v52 = vpop.eup %2509 }
 0x5fb   : > { %v1272_v58 = vmul.f32 %v2510_v52, %v2502_v36  ;;  %v2512_v59 = vpop.eup %2511 }
 0x5fc   : > { %v2514_v60 = vpop.eup %2513  ;;  %v1432_v33 = vmul.f32 %v2512_v59, %v2500_v27  ;;  %v1441_v27 = vpop.permute.xlu2 %1440 }
 0x5fd   : > { %v1273_v11 = vpack.c.bf16 %v1272_v58, %v1271_v43  ;;  %v1433_v2 = vmul.f32 %v2514_v60, %v2498_v30 }
 0x5ff   : > { %2367 = vmatmul.msk.bf16.vlgmr.msra.gmra.mxu3 %vm910_vm0, %v1273_v11  ;;  %v1434_v10 = vpack.c.bf16 %v1433_v2, %v1432_v33 }
 0x604   : > { %v1436_v61 = vpop.permute.xlu0 %1435 }
 0x605   : > { %1454 = vmatpush.bf16.msrb.mxu1 %v1436_v61 }
 0x608   : > { %2371 = vmatmul.msk.bf16.vlgmr.msrb.gmra.mxu1 %vm910_vm0, %v1434_v10 }
 0x60c   : > { %v1280_v22 = vpop.permute.xlu0 %1279 }
 0x637   : > { %v1535_v49 = vpop.xlane.xlu0 %1534 }
 0x638   : > { %v2373_v55 = vadd.f32 -0.001, %v1535_v49  ;;  %v1543_v51 = vmax.f32 %v1535_v49, 1.0 }
 0x63a   : > { %v1565_v17 = vmin.f32 %v2373_v55, %v1564_v57  ;;  %v1545_v43 = vrot.slane %v1543_v51, 1 }
 0x63c   : > { %v1566_v50 = vsub.f32 %v1535_v49, %v1565_v17  ;;  %vm1552_vm3 = vweird.f32 %v1545_v43 }
 0x63e   : > { %2515 = vrcp.f32 %v1566_v50  ;;  %v1578_v33 = vand.u32 2147483648, %v1566_v50  ;;  %v1576_v61 = vand.u32 2147483647, %v1566_v50 }
 0x63f   : > { %2517 = vrcp.f32 %v1545_v43 }
 0x640   : > { %vm1577_vm2 = vcmp.eq.f32.partialorder %v1576_v61, 8.507059e+37 }
 0x644   : > { %v2516_v52 = vpop.eup %2515 }
 0x645   : > { %v1568_v58 = vmul.f32 %v2516_v52, %v1566_v50  ;;  %v2518_v60 = vpop.eup %2517  ;;  %vm1573_vm0 = vweird.f32 %v2516_v52 }
 0x646   : > { %v1548_v10 = vmul.f32 %v2518_v60, %v1545_v43  ;;  %vm1553_vm4 = vweird.f32 %v2518_v60 }
 0x647   : > { %v1569_v11 = vsub.f32 1.0, %v1568_v58  ;;  %vm1554_vm5 = vmor %vm1552_vm3, %vm1553_vm4 }
 0x649   : > { %v1570_v59 = vmul.f32 %v2516_v52, %v1569_v11 }
 0x64b   : > { %v1571_v2 = vadd.f32 %v2516_v52, %v1570_v59 }
 0x663   : > { %v1372_v62 = vpop.f32.mrf.mxu0 }
 0x664   : > { %v1373_v5 = vadd.f32 %v1372_v62, %v3021_v53  ;;  %v1579_v62 = vor.u32 1.1754944e-38, %v1578_v33 }
 0x666   : > { %v1379_v21 = vadd.f32 %v2456_v6, %v1373_v5  ;;  %v1558_v5 = vand.u32 2147483648, %v1545_v43 }
 0x668   : > { %v1381_v24 = vmul.f32 %v1379_v21, %v2994_v18 }
 0x66b   : > { %v1374_v7 = vpop.f32.mrf.mxu0 }
 0x66c   : > { %v1375_v20 = vadd.f32 %v1374_v7, %v3027_v54  ;;  %v1556_v7 = vand.u32 2147483647, %v1545_v43 }
 0x66e   : > { %v1380_v25 = vadd.f32 %v2456_v6, %v1375_v20  ;;  %vm1557_vm6 = vcmp.eq.f32.partialorder %v1556_v7, 8.507059e+37 }
 0x670   : > { %v1382_v41 = vmul.f32 %v1380_v25, %v3004_v38 }
 0x682   : > { %v1295_v0 = vpop.f32.mrf.mxu3 }
 0x683   : > { %v1296_v9 = vadd.f32 %v1295_v0, %v1278_v63  ;;  %v1549_v0 = vsub.f32 1.0, %v1548_v10 }
 0x685   : > { %v1456_v8 = vpop.f32.mrf.mxu1  ;;  %v1302_v13 = vadd.f32 %v2457_v1, %v1296_v9  ;;  %v1550_v9 = vmul.f32 %v2518_v60, %v1549_v0 }
 0x686   : > { %v1457_v16 = vadd.f32 %v1456_v8, %v1439_v4  ;;  %v1559_v4 = vor.u32 1.1754944e-38, %v1558_v5 }
 0x687   : > { %v1304_v53 = vmul.f32 %v1302_v13, %v2819_v12  ;;  %v1551_v6 = vadd.f32 %v2518_v60, %v1550_v9 }
 0x688   : > { %v1463_v30 = vadd.f32 %v2458_v19, %v1457_v16 }
 0x689   : > { %v1383_v26 = vadd.f32 %v1381_v24, %v1304_v53  ;;  %v1555_v8 = vsel %vm1554_vm5, %v2518_v60, %v1551_v6 }
 0x68a   : > { %v1297_v23 = vpop.f32.mrf.mxu3  ;;  %v1465_v37 = vmul.f32 %v1463_v30, %v3002_v34  ;;  %v1471_v34 = vld [vmem:[%s3229_s17] sm:$0x3]  ;;  %v1560_v16 = vsel %vm1557_vm6, %v1559_v4, %v1555_v8 }
 0x68b   : > { %v1298_v28 = vadd.f32 %v1297_v23, %v1280_v22 }
 0x68c   : > { %v1467_v12 = vadd.f32 %v1465_v37, %v1383_v26 }
 0x68d   : > { %v1303_v32 = vadd.f32 %v2457_v1, %v1298_v28  ;;  %v1458_v36 = vpop.f32.mrf.mxu1 }
 0x68e   : > { %v1459_v40 = vadd.f32 %v1458_v36, %v1441_v27  ;;  %v1469_v46 = vmax.f32 %v1467_v12, 0.0 }
 0x68f   : > { %v1305_v54 = vmul.f32 %v1303_v32, %v2821_v14  ;;  %v1536_v14 = vrot.slane %v3114_v3, 1 }
 0x690   : > { %v1464_v35 = vadd.f32 %v2458_v19, %v1459_v40 }
 0x691   : > { %v1384_v42 = vadd.f32 %v1382_v41, %v1305_v54 }
 0x692   : > { %v1466_v44 = vmul.f32 %v1464_v35, %v3006_v15 }
 0x694   : > { %v1468_v45 = vadd.f32 %v1466_v44, %v1384_v42 }
 0x696   : > { %v1470_v18 = vmax.f32 %v1468_v45, 0.0 }
 0x698   : > { %v1472_v31 = vpack.c.bf16 %v1470_v18, %v1469_v46 }
 0x69a   : > { %v1477_v47 = vsel %vm834_vm13, %v1472_v31, 0 }
 0x69b   : > { %1486 = vmatpush.bf16.xpose.msrb.mxu2 %v1477_v47 }
 0x6a2   : > { %2372 = vmatmul.msk.bf16.vlgmr.msrb.gmra.mxu2 %vm834_vm13, %v1471_v34  ;;  %vm1572_vm13 = vweird.f32 %v1566_v50 }
 0x6a3   : > { %vm1574_vm1 = vmor %vm1572_vm13, %vm1573_vm0 }
 0x6a4   : > { %v1575_v63 = vsel %vm1574_vm1, %v2516_v52, %v1571_v2 }
 0x6a5   : > { %v1580_v1 = vsel %vm1577_vm2, %v1579_v62, %v1575_v63 }
 0x6a6   : > { %v1581_v39 = vmul.f32 %v1580_v1, %v1565_v17 }
 0x6a8   : > { %2519 = vlog2.f32 %v1581_v39 }
 0x6ae   : > { %v2520_v13 = vpop.eup %2519 }
 0x6af   : > { %v1583_v21 = vmul.f32 0.6931472, %v2520_v13 }
 0x725   : > { %v3138_v38 = vpop.f32.mrf.mxu2 }
 0x726   : > { %v1492_v15 = vmul.f32 4.0, %v3138_v38 }
 0x728   : > { %v1538_v48 = vmul.f32 %v1536_v14, %v1492_v15  ;;  %v1530_v30 = vrot.slane %v1492_v15, 7 }
 0x72a   : > { %v1540_v56 = vsel %vm1539_vm15, %v1538_v48, 0.0  ;;  %v3146_v23 = vsel %vm1528_vm7, %v1530_v30, -1e+30 }
 0x72b   : > { %1541 = vadd.xlane.f32.xlu1 %v1540_v56  ;;  %v3152_v56 = vstv %s3142_s25 }
 0x72d   : > { %v1490_v29 = vpop.f32.mrf.mxu2 }
 0x79e   : > { %v1542_v19 = vpop.xlane.xlu1 %1541 }
 0x79f   : > { %v1561_v20 = vmul.f32 %v1560_v16, %v1542_v19 }
 0x7a1   : > { %v1585_v22 = vrot.slane %v1561_v20, 7 }
 0x7a3   : > { %v1587_v53 = vsub.f32 %v1583_v21, %v1585_v22 }
 0x7a5   : > { %1590 = vperm.xlu2 %2449, %v1587_v53  }
 0x7ff   : > { %v1591_v25 = vpop.permute.xlu2 %1590 }
 0x800   : > { %v1593_v28 = vadd.f32 %v1591_v25, %v3146_v23 }
 0x802   : > { %v2374_v24 = vmul.f32 -1.442695, %v1593_v28 }
 0x804   : > { %2521 = vpow2.f32 %v2374_v24 }
 0x80a   : > { %v2522_v27 = vpop.eup %2521 }
 0x80b   : > { %v1597_v32 = vadd.f32 1.0, %v2522_v27 }
 0x80d   : > { %2523 = vrcp.f32 %v1597_v32  ;;  %v1609_v40 = vand.u32 2147483648, %v1597_v32  ;;  %v1607_v54 = vand.u32 2147483647, %v1597_v32  ;;  %vm1603_vm9 = vweird.f32 %v1597_v32 }
 0x80f   : > { %v1610_v3 = vor.u32 1.1754944e-38, %v1609_v40  ;;  %vm1608_vm11 = vcmp.eq.f32.partialorder %v1607_v54, 8.507059e+37 }
 0x813   : > { %v2524_v36 = vpop.eup %2523 }
 0x814   : > { %v1599_v26 = vmul.f32 %v2524_v36, %v1597_v32  ;;  %vm1604_vm8 = vweird.f32 %v2524_v36 }
 0x815   : > { %vm1605_vm10 = vmor %vm1603_vm9, %vm1604_vm8 }
 0x816   : > { %v1600_v37 = vsub.f32 1.0, %v1599_v26 }
 0x818   : > { %v1601_v41 = vmul.f32 %v2524_v36, %v1600_v37 }
 0x81a   : > { %v1602_v35 = vadd.f32 %v2524_v36, %v1601_v41 }
 0x81c   : > { %v1606_v42 = vsel %vm1605_vm10, %v2524_v36, %v1602_v35 }
 0x81d   : > { %v1611_v12 = vsel %vm1608_vm11, %v1610_v3, %v1606_v42 }
 0x81e   : > { %v1613_v44 = vsel %vm1507_vm14, %v1611_v12, 0.0  ;;  %v1618_v45 = vsub.f32 1.0, %v1611_v12 }
 0x81f   : > { %1614 = vadd.xlane.f32.xlu0 %v1613_v44 }
 0x820   : > { %v1619_v46 = vmul.f32 %v1618_v45, %v1611_v12 }
 0x822   : > { %v1620_v18 = vsel %vm1507_vm14, %v1619_v46, 0.0 }
 0x823   : > { %1621 = vadd.xlane.f32.xlu2 %v1620_v18 }
 0x892   : > { %v1615_v29 = vpop.xlane.xlu0 %1614 }
 0x893   : > { %v1617_v17 = vsub.f32 %v1615_v29, %v3152_v56 }
 0x895   : > { %v1641_v58 = vand.u32 2147483647, %v1617_v17 }
 0x896   : > { %v1622_v31 = vpop.xlane.xlu2 %1621 }
 0x897   : > { %v1623_v47 = vmax.f32 %v1622_v31, 1e-12  ;;  %vm1642_vm1 = vcmp.lt.f32.partialorder %v1641_v58, 1e-06 }
 0x899   : > { %2525 = vrcp.f32 %v1623_v47  ;;  %v1635_v48 = vand.u32 2147483648, %v1623_v47  ;;  %v1633_v55 = vand.u32 2147483647, %v1623_v47  ;;  %vm1629_vm15 = vweird.f32 %v1623_v47 }
 0x89b   : > { %v1636_v50 = vor.u32 1.1754944e-38, %v1635_v48  ;;  %vm1634_vm0 = vcmp.eq.f32.partialorder %v1633_v55, 8.507059e+37 }
 0x89f   : > { %v2526_v34 = vpop.eup %2525 }
 0x8a0   : > { %v1625_v14 = vmul.f32 %v2526_v34, %v1623_v47  ;;  %vm1630_vm12 = vweird.f32 %v2526_v34 }
 0x8a1   : > { %vm1631_vm13 = vmor %vm1629_vm15, %vm1630_vm12 }
 0x8a2   : > { %v1626_v15 = vsub.f32 1.0, %v1625_v14 }
 0x8a4   : > { %v1627_v49 = vmul.f32 %v2526_v34, %v1626_v15 }
 0x8a6   : > { %v1628_v57 = vadd.f32 %v2526_v34, %v1627_v49 }
 0x8a8   : > { %v1632_v51 = vsel %vm1631_vm13, %v2526_v34, %v1628_v57 }
 0x8a9   : > { %v1637_v52 = vsel %vm1634_vm0, %v1636_v50, %v1632_v51 }
 0x8aa   : > { %v1638_v43 = vmul.f32 %v1637_v52, %v1617_v17 }
 0x8ac   : > { %v2375_v11 = vclamps-f32 %v1638_v43, 2.0 }
 0x8ae   : > { %v1643_v59 = vsub.f32 %v1587_v53, %v2375_v11 }
 0x8b0   : > { %v1644_v60 = vsel %vm1642_vm1, %v1587_v53, %v1643_v59 }
 0x8b1   : > { %1647 = vperm.xlu1 %2450, %v1644_v60  }
 0x923   : > { %v1648_v33 = vpop.permute.xlu1 %1647 }
 0x924   : > { %v1650_v2 = vadd.f32 %v1648_v33, %v3146_v23 }
 0x926   : > { %v2376_v61 = vmul.f32 -1.442695, %v1650_v2 }
 0x928   : > { %2527 = vpow2.f32 %v2376_v61 }
 0x92e   : > { %v2528_v10 = vpop.eup %2527 }
 0x92f   : > { %v1654_v62 = vadd.f32 1.0, %v2528_v10 }
 0x931   : > { %2529 = vrcp.f32 %v1654_v62  ;;  %v1666_v9 = vand.u32 2147483648, %v1654_v62  ;;  %v1664_v5 = vand.u32 2147483647, %v1654_v62  ;;  %vm1660_vm3 = vweird.f32 %v1654_v62 }
 0x933   : > { %v1667_v7 = vor.u32 1.1754944e-38, %v1666_v9  ;;  %vm1665_vm5 = vcmp.eq.f32.partialorder %v1664_v5, 8.507059e+37 }
 0x937   : > { %v2530_v63 = vpop.eup %2529 }
 0x938   : > { %v1656_v0 = vmul.f32 %v2530_v63, %v1654_v62  ;;  %vm1661_vm2 = vweird.f32 %v2530_v63 }
 0x939   : > { %vm1662_vm4 = vmor %vm1660_vm3, %vm1661_vm2 }
 0x93a   : > { %v1657_v1 = vsub.f32 1.0, %v1656_v0 }
 0x93c   : > { %v1658_v39 = vmul.f32 %v2530_v63, %v1657_v1 }
 0x93e   : > { %v1659_v6 = vadd.f32 %v2530_v63, %v1658_v39 }
 0x940   : > { %v1663_v4 = vsel %vm1662_vm4, %v2530_v63, %v1659_v6 }
 0x941   : > { %v1668_v8 = vsel %vm1665_vm5, %v1667_v7, %v1663_v4 }
 0x942   : > { %v1670_v13 = vsel %vm1507_vm14, %v1668_v8, 0.0  ;;  %v1674_v16 = vsub.f32 1.0, %v1668_v8 }
 0x943   : > { %1671 = vadd.xlane.f32.xlu2 %v1670_v13 }
 0x944   : > { %v1675_v19 = vmul.f32 %v1674_v16, %v1668_v8 }
 0x946   : > { %v1676_v20 = vsel %vm1507_vm14, %v1675_v19, 0.0 }
 0x947   : > { %1677 = vadd.xlane.f32.xlu0 %v1676_v20 }
 0x9b6   : > { %v1672_v24 = vpop.xlane.xlu2 %1671 }
 0x9b7   : > { %v1673_v26 = vsub.f32 %v1672_v24, %v3152_v56 }
 0x9b9   : > { %v1697_v35 = vand.u32 2147483647, %v1673_v26 }
 0x9ba   : > { %v1678_v21 = vpop.xlane.xlu0 %1677 }
 0x9bb   : > { %v1679_v22 = vmax.f32 %v1678_v21, 1e-12  ;;  %vm1698_vm10 = vcmp.lt.f32.partialorder %v1697_v35, 1e-06 }
 0x9bd   : > { %2531 = vrcp.f32 %v1679_v22  ;;  %v1691_v28 = vand.u32 2147483648, %v1679_v22  ;;  %v1689_v32 = vand.u32 2147483647, %v1679_v22  ;;  %vm1685_vm7 = vweird.f32 %v1679_v22 }
 0x9bf   : > { %v1692_v37 = vor.u32 1.1754944e-38, %v1691_v28  ;;  %vm1690_vm9 = vcmp.eq.f32.partialorder %v1689_v32, 8.507059e+37 }
 0x9c3   : > { %v2532_v53 = vpop.eup %2531 }
 0x9c4   : > { %v1681_v30 = vmul.f32 %v2532_v53, %v1679_v22  ;;  %vm1686_vm6 = vweird.f32 %v2532_v53 }
 0x9c5   : > { %vm1687_vm8 = vmor %vm1685_vm7, %vm1686_vm6 }
 0x9c6   : > { %v1682_v25 = vsub.f32 1.0, %v1681_v30 }
 0x9c8   : > { %v1683_v27 = vmul.f32 %v2532_v53, %v1682_v25 }
 0x9ca   : > { %v1684_v36 = vadd.f32 %v2532_v53, %v1683_v27 }
 0x9cc   : > { %v1688_v40 = vsel %vm1687_vm8, %v2532_v53, %v1684_v36 }
 0x9cd   : > { %v1693_v41 = vsel %vm1690_vm9, %v1692_v37, %v1688_v40 }
 0x9ce   : > { %v1694_v54 = vmul.f32 %v1693_v41, %v1673_v26 }
 0x9d0   : > { %v2377_v3 = vclamps-f32 %v1694_v54, 2.0 }
 0x9d2   : > { %v1699_v42 = vsub.f32 %v1644_v60, %v2377_v3 }
 0x9d4   : > { %v1700_v12 = vsel %vm1698_vm10, %v1644_v60, %v1699_v42 }
 0x9d5   : > { %1703 = vperm.xlu0 %2451, %v1700_v12  }
 0xa47   : > { %v1704_v44 = vpop.permute.xlu0 %1703 }
 0xa48   : > { %v1706_v45 = vadd.f32 %v1704_v44, %v3146_v23 }
 0xa4a   : > { %v2378_v46 = vmul.f32 -1.442695, %v1706_v45 }
 0xa4c   : > { %2533 = vpow2.f32 %v2378_v46 }
 0xa52   : > { %v2534_v18 = vpop.eup %2533 }
 0xa53   : > { %v1710_v31 = vadd.f32 1.0, %v2534_v18 }
 0xa55   : > { %2535 = vrcp.f32 %v1710_v31  ;;  %v1722_v15 = vand.u32 2147483648, %v1710_v31  ;;  %v1720_v29 = vand.u32 2147483647, %v1710_v31  ;;  %vm1716_vm12 = vweird.f32 %v1710_v31 }
 0xa57   : > { %v1723_v55 = vor.u32 1.1754944e-38, %v1722_v15  ;;  %vm1721_vm13 = vcmp.eq.f32.partialorder %v1720_v29, 8.507059e+37 }
 0xa5b   : > { %v2536_v47 = vpop.eup %2535 }
 0xa5c   : > { %v1712_v34 = vmul.f32 %v2536_v47, %v1710_v31  ;;  %vm1717_vm11 = vweird.f32 %v2536_v47 }
 0xa5d   : > { %vm1718_vm15 = vmor %vm1716_vm12, %vm1717_vm11 }
 0xa5e   : > { %v1713_v14 = vsub.f32 1.0, %v1712_v34 }
 0xa60   : > { %v1714_v48 = vmul.f32 %v2536_v47, %v1713_v14 }
 0xa62   : > { %v1715_v49 = vadd.f32 %v2536_v47, %v1714_v48 }
 0xa64   : > { %v1719_v57 = vsel %vm1718_vm15, %v2536_v47, %v1715_v49 }
 0xa65   : > { %v1724_v17 = vsel %vm1721_vm13, %v1723_v55, %v1719_v57 }
 0xa66   : > { %v1726_v50 = vsel %vm1507_vm14, %v1724_v17, 0.0  ;;  %v1730_v51 = vsub.f32 1.0, %v1724_v17 }
 0xa67   : > { %1727 = vadd.xlane.f32.xlu1 %v1726_v50 }
 0xa68   : > { %v1731_v52 = vmul.f32 %v1730_v51, %v1724_v17 }
 0xa6a   : > { %v1732_v43 = vsel %vm1507_vm14, %v1731_v52, 0.0 }
 0xa6b   : > { %1733 = vadd.xlane.f32.xlu2 %v1732_v43 }
 0xada   : > { %v1728_v61 = vpop.xlane.xlu1 %1727 }
 0xadb   : > { %v1729_v0 = vsub.f32 %v1728_v61, %v3152_v56 }
 0xadd   : > { %v1753_v6 = vand.u32 2147483647, %v1729_v0 }
 0xade   : > { %v1734_v58 = vpop.xlane.xlu2 %1733 }
 0xadf   : > { %v1735_v11 = vmax.f32 %v1734_v58, 1e-12  ;;  %vm1754_vm4 = vcmp.lt.f32.partialorder %v1753_v6, 1e-06 }
 0xae1   : > { %2537 = vrcp.f32 %v1735_v11  ;;  %v1747_v2 = vand.u32 2147483648, %v1735_v11  ;;  %v1745_v62 = vand.u32 2147483647, %v1735_v11  ;;  %vm1741_vm1 = vweird.f32 %v1735_v11 }
 0xae3   : > { %v1748_v1 = vor.u32 1.1754944e-38, %v1747_v2  ;;  %vm1746_vm3 = vcmp.eq.f32.partialorder %v1745_v62, 8.507059e+37 }
 0xae7   : > { %v2538_v59 = vpop.eup %2537 }
 0xae8   : > { %v1737_v60 = vmul.f32 %v2538_v59, %v1735_v11  ;;  %vm1742_vm0 = vweird.f32 %v2538_v59 }
 0xae9   : > { %vm1743_vm2 = vmor %vm1741_vm1, %vm1742_vm0 }
 0xaea   : > { %v1738_v33 = vsub.f32 1.0, %v1737_v60 }
 0xaec   : > { %v1739_v10 = vmul.f32 %v2538_v59, %v1738_v33 }
 0xaee   : > { %v1740_v63 = vadd.f32 %v2538_v59, %v1739_v10 }
 0xaf0   : > { %v1744_v9 = vsel %vm1743_vm2, %v2538_v59, %v1740_v63 }
 0xaf1   : > { %v1749_v39 = vsel %vm1746_vm3, %v1748_v1, %v1744_v9 }
 0xaf2   : > { %v1750_v5 = vmul.f32 %v1749_v39, %v1729_v0 }
 0xaf4   : > { %v2379_v7 = vclamps-f32 %v1750_v5, 2.0 }
 0xaf6   : > { %v1755_v4 = vsub.f32 %v1700_v12, %v2379_v7 }
 0xaf8   : > { %v1756_v8 = vsel %vm1754_vm4, %v1700_v12, %v1755_v4 }
 0xaf9   : > { %1759 = vperm.xlu2 %2449, %v1756_v8  }
 0xb53   : > { %v1760_v13 = vpop.permute.xlu2 %1759 }
 0xb54   : > { %v1762_v16 = vadd.f32 %v1760_v13, %v3146_v23 }
 0xb56   : > { %v2380_v19 = vmul.f32 -1.442695, %v1762_v16 }
 0xb58   : > { %2539 = vpow2.f32 %v2380_v19 }
 0xb5e   : > { %v2540_v20 = vpop.eup %2539 }
 0xb5f   : > { %v1766_v21 = vadd.f32 1.0, %v2540_v20 }
 0xb61   : > { %2541 = vrcp.f32 %v1766_v21  ;;  %v1778_v25 = vand.u32 2147483648, %v1766_v21  ;;  %v1776_v24 = vand.u32 2147483647, %v1766_v21  ;;  %vm1772_vm6 = vweird.f32 %v1766_v21 }
 0xb63   : > { %v1779_v32 = vor.u32 1.1754944e-38, %v1778_v25  ;;  %vm1777_vm8 = vcmp.eq.f32.partialorder %v1776_v24, 8.507059e+37 }
 0xb67   : > { %v2542_v22 = vpop.eup %2541 }
 0xb68   : > { %v1768_v53 = vmul.f32 %v2542_v22, %v1766_v21  ;;  %vm1773_vm5 = vweird.f32 %v2542_v22 }
 0xb69   : > { %vm1774_vm7 = vmor %vm1772_vm6, %vm1773_vm5 }
 0xb6a   : > { %v1769_v30 = vsub.f32 1.0, %v1768_v53 }
 0xb6c   : > { %v1770_v28 = vmul.f32 %v2542_v22, %v1769_v30 }
 0xb6e   : > { %v1771_v27 = vadd.f32 %v2542_v22, %v1770_v28 }
 0xb70   : > { %v1775_v36 = vsel %vm1774_vm7, %v2542_v22, %v1771_v27 }
 0xb71   : > { %v1780_v26 = vsel %vm1777_vm8, %v1779_v32, %v1775_v36 }
 0xb72   : > { %v1782_v37 = vsel %vm1507_vm14, %v1780_v26, 0.0  ;;  %v1786_v40 = vsub.f32 1.0, %v1780_v26 }
 0xb73   : > { %1783 = vadd.xlane.f32.xlu0 %v1782_v37 }
 0xb74   : > { %v1787_v41 = vmul.f32 %v1786_v40, %v1780_v26 }
 0xb76   : > { %v1788_v54 = vsel %vm1507_vm14, %v1787_v41, 0.0 }
 0xb77   : > { %1789 = vadd.xlane.f32.xlu2 %v1788_v54 }
 0xbe6   : > { %v1784_v46 = vpop.xlane.xlu0 %1783 }
 0xbe7   : > { %v1785_v34 = vsub.f32 %v1784_v46, %v3152_v56 }
 0xbe9   : > { %v1809_v49 = vand.u32 2147483647, %v1785_v34 }
 0xbea   : > { %v1790_v35 = vpop.xlane.xlu2 %1789 }
 0xbeb   : > { %v1791_v3 = vmax.f32 %v1790_v35, 1e-12  ;;  %vm1810_vm15 = vcmp.lt.f32.partialorder %v1809_v49, 1e-06 }
 0xbed   : > { %2543 = vrcp.f32 %v1791_v3  ;;  %v1803_v45 = vand.u32 2147483648, %v1791_v3  ;;  %v1801_v31 = vand.u32 2147483647, %v1791_v3  ;;  %vm1797_vm10 = vweird.f32 %v1791_v3 }
 0xbef   : > { %v1804_v14 = vor.u32 1.1754944e-38, %v1803_v45  ;;  %vm1802_vm12 = vcmp.eq.f32.partialorder %v1801_v31, 8.507059e+37 }
 0xbf3   : > { %v2544_v42 = vpop.eup %2543 }
 0xbf4   : > { %v1793_v12 = vmul.f32 %v2544_v42, %v1791_v3  ;;  %vm1798_vm9 = vweird.f32 %v2544_v42 }
 0xbf5   : > { %vm1799_vm11 = vmor %vm1797_vm10, %vm1798_vm9 }
 0xbf6   : > { %v1794_v44 = vsub.f32 1.0, %v1793_v12 }
 0xbf8   : > { %v1795_v18 = vmul.f32 %v2544_v42, %v1794_v44 }
 0xbfa   : > { %v1796_v47 = vadd.f32 %v2544_v42, %v1795_v18 }
 0xbfc   : > { %v1800_v15 = vsel %vm1799_vm11, %v2544_v42, %v1796_v47 }
 0xbfd   : > { %v1805_v48 = vsel %vm1802_vm12, %v1804_v14, %v1800_v15 }
 0xbfe   : > { %v1806_v29 = vmul.f32 %v1805_v48, %v1785_v34 }
 0xc00   : > { %v2381_v55 = vclamps-f32 %v1806_v29, 2.0 }
 0xc02   : > { %v1811_v57 = vsub.f32 %v1756_v8, %v2381_v55 }
 0xc04   : > { %v1812_v17 = vsel %vm1810_vm15, %v1756_v8, %v1811_v57 }
 0xc05   : > { %1815 = vperm.xlu1 %2450, %v1812_v17  }
 0xc77   : > { %v1816_v50 = vpop.permute.xlu1 %1815 }
 0xc78   : > { %v1818_v51 = vadd.f32 %v1816_v50, %v3146_v23 }
 0xc7a   : > { %v2382_v52 = vmul.f32 -1.442695, %v1818_v51 }
 0xc7c   : > { %2545 = vpow2.f32 %v2382_v52 }
 0xc82   : > { %v2546_v43 = vpop.eup %2545 }
 0xc83   : > { %v1822_v58 = vadd.f32 1.0, %v2546_v43 }
 0xc85   : > { %2547 = vrcp.f32 %v1822_v58  ;;  %v1834_v33 = vand.u32 2147483648, %v1822_v58  ;;  %v1832_v61 = vand.u32 2147483647, %v1822_v58  ;;  %vm1828_vm0 = vweird.f32 %v1822_v58 }
 0xc87   : > { %v1835_v62 = vor.u32 1.1754944e-38, %v1834_v33  ;;  %vm1833_vm2 = vcmp.eq.f32.partialorder %v1832_v61, 8.507059e+37 }
 0xc8b   : > { %v2548_v11 = vpop.eup %2547 }
 0xc8c   : > { %v1824_v59 = vmul.f32 %v2548_v11, %v1822_v58  ;;  %vm1829_vm13 = vweird.f32 %v2548_v11 }
 0xc8d   : > { %vm1830_vm1 = vmor %vm1828_vm0, %vm1829_vm13 }
 0xc8e   : > { %v1825_v60 = vsub.f32 1.0, %v1824_v59 }
 0xc90   : > { %v1826_v2 = vmul.f32 %v2548_v11, %v1825_v60 }
 0xc92   : > { %v1827_v10 = vadd.f32 %v2548_v11, %v1826_v2 }
 0xc94   : > { %v1831_v63 = vsel %vm1830_vm1, %v2548_v11, %v1827_v10 }
 0xc95   : > { %v1836_v0 = vsel %vm1833_vm2, %v1835_v62, %v1831_v63 }
 0xc96   : > { %v1838_v1 = vsel %vm1507_vm14, %v1836_v0, 0.0  ;;  %v1842_v9 = vsub.f32 1.0, %v1836_v0 }
 0xc97   : > { %1839 = vadd.xlane.f32.xlu2 %v1838_v1 }
 0xc98   : > { %v1843_v39 = vmul.f32 %v1842_v9, %v1836_v0 }
 0xc9a   : > { %v1844_v5 = vsel %vm1507_vm14, %v1843_v39, 0.0 }
 0xc9b   : > { %1845 = vadd.xlane.f32.xlu1 %v1844_v5 }
 0xd0a   : > { %v1840_v19 = vpop.xlane.xlu2 %1839 }
 0xd0b   : > { %v1841_v53 = vsub.f32 %v1840_v19, %v3152_v56 }
 0xd0d   : > { %v1865_v27 = vand.u32 2147483647, %v1841_v53 }
 0xd0e   : > { %v1846_v6 = vpop.xlane.xlu1 %1845 }
 0xd0f   : > { %v1847_v7 = vmax.f32 %v1846_v6, 1e-12  ;;  %vm1866_vm7 = vcmp.lt.f32.partialorder %v1865_v27, 1e-06 }
 0xd11   : > { %2549 = vrcp.f32 %v1847_v7  ;;  %v1859_v16 = vand.u32 2147483648, %v1847_v7  ;;  %v1857_v21 = vand.u32 2147483647, %v1847_v7  ;;  %vm1853_vm4 = vweird.f32 %v1847_v7 }
 0xd13   : > { %v1860_v30 = vor.u32 1.1754944e-38, %v1859_v16  ;;  %vm1858_vm6 = vcmp.eq.f32.partialorder %v1857_v21, 8.507059e+37 }
 0xd17   : > { %v2550_v4 = vpop.eup %2549 }
 0xd18   : > { %v1849_v8 = vmul.f32 %v2550_v4, %v1847_v7  ;;  %vm1854_vm3 = vweird.f32 %v2550_v4 }
 0xd19   : > { %vm1855_vm5 = vmor %vm1853_vm4, %vm1854_vm3 }
 0xd1a   : > { %v1850_v13 = vsub.f32 1.0, %v1849_v8 }
 0xd1c   : > { %v1851_v20 = vmul.f32 %v2550_v4, %v1850_v13 }
 0xd1e   : > { %v1852_v22 = vadd.f32 %v2550_v4, %v1851_v20 }
 0xd20   : > { %v1856_v25 = vsel %vm1855_vm5, %v2550_v4, %v1852_v22 }
 0xd21   : > { %v1861_v28 = vsel %vm1858_vm6, %v1860_v30, %v1856_v25 }
 0xd22   : > { %v1862_v24 = vmul.f32 %v1861_v28, %v1841_v53 }
 0xd24   : > { %v2383_v32 = vclamps-f32 %v1862_v24, 2.0 }
 0xd26   : > { %v1867_v36 = vsub.f32 %v1812_v17, %v2383_v32 }
 0xd28   : > { %v1868_v26 = vsel %vm1866_vm7, %v1812_v17, %v1867_v36 }
 0xd29   : > { %1871 = vperm.xlu0 %2451, %v1868_v26  }
 0xd9b   : > { %v1872_v37 = vpop.permute.xlu0 %1871 }
 0xd9c   : > { %v1874_v40 = vadd.f32 %v1872_v37, %v3146_v23 }
 0xd9e   : > { %v2384_v41 = vmul.f32 -1.442695, %v1874_v40 }
 0xda0   : > { %2551 = vpow2.f32 %v2384_v41 }
 0xda6   : > { %v2552_v54 = vpop.eup %2551 }
 0xda7   : > { %v1878_v35 = vadd.f32 1.0, %v2552_v54 }
 0xda9   : > { %2553 = vrcp.f32 %v1878_v35  ;;  %v1890_v44 = vand.u32 2147483648, %v1878_v35  ;;  %v1888_v46 = vand.u32 2147483647, %v1878_v35  ;;  %vm1884_vm9 = vweird.f32 %v1878_v35 }
 0xdab   : > { %v1891_v31 = vor.u32 1.1754944e-38, %v1890_v44  ;;  %vm1889_vm11 = vcmp.eq.f32.partialorder %v1888_v46, 8.507059e+37 }
 0xdaf   : > { %v2554_v3 = vpop.eup %2553 }
 0xdb0   : > { %v1880_v42 = vmul.f32 %v2554_v3, %v1878_v35  ;;  %vm1885_vm8 = vweird.f32 %v2554_v3 }
 0xdb1   : > { %vm1886_vm10 = vmor %vm1884_vm9, %vm1885_vm8 }
 0xdb2   : > { %v1881_v12 = vsub.f32 1.0, %v1880_v42 }
 0xdb4   : > { %v1882_v45 = vmul.f32 %v2554_v3, %v1881_v12 }
 0xdb6   : > { %v1883_v18 = vadd.f32 %v2554_v3, %v1882_v45 }
 0xdb8   : > { %v1887_v47 = vsel %vm1886_vm10, %v2554_v3, %v1883_v18 }
 0xdb9   : > { %v1892_v34 = vsel %vm1889_vm11, %v1891_v31, %v1887_v47 }
 0xdba   : > { %v1898_v14 = vsub.f32 1.0, %v1892_v34  ;;  %v1894_v29 = vsel %vm1507_vm14, %v1892_v34, 0.0 }
 0xdbc   : > { %v1899_v15 = vmul.f32 %v1898_v14, %v1892_v34 }
 0xdbe   : > { %v1900_v48 = vsel %vm1507_vm14, %v1899_v15, 0.0 }
 0xdbf   : > { %1901 = vadd.xlane.f32.xlu2 %v1900_v48 }
 0xdc7   : > { %1895 = vadd.xlane.f32.xlu2 %v1894_v29 }
 0xe32   : > { %v1902_v49 = vpop.xlane.xlu2 %1901 }
 0xe33   : > { %v1903_v55 = vmax.f32 %v1902_v49, 1e-12 }
 0xe35   : > { %2555 = vrcp.f32 %v1903_v55  ;;  %v1915_v51 = vand.u32 2147483648, %v1903_v55  ;;  %v1913_v43 = vand.u32 2147483647, %v1903_v55  ;;  %vm1909_vm15 = vweird.f32 %v1903_v55 }
 0xe37   : > { %v1916_v59 = vor.u32 1.1754944e-38, %v1915_v51  ;;  %vm1914_vm0 = vcmp.eq.f32.partialorder %v1913_v43, 8.507059e+37 }
 0xe3a   : > { %v1896_v58 = vpop.xlane.xlu2 %1895 }
 0xe3b   : > { %v2556_v57 = vpop.eup %2555  ;;  %v1897_v60 = vsub.f32 %v1896_v58, %v3152_v56 }
 0xe3c   : > { %v1905_v17 = vmul.f32 %v2556_v57, %v1903_v55  ;;  %vm1910_vm12 = vweird.f32 %v2556_v57 }
 0xe3d   : > { %vm1911_vm13 = vmor %vm1909_vm15, %vm1910_vm12  ;;  %v1921_v10 = vand.u32 2147483647, %v1897_v60 }
 0xe3e   : > { %v1906_v50 = vsub.f32 1.0, %v1905_v17 }
 0xe3f   : > { %vm1922_vm1 = vcmp.lt.f32.partialorder %v1921_v10, 1e-06 }
 0xe40   : > { %v1907_v52 = vmul.f32 %v2556_v57, %v1906_v50 }
 0xe42   : > { %v1908_v11 = vadd.f32 %v2556_v57, %v1907_v52 }
 0xe44   : > { %v1912_v33 = vsel %vm1911_vm13, %v2556_v57, %v1908_v11 }
 0xe45   : > { %v1917_v2 = vsel %vm1914_vm0, %v1916_v59, %v1912_v33 }
 0xe46   : > { %v1918_v61 = vmul.f32 %v1917_v2, %v1897_v60 }
 0xe48   : > { %v2385_v62 = vclamps-f32 %v1918_v61, 2.0 }
 0xe4a   : > { %v1923_v63 = vsub.f32 %v1868_v26, %v2385_v62 }
 0xe4c   : > { %v1924_v0 = vsel %vm1922_vm1, %v1868_v26, %v1923_v63 }
 0xe4d   : > { %1927 = vperm.xlu0 %2451, %v1924_v0  }
 0xebf   : > { %v1928_v1 = vpop.permute.xlu0 %1927 }
 0xec0   : > { %v1930_v9 = vadd.f32 %v1928_v1, %v3146_v23 }
 0xec2   : > { %v2386_v39 = vmul.f32 -1.442695, %v1930_v9 }
 0xec4   : > { %2557 = vpow2.f32 %v2386_v39 }
 0xeca   : > { %v2558_v5 = vpop.eup %2557 }
 0xecb   : > { %v1934_v6 = vadd.f32 1.0, %v2558_v5 }
 0xecd   : > { %2559 = vrcp.f32 %v1934_v6  ;;  %v1946_v13 = vand.u32 2147483648, %v1934_v6  ;;  %v1944_v19 = vand.u32 2147483647, %v1934_v6  ;;  %vm1940_vm3 = vweird.f32 %v1934_v6 }
 0xecf   : > { %v1947_v21 = vor.u32 1.1754944e-38, %v1946_v13  ;;  %vm1945_vm5 = vcmp.eq.f32.partialorder %v1944_v19, 8.507059e+37 }
 0xed3   : > { %v2560_v7 = vpop.eup %2559 }
 0xed4   : > { %v1936_v4 = vmul.f32 %v2560_v7, %v1934_v6  ;;  %vm1941_vm2 = vweird.f32 %v2560_v7 }
 0xed5   : > { %vm1942_vm4 = vmor %vm1940_vm3, %vm1941_vm2 }
 0xed6   : > { %v1937_v8 = vsub.f32 1.0, %v1936_v4 }
 0xed8   : > { %v1938_v16 = vmul.f32 %v2560_v7, %v1937_v8 }
 0xeda   : > { %v1939_v20 = vadd.f32 %v2560_v7, %v1938_v16 }
 0xedc   : > { %v1943_v22 = vsel %vm1942_vm4, %v2560_v7, %v1939_v20 }
 0xedd   : > { %v1948_v53 = vsel %vm1945_vm5, %v1947_v21, %v1943_v22 }
 0xede   : > { %v1950_v30 = vsel %vm1507_vm14, %v1948_v53, 0.0  ;;  %v1954_v25 = vsub.f32 1.0, %v1948_v53 }
 0xedf   : > { %1951 = vadd.xlane.f32.xlu0 %v1950_v30 }
 0xee0   : > { %v1955_v28 = vmul.f32 %v1954_v25, %v1948_v53 }
 0xee2   : > { %v1956_v24 = vsel %vm1507_vm14, %v1955_v28, 0.0 }
 0xee3   : > { %1957 = vadd.xlane.f32.xlu2 %v1956_v24 }
 0xf52   : > { %v1952_v41 = vpop.xlane.xlu0 %1951 }
 0xf53   : > { %v1953_v42 = vsub.f32 %v1952_v41, %v3152_v56 }
 0xf55   : > { %v1977_v18 = vand.u32 2147483647, %v1953_v42 }
 0xf56   : > { %v1958_v27 = vpop.xlane.xlu2 %1957 }
 0xf57   : > { %v1959_v32 = vmax.f32 %v1958_v27, 1e-12  ;;  %vm1978_vm10 = vcmp.lt.f32.partialorder %v1977_v18, 1e-06 }
 0xf59   : > { %2561 = vrcp.f32 %v1959_v32  ;;  %v1971_v40 = vand.u32 2147483648, %v1959_v32  ;;  %v1969_v35 = vand.u32 2147483647, %v1959_v32  ;;  %vm1965_vm7 = vweird.f32 %v1959_v32 }
 0xf5b   : > { %v1972_v12 = vor.u32 1.1754944e-38, %v1971_v40  ;;  %vm1970_vm9 = vcmp.eq.f32.partialorder %v1969_v35, 8.507059e+37 }
 0xf5f   : > { %v2562_v36 = vpop.eup %2561 }
 0xf60   : > { %v1961_v26 = vmul.f32 %v2562_v36, %v1959_v32  ;;  %vm1966_vm6 = vweird.f32 %v2562_v36 }
 0xf61   : > { %vm1967_vm8 = vmor %vm1965_vm7, %vm1966_vm6 }
 0xf62   : > { %v1962_v37 = vsub.f32 1.0, %v1961_v26 }
 0xf64   : > { %v1963_v54 = vmul.f32 %v2562_v36, %v1962_v37 }
 0xf66   : > { %v1964_v3 = vadd.f32 %v2562_v36, %v1963_v54 }
 0xf68   : > { %v1968_v44 = vsel %vm1967_vm8, %v2562_v36, %v1964_v3 }
 0xf69   : > { %v1973_v45 = vsel %vm1970_vm9, %v1972_v12, %v1968_v44 }
 0xf6a   : > { %v1974_v46 = vmul.f32 %v1973_v45, %v1953_v42 }
 0xf6c   : > { %v2387_v31 = vclamps-f32 %v1974_v46, 2.0 }
 0xf6e   : > { %v1979_v47 = vsub.f32 %v1924_v0, %v2387_v31 }
 0xf70   : > { %v1980_v34 = vsel %vm1978_vm10, %v1924_v0, %v1979_v47 }
 0xf71   : > { %1983 = vperm.xlu2 %2449, %v1980_v34  }
 0xfcb   : > { %v1984_v14 = vpop.permute.xlu2 %1983 }
 0xfcc   : > { %v1986_v15 = vadd.f32 %v1984_v14, %v3146_v23 }
 0xfce   : > { %v2388_v48 = vmul.f32 -1.442695, %v1986_v15 }
 0xfd0   : > { %2563 = vpow2.f32 %v2388_v48 }
 0xfd6   : > { %v2564_v29 = vpop.eup %2563 }
 0xfd7   : > { %v1990_v49 = vadd.f32 1.0, %v2564_v29 }
 0xfd9   : > { %2565 = vrcp.f32 %v1990_v49  ;;  %v2002_v50 = vand.u32 2147483648, %v1990_v49  ;;  %v2000_v52 = vand.u32 2147483647, %v1990_v49  ;;  %vm1996_vm12 = vweird.f32 %v1990_v49 }
 0xfdb   : > { %v2003_v58 = vor.u32 1.1754944e-38, %v2002_v50  ;;  %vm2001_vm13 = vcmp.eq.f32.partialorder %v2000_v52, 8.507059e+37 }
 0xfdf   : > { %v2566_v55 = vpop.eup %2565 }
 0xfe0   : > { %v1992_v57 = vmul.f32 %v2566_v55, %v1990_v49  ;;  %vm1997_vm11 = vweird.f32 %v2566_v55 }
 0xfe1   : > { %vm1998_vm15 = vmor %vm1996_vm12, %vm1997_vm11 }
 0xfe2   : > { %v1993_v17 = vsub.f32 1.0, %v1992_v57 }
 0xfe4   : > { %v1994_v51 = vmul.f32 %v2566_v55, %v1993_v17 }
 0xfe6   : > { %v1995_v43 = vadd.f32 %v2566_v55, %v1994_v51 }
 0xfe8   : > { %v1999_v11 = vsel %vm1998_vm15, %v2566_v55, %v1995_v43 }
 0xfe9   : > { %v2004_v59 = vsel %vm2001_vm13, %v2003_v58, %v1999_v11 }
 0xfea   : > { %v2010_v60 = vsub.f32 1.0, %v2004_v59  ;;  %v2006_v61 = vsel %vm1507_vm14, %v2004_v59, 0.0 }
 0xfec   : > { %v2011_v33 = vmul.f32 %v2010_v60, %v2004_v59  ;;  %v2587_v60 = vld [vmem:[%s3108_s26] sm:$0x7] }
 0xfee   : > { %v2012_v2 = vsel %vm1507_vm14, %v2011_v33, 0.0  ;;  %v1502_v33 = vsub.f32 1.0, %v2587_v60 }
 0xfef   : > { %2013 = vadd.xlane.f32.xlu1 %v2012_v2 }
 0xff0   : > { %v1504_v2 = vrot.slane %v1502_v33, 7 }
 0xff7   : > { %2007 = vadd.xlane.f32.xlu1 %v2006_v61  ;;  %v1506_v61 = vmul.f32 %v1504_v2, %v3138_v38 }
0x1062   : > { %v2014_v10 = vpop.xlane.xlu1 %2013 }
0x1063   : > { %v2015_v62 = vmax.f32 %v2014_v10, 1e-12  ;;  %v1508_v10 = vsel %vm1507_vm14, %v1506_v61, 0.0 }
0x1065   : > { %2567 = vrcp.f32 %v2015_v62  ;;  %v2027_v9 = vand.u32 2147483648, %v2015_v62  ;;  %v2025_v5 = vand.u32 2147483647, %v2015_v62  ;;  %vm2021_vm1 = vweird.f32 %v2015_v62 }
0x1067   : > { %v2028_v4 = vor.u32 1.1754944e-38, %v2027_v9  ;;  %vm2026_vm3 = vcmp.eq.f32.partialorder %v2025_v5, 8.507059e+37 }
0x106a   : > { %v2008_v6 = vpop.xlane.xlu1 %2007 }
0x106b   : > { %v2568_v63 = vpop.eup %2567  ;;  %v2009_v8 = vsub.f32 %v2008_v6, %v3152_v56 }
0x106c   : > { %v2017_v0 = vmul.f32 %v2568_v63, %v2015_v62  ;;  %vm2022_vm0 = vweird.f32 %v2568_v63 }
0x106d   : > { %vm2023_vm2 = vmor %vm2021_vm1, %vm2022_vm0  ;;  %v2033_v20 = vand.u32 2147483647, %v2009_v8 }
0x106e   : > { %v2018_v1 = vsub.f32 1.0, %v2017_v0 }
0x106f   : > { %vm2034_vm4 = vcmp.lt.f32.partialorder %v2033_v20, 1e-06 }
0x1070   : > { %v2019_v39 = vmul.f32 %v2568_v63, %v2018_v1 }
0x1072   : > { %v2020_v7 = vadd.f32 %v2568_v63, %v2019_v39 }
0x1074   : > { %v2024_v13 = vsel %vm2023_vm2, %v2568_v63, %v2020_v7 }
0x1075   : > { %v2029_v16 = vsel %vm2026_vm3, %v2028_v4, %v2024_v13  ;;  %vm1498_vm3 = vcmask 124930  }
0x1076   : > { %v2030_v19 = vmul.f32 %v2029_v16, %v2009_v8 }
0x1078   : > { %v2389_v21 = vclamps-f32 %v2030_v19, 2.0 }
0x107a   : > { %v2035_v22 = vsub.f32 %v1980_v34, %v2389_v21 }
0x107c   : > { %v2036_v53 = vsel %vm2034_vm4, %v1980_v34, %v2035_v22 }
0x107d   : > { %2039 = vperm.xlu2 %2449, %v2036_v53  }
0x10d7   : > { %v2040_v30 = vpop.permute.xlu2 %2039 }
0x10d8   : > { %v2042_v25 = vadd.f32 %v2040_v30, %v3146_v23 }
0x10da   : > { %v2390_v28 = vmul.f32 -1.442695, %v2042_v25  ;;  %v1495_v25 = vrot.slane %v2587_v60, 6 }
0x10dc   : > { %2569 = vpow2.f32 %v2390_v28  ;;  %v1497_v28 = vmul.f32 %v1495_v25, %v3138_v38 }
0x10e2   : > { %v2570_v24 = vpop.eup %2569 }
0x10e3   : > { %v2046_v27 = vadd.f32 1.0, %v2570_v24  ;;  %v1499_v24 = vsel %vm1498_vm3, %v1497_v28, 0.0 }
0x10e5   : > { %2571 = vrcp.f32 %v2046_v27  ;;  %v2058_v37 = vand.u32 2147483648, %v2046_v27  ;;  %v2056_v41 = vand.u32 2147483647, %v2046_v27  ;;  %vm2052_vm6 = vweird.f32 %v2046_v27 }
0x10e7   : > { %v2059_v35 = vor.u32 1.1754944e-38, %v2058_v37  ;;  %vm2057_vm8 = vcmp.eq.f32.partialorder %v2056_v41, 8.507059e+37 }
0x10eb   : > { %v2572_v32 = vpop.eup %2571 }
0x10ec   : > { %v2048_v36 = vmul.f32 %v2572_v32, %v2046_v27  ;;  %vm2053_vm5 = vweird.f32 %v2572_v32  ;;  %v2635_v27 = vmov 16.0  }
0x10ed   : > { %vm2054_vm7 = vmor %vm2052_vm6, %vm2053_vm5 }
0x10ee   : > { %v2049_v26 = vsub.f32 1.0, %v2048_v36 }
0x10f0   : > { %v2050_v40 = vmul.f32 %v2572_v32, %v2049_v26 }
0x10f2   : > { %v2051_v54 = vadd.f32 %v2572_v32, %v2050_v40 }
0x10f4   : > { %v2055_v3 = vsel %vm2054_vm7, %v2572_v32, %v2051_v54 }
0x10f5   : > { %v2060_v42 = vsel %vm2057_vm8, %v2059_v35, %v2055_v3 }
0x10f6   : > { %v2062_v12 = vsel %vm1507_vm14, %v2060_v42, 0.0  ;;  %v2066_v44 = vsub.f32 1.0, %v2060_v42 }
0x10f7   : > { %2063 = vadd.xlane.f32.xlu2 %v2062_v12 }
0x10f8   : > { %v2067_v45 = vmul.f32 %v2066_v44, %v2060_v42 }
0x10fa   : > { %v2068_v46 = vsel %vm1507_vm14, %v2067_v45, 0.0 }
0x10fb   : > { %2069 = vadd.xlane.f32.xlu1 %v2068_v46 }
0x116a   : > { %v2064_v48 = vpop.xlane.xlu2 %2063 }
0x116b   : > { %v2065_v57 = vsub.f32 %v2064_v48, %v3152_v56 }
0x116d   : > { %v2089_v43 = vand.u32 2147483647, %v2065_v57 }
0x116e   : > { %v2070_v18 = vpop.xlane.xlu1 %2069 }
0x116f   : > { %v2071_v31 = vmax.f32 %v2070_v18, 1e-12  ;;  %vm2090_vm15 = vcmp.lt.f32.partialorder %v2089_v43, 1e-06 }
0x1171   : > { %2573 = vrcp.f32 %v2071_v31  ;;  %v2083_v15 = vand.u32 2147483648, %v2071_v31  ;;  %v2081_v49 = vand.u32 2147483647, %v2071_v31  ;;  %vm2077_vm10 = vweird.f32 %v2071_v31 }
0x1173   : > { %v2084_v17 = vor.u32 1.1754944e-38, %v2083_v15  ;;  %vm2082_vm12 = vcmp.eq.f32.partialorder %v2081_v49, 8.507059e+37 }
0x1177   : > { %v2574_v47 = vpop.eup %2573 }
0x1178   : > { %v2073_v34 = vmul.f32 %v2574_v47, %v2071_v31  ;;  %vm2078_vm9 = vweird.f32 %v2574_v47 }
0x1179   : > { %vm2079_vm11 = vmor %vm2077_vm10, %vm2078_vm9  ;;  %vm1526_vm9 = vcmask 2050  }
0x117a   : > { %v2074_v14 = vsub.f32 1.0, %v2073_v34 }
0x117c   : > { %v2075_v29 = vmul.f32 %v2574_v47, %v2074_v14 }
0x117e   : > { %v2076_v55 = vadd.f32 %v2574_v47, %v2075_v29 }
0x1180   : > { %v2080_v50 = vsel %vm2079_vm11, %v2574_v47, %v2076_v55  ;;  %v1516_v47 = vstv %s1515_s2 }
0x1181   : > { %v2085_v51 = vsel %vm2082_vm12, %v2084_v17, %v2080_v50 }
0x1182   : > { %v2086_v52 = vmul.f32 %v2085_v51, %v2065_v57 }
0x1184   : > { %v2391_v58 = vclamps-f32 %v2086_v52, 2.0 }
0x1186   : > { %v2091_v11 = vsub.f32 %v2036_v53, %v2391_v58 }
0x1188   : > { %v3187_v59 = vsel %vm2090_vm15, %v2036_v53, %v2091_v11 }
0x1189   : > { %2095 = vperm.xlu1 %2450, %v3187_v59  }
0x11b3   : > { %1509 = vadd.xlane.f32.xlu1 %v1508_v10 }
0x11fb   : > { %v2096_v62 = vpop.permute.xlu1 %2095 }
0x11fc   : > { %v2098_v63 = vadd.f32 %v2096_v62, %v3146_v23 }
0x11fe   : > { %v2392_v0 = vmul.f32 -1.442695, %v2098_v63 }
0x1200   : > { %2575 = vpow2.f32 %v2392_v0 }
0x1206   : > { %v2576_v1 = vpop.eup %2575 }
0x1207   : > { %v2102_v9 = vadd.f32 1.0, %v2576_v1 }
0x1209   : > { %2577 = vrcp.f32 %v2102_v9  ;;  %v2114_v7 = vand.u32 2147483648, %v2102_v9  ;;  %v2112_v8 = vand.u32 2147483647, %v2102_v9  ;;  %vm2108_vm0 = vweird.f32 %v2102_v9 }
0x120a   : > { %2579 = vrcp.f32 %v2635_v27 }
0x120b   : > { %v2115_v16 = vor.u32 1.1754944e-38, %v2114_v7  ;;  %vm2113_vm2 = vcmp.eq.f32.partialorder %v2112_v8, 8.507059e+37 }
0x120f   : > { %v2578_v39 = vpop.eup %2577 }
0x1210   : > { %v2104_v5 = vmul.f32 %v2578_v39, %v2102_v9  ;;  %vm2109_vm13 = vweird.f32 %v2578_v39  ;;  %v2580_v32 = vpop.eup %2579 }
0x1211   : > { %vm2110_vm1 = vmor %vm2108_vm0, %vm2109_vm13  ;;  %v1519_v37 = vmul.f32 16.0, %v2580_v32  ;;  %vm1523_vm5 = vweird.f32 %v2580_v32 }
0x1212   : > { %v2105_v6 = vsub.f32 1.0, %v2104_v5 }
0x1213   : > { %v1520_v40 = vsub.f32 1.0, %v1519_v37 }
0x1214   : > { %v2106_v4 = vmul.f32 %v2578_v39, %v2105_v6 }
0x1215   : > { %v1521_v3 = vmul.f32 %v2580_v32, %v1520_v40 }
0x1216   : > { %v2107_v13 = vadd.f32 %v2578_v39, %v2106_v4 }
0x1217   : > { %v1522_v46 = vadd.f32 %v2580_v32, %v1521_v3 }
0x1218   : > { %v2111_v19 = vsel %vm2110_vm1, %v2578_v39, %v2107_v13 }
0x1219   : > { %v2116_v20 = vsel %vm2113_vm2, %v2115_v16, %v2111_v19  ;;  %v1524_v49 = vsel %vm1523_vm5, %v2580_v32, %v1522_v46 }
0x121a   : > { %v2122_v21 = vsub.f32 1.0, %v2116_v20  ;;  %v2118_v30 = vsel %vm1507_vm14, %v2116_v20, 0.0 }
0x121c   : > { %v2123_v22 = vmul.f32 %v2122_v21, %v2116_v20 }
0x121e   : > { %v2124_v53 = vsel %vm1507_vm14, %v2123_v22, 0.0 }
0x121f   : > { %2125 = vadd.xlane.f32.xlu0 %v2124_v53 }
0x1226   : > { %v1510_v42 = vpop.xlane.xlu1 %1509 }
0x1227   : > { %2119 = vadd.xlane.f32.xlu0 %v2118_v30  ;;  %v1512_v18 = vrot.slane %v1510_v42, 7 }
0x122f   : > { %1500 = vadd.xlane.f32.xlu0 %v1499_v24 }
0x1292   : > { %v2126_v36 = vpop.xlane.xlu0 %2125 }
0x1293   : > { %v2127_v26 = vmax.f32 %v2126_v36, 1e-12 }
0x1295   : > { %2581 = vrcp.f32 %v2127_v26  ;;  %v2139_v38 = vand.u32 2147483648, %v2127_v26  ;;  %v2137_v45 = vand.u32 2147483647, %v2127_v26  ;;  %vm2133_vm6 = vweird.f32 %v2127_v26 }
0x1297   : > { %v2140_v14 = vor.u32 1.1754944e-38, %v2139_v38  ;;  %vm2138_vm8 = vcmp.eq.f32.partialorder %v2137_v45, 8.507059e+37 }
0x129a   : > { %v2120_v41 = vpop.xlane.xlu0 %2119 }
0x129b   : > { %v2582_v54 = vpop.eup %2581  ;;  %v2121_v15 = vsub.f32 %v2120_v41, %v3152_v56 }
0x129c   : > { %v2129_v35 = vmul.f32 %v2582_v54, %v2127_v26  ;;  %vm2134_vm4 = vweird.f32 %v2582_v54 }
0x129d   : > { %vm2135_vm7 = vmor %vm2133_vm6, %vm2134_vm4  ;;  %v2145_v50 = vand.u32 2147483647, %v2121_v15 }
0x129e   : > { %v2130_v12 = vsub.f32 1.0, %v2129_v35 }
0x129f   : > { %vm2146_vm10 = vcmp.lt.f32.partialorder %v2145_v50, 1e-06 }
0x12a0   : > { %v2131_v44 = vmul.f32 %v2582_v54, %v2130_v12 }
0x12a2   : > { %v2132_v31 = vadd.f32 %v2582_v54, %v2131_v44  ;;  %v1501_v34 = vpop.xlane.xlu0 %1500 }
0x12a3   : > { %v1514_v48 = vadd.f32 %v1512_v18, %v1501_v34 }
0x12a4   : > { %v2136_v29 = vsel %vm2135_vm7, %v2582_v54, %v2132_v31 }
0x12a5   : > { %v2141_v55 = vsel %vm2138_vm8, %v2140_v14, %v2136_v29  ;;  %v1517_v57 = vadd.f32 %v1516_v47, %v1514_v48 }
0x12a6   : > { %v2142_v17 = vmul.f32 %v2141_v55, %v2121_v15 }
0x12a7   : > { %v1525_v51 = vmul.f32 %v1524_v49, %v1517_v57 }
0x12a8   : > { %v2393_v52 = vclamps-f32 %v2142_v17, 2.0 }
0x12a9   : > { %1527 = vst.msk [vmem:[%s659_s28 - $0x2] sm:$0x4] %vm1526_vm9, %v1525_v51 }
0x12aa   : > { %v2147_v43 = vsub.f32 %v3187_v59, %v2393_v52 }
0x12ac   : > { %v2148_v56 = vsel %vm2146_vm10, %v3187_v59, %v2147_v43 }
0x12ad   : > { %2151 = vperm.xlu0 %2451, %v2148_v56  }
0x131f   : > { %v2152_v58 = vpop.permute.xlu0 %2151 }
0x1320   : > { %v2154_v11 = vadd.f32 %v2152_v58, %v3146_v23 }
0x1322   : > { %v2394_v60 = vmul.f32 -1.442695, %v2154_v11 }
0x1324   : > { %2583 = vpow2.f32 %v2394_v60 }
0x132a   : > { %v2584_v33 = vpop.eup %2583 }
0x132b   : > { %v2158_v2 = vadd.f32 1.0, %v2584_v33 }
0x132d   : > { %2585 = vrcp.f32 %v2158_v2  ;;  %v2170_v63 = vand.u32 2147483648, %v2158_v2  ;;  %v2168_v1 = vand.u32 2147483647, %v2158_v2  ;;  %vm2164_vm12 = vweird.f32 %v2158_v2 }
0x132f   : > { %v2171_v23 = vor.u32 1.1754944e-38, %v2170_v63  ;;  %vm2169_vm13 = vcmp.eq.f32.partialorder %v2168_v1, 8.507059e+37 }
0x1333   : > { %v2586_v61 = vpop.eup %2585 }
0x1334   : > { %v2160_v10 = vmul.f32 %v2586_v61, %v2158_v2  ;;  %vm2165_vm11 = vweird.f32 %v2586_v61 }
0x1335   : > { %vm2166_vm15 = vmor %vm2164_vm12, %vm2165_vm11 }
0x1336   : > { %v2161_v62 = vsub.f32 1.0, %v2160_v10 }
0x1338   : > { %v2162_v0 = vmul.f32 %v2586_v61, %v2161_v62 }
0x133a   : > { %v2163_v9 = vadd.f32 %v2586_v61, %v2162_v0 }
0x133c   : > { %v2167_v59 = vsel %vm2166_vm15, %v2586_v61, %v2163_v9 }
0x133d   : > { %v2172_v39 = vsel %vm2169_vm13, %v2171_v23, %v2167_v59 }
0x133e   : > { %2174 = vst.msk [vmem:[%s656_s30 - $0x1] sm:$0x2] %vm1507_vm14, %v2172_v39 }
0x133f PF: > { %s43_s24 = sadd.s32 1, %s2620_s24  }
0x1340   : > { %p40_p4 = scmp.ge.s32.totalorder %s43_s24, 10  }
0x1342   :  { %42 = sbr.rel (!%p40_p4) target bundleno = 19 (0x13), region = 141 }

</bundles_post_ra>
